<compile_context>
chip_gen: v7x
topology: tpu7x:2x2x1
jax: 0.10.0
libtpu: 0.0.40
codegen_flags: <defaults>
</compile_context>

<pallas_src>
import jax
import jax.numpy as jnp
from jax import lax
from jax.experimental import pallas as pl
from jax.experimental.pallas import tpu as pltpu


def _round_up(v, m):
    return ((v + m - 1) // m) * m


# ---------------------------------------------------------------------------
# Fused kernel: all LSTM layers + FC head in one pallas_call, grid=(1,).
# ---------------------------------------------------------------------------
def _make_fused_kernel(num_layers, seq_len, b_pad, feat_pad):
    L, T, Bp, P = num_layers, seq_len, b_pad, feat_pad

    def kernel(x_ref, wih_ref, whh_ref, b_ref, fcw_ref, fcb_ref, out_ref,
               gx_sc, hseq_sc, h_sc, c_sc):
        # Layer-0 input: padded, bf16, flattened (T*Bp, P) sequence.
        inp = x_ref[...]

        for layer in range(L):                       # static unroll over layers
            # ---- hoisted input projection: one big MXU matmul over all steps
            gx_sc[...] = (
                jnp.dot(inp, wih_ref[layer], preferred_element_type=jnp.float32)
                + b_ref[layer]                       # combined b_ih + b_hh
            )

            h_sc[...] = jnp.zeros_like(h_sc)
            c_sc[...] = jnp.zeros_like(c_sc)
            whh_l = whh_ref[layer]                   # (P, 4P) bf16
            is_last = layer == L - 1

            # ---- time recurrence: only h_prev @ W_hh per step
            def step(t, carry, whh_l=whh_l, is_last=is_last):
                row = pl.multiple_of(t * Bp, Bp)
                h_prev = h_sc[...]
                gates = gx_sc[pl.ds(row, Bp), :] + jnp.dot(
                    h_prev.astype(jnp.bfloat16), whh_l,
                    preferred_element_type=jnp.float32)
                # PyTorch gate order (i, f, g, o); each slice is lane-aligned.
                i_g = jax.nn.sigmoid(gates[:, 0 * P:1 * P])
                f_g = jax.nn.sigmoid(gates[:, 1 * P:2 * P])
                g_g = jnp.tanh(gates[:, 2 * P:3 * P])
                o_g = jax.nn.sigmoid(gates[:, 3 * P:4 * P])
                c_new = f_g * c_sc[...] + i_g * g_g
                h_new = o_g * jnp.tanh(c_new)
                c_sc[...] = c_new
                h_sc[...] = h_new
                if not is_last:                      # last layer: only final h needed
                    hseq_sc[pl.ds(row, Bp), :] = h_new
                return carry

            lax.fori_loop(0, T, step, 0, unroll=True)

            if not is_last:
                inp = hseq_sc[...].astype(jnp.bfloat16)   # feed next layer

        # ---- fused FC head: out = h_last @ W_fc^T + b, lane-dense (Bp, 128)
        out_ref[...] = (
            jnp.dot(h_sc[...], fcw_ref[...], preferred_element_type=jnp.float32)
            + fcb_ref[...]
        ).astype(out_ref.dtype)

    return kernel


def _fused_call(x_packed, w_ih, w_hh, bias, fc_w, fc_b, num_layers, seq_len,
                b_pad, feat_pad):
    L, T, Bp, P = num_layers, seq_len, b_pad, feat_pad
    kernel = _make_fused_kernel(L, T, Bp, P)
    return pl.pallas_call(
        kernel,
        out_shape=jax.ShapeDtypeStruct((Bp, 128), jnp.float32),
        grid=(1,),
        in_specs=[
            pl.BlockSpec((T * Bp, P), lambda i: (0, 0)),        # x (bf16)
            pl.BlockSpec((L, P, 4 * P), lambda i: (0, 0, 0)),   # W_ih^T stacked (bf16)
            pl.BlockSpec((L, P, 4 * P), lambda i: (0, 0, 0)),   # W_hh^T stacked (bf16)
            pl.BlockSpec((L, 1, 4 * P), lambda i: (0, 0, 0)),   # b_ih + b_hh (f32)
            pl.BlockSpec((P, 128), lambda i: (0, 0)),           # fc weight^T, padded
            pl.BlockSpec((1, 128), lambda i: (0, 0)),           # fc bias, padded
        ],
        out_specs=pl.BlockSpec((Bp, 128), lambda i: (0, 0)),
        scratch_shapes=[
            pltpu.VMEM((T * Bp, 4 * P), jnp.float32),   # gates_x slab (per layer)
            pltpu.VMEM((T * Bp, P), jnp.float32),       # inter-layer hidden sequence
            pltpu.VMEM((Bp, P), jnp.float32),           # h
            pltpu.VMEM((Bp, P), jnp.float32),           # c
        ],
        compiler_params=pltpu.CompilerParams(
            dimension_semantics=("arbitrary",),
            vmem_limit_bytes=64 * 1024 * 1024,
        ),
    )(x_packed, w_ih, w_hh, bias, fc_w, fc_b)


# ---------------------------------------------------------------------------
# Parameters: raw PyTorch-layout params + packing into kernel layouts.
# ---------------------------------------------------------------------------
def init_params(key, input_size, hidden_size, lstm_layer_num):
    """Raw params with PyTorch shapes/init (w_ih: (4H, D_in), gate order i,f,g,o)."""
    bound = 1.0 / (hidden_size ** 0.5)
    lstm = []
    for layer in range(lstm_layer_num):
        d_in = input_size if layer == 0 else hidden_size
        key, k1, k2, k3, k4 = jax.random.split(key, 5)
        lstm.append({
            "w_ih": jax.random.uniform(k1, (4 * hidden_size, d_in), jnp.float32, -bound, bound),
            "w_hh": jax.random.uniform(k2, (4 * hidden_size, hidden_size), jnp.float32, -bound, bound),
            "b_ih": jax.random.uniform(k3, (4 * hidden_size,), jnp.float32, -bound, bound),
            "b_hh": jax.random.uniform(k4, (4 * hidden_size,), jnp.float32, -bound, bound),
        })
    key, kw, kb = jax.random.split(key, 3)
    fc_w = 0.1 * jax.random.normal(kw, (1, hidden_size), jnp.float32)  # init.normal_(std=0.1)
    fc_b = jax.random.uniform(kb, (1,), jnp.float32, -bound, bound)    # nn.Linear default bias
    return {"lstm": lstm, "fc_w": fc_w, "fc_b": fc_b}


def pack_params(raw, input_size, hidden_size):
    """Pad/stack raw params into lane-aligned layouts the fused kernel consumes."""
    H = hidden_size
    P = max(_round_up(input_size, 128), _round_up(H, 128))

    def gate_pad_cols(m):   # (rows, 4H) -> (rows, 4P): pad each gate block H -> P
        r = m.shape[0]
        return jnp.pad(m.reshape(r, 4, H), ((0, 0), (0, 0), (0, P - H))).reshape(r, 4 * P)

    wih, whh, bias = [], [], []
    for lp in raw["lstm"]:
        d_in = lp["w_ih"].shape[1]
        wih.append(jnp.pad(gate_pad_cols(lp["w_ih"].T), ((0, P - d_in), (0, 0))))
        whh.append(jnp.pad(gate_pad_cols(lp["w_hh"].T), ((0, P - H), (0, 0))))
        bias.append(gate_pad_cols((lp["b_ih"] + lp["b_hh"]).reshape(1, 4 * H)))
    fc_w = jnp.pad(raw["fc_w"].T, ((0, P - H), (0, 127)))       # (P, 128)
    fc_b = jnp.pad(raw["fc_b"].reshape(1, 1), ((0, 0), (0, 127)))
    return {
        "w_ih": jnp.stack(wih).astype(jnp.bfloat16),            # (L, P, 4P)
        "w_hh": jnp.stack(whh).astype(jnp.bfloat16),            # (L, P, 4P)
        "bias": jnp.stack(bias),                                # (L, 1, 4P) f32
        "fc_w": fc_w,                                           # (P, 128) f32
        "fc_b": fc_b,                                           # (1, 128) f32
    }


# ---------------------------------------------------------------------------
# Forward pass: layout/padding glue in JAX, everything hot in the fused kernel.
# ---------------------------------------------------------------------------
@jax.jit
def lstm_regression_forward(x, kparams):
    """x: (batch, seq, input_size) float32 -> (batch, 1) float32."""
    B, T, D = x.shape
    L, P, _ = kparams["w_hh"].shape
    Bp = max(8, _round_up(B, 8))
    # (B, T, D) -> (T, B, D), pad batch -> Bp and feature -> P, flatten rows.
    xt = jnp.transpose(x.astype(jnp.float32), (1, 0, 2))
    xt = jnp.pad(xt, ((0, 0), (0, Bp - B), (0, P - D)))
    x_packed = xt.reshape(T * Bp, P).astype(jnp.bfloat16)
    out = _fused_call(x_packed, kparams["w_ih"], kparams["w_hh"], kparams["bias"],
                      kparams["fc_w"], kparams["fc_b"], L, T, Bp, P)
    return out[:B, :1]


# ---------------------------------------------------------------------------
# Plain-JAX reference with the same precision recipe (bf16 matmul operands,
# f32 accumulation, f32 elementwise).
# ---------------------------------------------------------------------------
def ref_forward(x, raw):
    h_seq = jnp.transpose(x.astype(jnp.float32), (1, 0, 2))     # (T, B, D)
    T, B, _ = h_seq.shape
    for lp in raw["lstm"]:
        H = lp["w_hh"].shape[1]
        wih_t = lp["w_ih"].T.astype(jnp.bfloat16)
        whh_t = lp["w_hh"].T.astype(jnp.bfloat16)
        bias = lp["b_ih"] + lp["b_hh"]
        h = jnp.zeros((B, H), jnp.float32)
        c = jnp.zeros((B, H), jnp.float32)
        outs = []
        for t in range(T):
            gates = (jnp.dot(h_seq[t].astype(jnp.bfloat16), wih_t,
                             preferred_element_type=jnp.float32)
                     + jnp.dot(h.astype(jnp.bfloat16), whh_t,
                               preferred_element_type=jnp.float32)
                     + bias)
            i_g = jax.nn.sigmoid(gates[:, 0 * H:1 * H])
            f_g = jax.nn.sigmoid(gates[:, 1 * H:2 * H])
            g_g = jnp.tanh(gates[:, 2 * H:3 * H])
            o_g = jax.nn.sigmoid(gates[:, 3 * H:4 * H])
            c = f_g * c + i_g * g_g
            h = o_g * jnp.tanh(c)
            outs.append(h)
        h_seq = jnp.stack(outs, axis=0)
    return jnp.dot(h_seq[-1], raw["fc_w"].T) + raw["fc_b"]


if __name__ == "__main__":
    batch, seq, input_size, hidden_size, layers = 2, 8, 16, 32, 2

    key = jax.random.PRNGKey(0)
    key, xk, pk = jax.random.split(key, 3)
    x = jax.random.normal(xk, (batch, seq, input_size), jnp.float32)

    raw = init_params(pk, input_size, hidden_size, layers)
    kparams = pack_params(raw, input_size, hidden_size)

    out = jax.block_until_ready(lstm_regression_forward(x, kparams))
    assert out.shape == (batch, 1), out.shape

    ref = jax.block_until_ready(ref_forward(x, raw))
    assert jnp.allclose(out, ref, atol=2e-3, rtol=2e-3), (out, ref)

    print("KERNEL_OK")
</pallas_src>

<mosaic_0001>
module attributes {stable_mosaic.version = 11 : i64} {
  func.func @kernel(%arg0: i32, %arg1: memref<64x128xbf16, #tpu.memory_space<vmem>>, %arg2: memref<2x128x512xbf16, #tpu.memory_space<vmem>>, %arg3: memref<2x128x512xbf16, #tpu.memory_space<vmem>>, %arg4: memref<2x1x512xf32, #tpu.memory_space<vmem>>, %arg5: memref<128x128xf32, #tpu.memory_space<vmem>>, %arg6: memref<1x128xf32, #tpu.memory_space<vmem>>, %arg7: memref<8x128xf32, #tpu.memory_space<vmem>>, %arg8: memref<64x512xf32, #tpu.memory_space<vmem>>, %arg9: memref<64x128xf32, #tpu.memory_space<vmem>>, %arg10: memref<8x128xf32, #tpu.memory_space<vmem>>, %arg11: memref<8x128xf32, #tpu.memory_space<vmem>>) attributes {dimension_semantics = [#tpu.dimension_semantics<arbitrary>], iteration_bounds = array<i64: 1>, scalar_prefetch = 0 : i64, scratch_operands = 4 : i64, tpu.core_type = #tpu.core_type<tc>, window_params = [{pipeline_mode = #tpu.pipeline_mode<synchronous>, transform_indices = @transform_0, window_bounds = array<i64: 64, 128>}, {pipeline_mode = #tpu.pipeline_mode<synchronous>, transform_indices = @transform_1, window_bounds = array<i64: 2, 128, 512>}, {pipeline_mode = #tpu.pipeline_mode<synchronous>, transform_indices = @transform_2, window_bounds = array<i64: 2, 128, 512>}, {pipeline_mode = #tpu.pipeline_mode<synchronous>, transform_indices = @transform_3, window_bounds = array<i64: 2, 1, 512>}, {pipeline_mode = #tpu.pipeline_mode<synchronous>, transform_indices = @transform_4, window_bounds = array<i64: 128, 128>}, {pipeline_mode = #tpu.pipeline_mode<synchronous>, transform_indices = @transform_5, window_bounds = array<i64: 1, 128>}, {pipeline_mode = #tpu.pipeline_mode<synchronous>, transform_indices = @transform_6, window_bounds = array<i64: 8, 128>}]} {
    %c0 = arith.constant 0 : index
    %c0_0 = arith.constant 0 : index
    %0 = vector.load %arg1[%c0, %c0_0] : memref<64x128xbf16, #tpu.memory_space<vmem>>, vector<64x128xbf16>
    %c0_1 = arith.constant 0 : index
    %c0_2 = arith.constant 0 : index
    %c0_3 = arith.constant 0 : index
    %1 = vector.load %arg2[%c0_1, %c0_2, %c0_3] : memref<2x128x512xbf16, #tpu.memory_space<vmem>>, vector<1x128x512xbf16>
    %2 = vector.shape_cast %1 : vector<1x128x512xbf16> to vector<128x512xbf16>
    %cst = arith.constant dense<0.000000e+00> : vector<64x512xf32>
    %3 = tpu.matmul %0, %2, %cst {dimension_numbers = #tpu.dot_dimension_numbers<[1], [0], [0], [1], [0, 0, 1, 1], [], []>} : vector<64x128xbf16>, vector<128x512xbf16>, vector<64x512xf32> -> vector<64x512xf32>
    %c0_4 = arith.constant 0 : index
    %c0_5 = arith.constant 0 : index
    %c0_6 = arith.constant 0 : index
    %4 = vector.load %arg4[%c0_4, %c0_5, %c0_6] : memref<2x1x512xf32, #tpu.memory_space<vmem>>, vector<1x1x512xf32>
    %5 = vector.shape_cast %4 : vector<1x1x512xf32> to vector<1x512xf32>
    %6 = vector.broadcast %5 : vector<1x512xf32> to vector<64x512xf32>
    %7 = arith.addf %3, %6 : vector<64x512xf32>
    %c0_7 = arith.constant 0 : index
    %c0_8 = arith.constant 0 : index
    %8 = vector.load %arg8[%c0_7, %c0_8] : memref<64x512xf32, #tpu.memory_space<vmem>>, vector<64x512xf32>
    tpu.vector_store %arg8[%c0_7, %c0_8], %7 {strides = array<i32>} : memref<64x512xf32, #tpu.memory_space<vmem>>, vector<64x512xf32>,
    %cst_9 = arith.constant 0.000000e+00 : f32
    %9 = vector.broadcast %cst_9 : f32 to vector<8x128xf32>
    %c0_10 = arith.constant 0 : index
    %c0_11 = arith.constant 0 : index
    %10 = vector.load %arg10[%c0_10, %c0_11] : memref<8x128xf32, #tpu.memory_space<vmem>>, vector<8x128xf32>
    tpu.vector_store %arg10[%c0_10, %c0_11], %9 {strides = array<i32>} : memref<8x128xf32, #tpu.memory_space<vmem>>, vector<8x128xf32>,
    %cst_12 = arith.constant 0.000000e+00 : f32
    %11 = vector.broadcast %cst_12 : f32 to vector<8x128xf32>
    %c0_13 = arith.constant 0 : index
    %c0_14 = arith.constant 0 : index
    %12 = vector.load %arg11[%c0_13, %c0_14] : memref<8x128xf32, #tpu.memory_space<vmem>>, vector<8x128xf32>
    tpu.vector_store %arg11[%c0_13, %c0_14], %11 {strides = array<i32>} : memref<8x128xf32, #tpu.memory_space<vmem>>, vector<8x128xf32>,
    %c0_15 = arith.constant 0 : index
    %c0_16 = arith.constant 0 : index
    %c0_17 = arith.constant 0 : index
    %13 = vector.load %arg3[%c0_15, %c0_16, %c0_17] : memref<2x128x512xbf16, #tpu.memory_space<vmem>>, vector<1x128x512xbf16>
    %14 = vector.shape_cast %13 : vector<1x128x512xbf16> to vector<128x512xbf16>
    %c0_i32 = arith.constant 0 : i32
    %c8_i32 = arith.constant 8 : i32
    %15 = arith.muli %c0_i32, %c8_i32 : i32
    %16 = tpu.assume_multiple %15, 8 : i32
    %c0_18 = arith.constant 0 : index
    %c0_19 = arith.constant 0 : index
    %17 = vector.load %arg10[%c0_18, %c0_19] : memref<8x128xf32, #tpu.memory_space<vmem>>, vector<8x128xf32>
    %18 = arith.index_cast %16 : i32 to index
    %c0_20 = arith.constant 0 : index
    %19 = vector.load %arg8[%18, %c0_20] : memref<64x512xf32, #tpu.memory_space<vmem>>, vector<8x512xf32>
    %20 = arith.truncf %17 : vector<8x128xf32> to vector<8x128xbf16>
    %cst_21 = arith.constant dense<0.000000e+00> : vector<8x512xf32>
    %21 = tpu.matmul %20, %14, %cst_21 {dimension_numbers = #tpu.dot_dimension_numbers<[1], [0], [0], [1], [0, 0, 1, 1], [], []>} : vector<8x128xbf16>, vector<128x512xbf16>, vector<8x512xf32> -> vector<8x512xf32>
    %22 = arith.addf %19, %21 : vector<8x512xf32>
    %23 = vector.extract_strided_slice %22 {offsets = [0, 0], sizes = [8, 128], strides = [1, 1]} : vector<8x512xf32> to vector<8x128xf32>
    %24 = arith.negf %23 : vector<8x128xf32>
    %25 = math.exp %24 : vector<8x128xf32>
    %cst_22 = arith.constant 1.000000e+00 : f32
    %26 = vector.broadcast %cst_22 : f32 to vector<8x128xf32>
    %27 = arith.addf %26, %25 : vector<8x128xf32>
    %28 = arith.divf %26, %27 : vector<8x128xf32>
    %29 = vector.extract_strided_slice %22 {offsets = [0, 128], sizes = [8, 128], strides = [1, 1]} : vector<8x512xf32> to vector<8x128xf32>
    %30 = arith.negf %29 : vector<8x128xf32>
    %31 = math.exp %30 : vector<8x128xf32>
    %cst_23 = arith.constant 1.000000e+00 : f32
    %32 = vector.broadcast %cst_23 : f32 to vector<8x128xf32>
    %33 = arith.addf %32, %31 : vector<8x128xf32>
    %34 = arith.divf %32, %33 : vector<8x128xf32>
    %35 = vector.extract_strided_slice %22 {offsets = [0, 256], sizes = [8, 128], strides = [1, 1]} : vector<8x512xf32> to vector<8x128xf32>
    %36 = math.tanh %35 : vector<8x128xf32>
    %37 = vector.extract_strided_slice %22 {offsets = [0, 384], sizes = [8, 128], strides = [1, 1]} : vector<8x512xf32> to vector<8x128xf32>
    %38 = arith.negf %37 : vector<8x128xf32>
    %39 = math.exp %38 : vector<8x128xf32>
    %cst_24 = arith.constant 1.000000e+00 : f32
    %40 = vector.broadcast %cst_24 : f32 to vector<8x128xf32>
    %41 = arith.addf %40, %39 : vector<8x128xf32>
    %42 = arith.divf %40, %41 : vector<8x128xf32>
    %c0_25 = arith.constant 0 : index
    %c0_26 = arith.constant 0 : index
    %43 = vector.load %arg11[%c0_25, %c0_26] : memref<8x128xf32, #tpu.memory_space<vmem>>, vector<8x128xf32>
    %44 = arith.mulf %34, %43 : vector<8x128xf32>
    %45 = arith.mulf %28, %36 : vector<8x128xf32>
    %46 = arith.addf %44, %45 : vector<8x128xf32>
    %47 = math.tanh %46 : vector<8x128xf32>
    %48 = arith.mulf %42, %47 : vector<8x128xf32>
    %c0_27 = arith.constant 0 : index
    %c0_28 = arith.constant 0 : index
    %49 = vector.load %arg11[%c0_27, %c0_28] : memref<8x128xf32, #tpu.memory_space<vmem>>, vector<8x128xf32>
    tpu.vector_store %arg11[%c0_27, %c0_28], %46 {strides = array<i32>} : memref<8x128xf32, #tpu.memory_space<vmem>>, vector<8x128xf32>,
    %c0_29 = arith.constant 0 : index
    %c0_30 = arith.constant 0 : index
    %50 = vector.load %arg10[%c0_29, %c0_30] : memref<8x128xf32, #tpu.memory_space<vmem>>, vector<8x128xf32>
    tpu.vector_store %arg10[%c0_29, %c0_30], %48 {strides = array<i32>} : memref<8x128xf32, #tpu.memory_space<vmem>>, vector<8x128xf32>,
    %51 = arith.index_cast %16 : i32 to index
    %c0_31 = arith.constant 0 : index
    %52 = vector.load %arg9[%51, %c0_31] : memref<64x128xf32, #tpu.memory_space<vmem>>, vector<8x128xf32>
    tpu.vector_store %arg9[%51, %c0_31], %48 {strides = array<i32>} : memref<64x128xf32, #tpu.memory_space<vmem>>, vector<8x128xf32>,
    %c1_i32 = arith.constant 1 : i32
    %c8_i32_32 = arith.constant 8 : i32
    %53 = arith.muli %c1_i32, %c8_i32_32 : i32
    %54 = tpu.assume_multiple %53, 8 : i32
    %c0_33 = arith.constant 0 : index
    %c0_34 = arith.constant 0 : index
    %55 = vector.load %arg10[%c0_33, %c0_34] : memref<8x128xf32, #tpu.memory_space<vmem>>, vector<8x128xf32>
    %56 = arith.index_cast %54 : i32 to index
    %c0_35 = arith.constant 0 : index
    %57 = vector.load %arg8[%56, %c0_35] : memref<64x512xf32, #tpu.memory_space<vmem>>, vector<8x512xf32>
    %58 = arith.truncf %55 : vector<8x128xf32> to vector<8x128xbf16>
    %cst_36 = arith.constant dense<0.000000e+00> : vector<8x512xf32>
    %59 = tpu.matmul %58, %14, %cst_36 {dimension_numbers = #tpu.dot_dimension_numbers<[1], [0], [0], [1], [0, 0, 1, 1], [], []>} : vector<8x128xbf16>, vector<128x512xbf16>, vector<8x512xf32> -> vector<8x512xf32>
    %60 = arith.addf %57, %59 : vector<8x512xf32>
    %61 = vector.extract_strided_slice %60 {offsets = [0, 0], sizes = [8, 128], strides = [1, 1]} : vector<8x512xf32> to vector<8x128xf32>
    %62 = arith.negf %61 : vector<8x128xf32>
    %63 = math.exp %62 : vector<8x128xf32>
    %cst_37 = arith.constant 1.000000e+00 : f32
    %64 = vector.broadcast %cst_37 : f32 to vector<8x128xf32>
    %65 = arith.addf %64, %63 : vector<8x128xf32>
    %66 = arith.divf %64, %65 : vector<8x128xf32>
    %67 = vector.extract_strided_slice %60 {offsets = [0, 128], sizes = [8, 128], strides = [1, 1]} : vector<8x512xf32> to vector<8x128xf32>
    %68 = arith.negf %67 : vector<8x128xf32>
    %69 = math.exp %68 : vector<8x128xf32>
    %cst_38 = arith.constant 1.000000e+00 : f32
    %70 = vector.broadcast %cst_38 : f32 to vector<8x128xf32>
    %71 = arith.addf %70, %69 : vector<8x128xf32>
    %72 = arith.divf %70, %71 : vector<8x128xf32>
    %73 = vector.extract_strided_slice %60 {offsets = [0, 256], sizes = [8, 128], strides = [1, 1]} : vector<8x512xf32> to vector<8x128xf32>
    %74 = math.tanh %73 : vector<8x128xf32>
    %75 = vector.extract_strided_slice %60 {offsets = [0, 384], sizes = [8, 128], strides = [1, 1]} : vector<8x512xf32> to vector<8x128xf32>
    %76 = arith.negf %75 : vector<8x128xf32>
    %77 = math.exp %76 : vector<8x128xf32>
    %cst_39 = arith.constant 1.000000e+00 : f32
    %78 = vector.broadcast %cst_39 : f32 to vector<8x128xf32>
    %79 = arith.addf %78, %77 : vector<8x128xf32>
    %80 = arith.divf %78, %79 : vector<8x128xf32>
    %c0_40 = arith.constant 0 : index
    %c0_41 = arith.constant 0 : index
    %81 = vector.load %arg11[%c0_40, %c0_41] : memref<8x128xf32, #tpu.memory_space<vmem>>, vector<8x128xf32>
    %82 = arith.mulf %72, %81 : vector<8x128xf32>
    %83 = arith.mulf %66, %74 : vector<8x128xf32>
    %84 = arith.addf %82, %83 : vector<8x128xf32>
    %85 = math.tanh %84 : vector<8x128xf32>
    %86 = arith.mulf %80, %85 : vector<8x128xf32>
    %c0_42 = arith.constant 0 : index
    %c0_43 = arith.constant 0 : index
    %87 = vector.load %arg11[%c0_42, %c0_43] : memref<8x128xf32, #tpu.memory_space<vmem>>, vector<8x128xf32>
    tpu.vector_store %arg11[%c0_42, %c0_43], %84 {strides = array<i32>} : memref<8x128xf32, #tpu.memory_space<vmem>>, vector<8x128xf32>,
    %c0_44 = arith.constant 0 : index
    %c0_45 = arith.constant 0 : index
    %88 = vector.load %arg10[%c0_44, %c0_45] : memref<8x128xf32, #tpu.memory_space<vmem>>, vector<8x128xf32>
    tpu.vector_store %arg10[%c0_44, %c0_45], %86 {strides = array<i32>} : memref<8x128xf32, #tpu.memory_space<vmem>>, vector<8x128xf32>,
    %89 = arith.index_cast %54 : i32 to index
    %c0_46 = arith.constant 0 : index
    %90 = vector.load %arg9[%89, %c0_46] : memref<64x128xf32, #tpu.memory_space<vmem>>, vector<8x128xf32>
    tpu.vector_store %arg9[%89, %c0_46], %86 {strides = array<i32>} : memref<64x128xf32, #tpu.memory_space<vmem>>, vector<8x128xf32>,
    %c2_i32 = arith.constant 2 : i32
    %c8_i32_47 = arith.constant 8 : i32
    %91 = arith.muli %c2_i32, %c8_i32_47 : i32
    %92 = tpu.assume_multiple %91, 8 : i32
    %c0_48 = arith.constant 0 : index
    %c0_49 = arith.constant 0 : index
    %93 = vector.load %arg10[%c0_48, %c0_49] : memref<8x128xf32, #tpu.memory_space<vmem>>, vector<8x128xf32>
    %94 = arith.index_cast %92 : i32 to index
    %c0_50 = arith.constant 0 : index
    %95 = vector.load %arg8[%94, %c0_50] : memref<64x512xf32, #tpu.memory_space<vmem>>, vector<8x512xf32>
    %96 = arith.truncf %93 : vector<8x128xf32> to vector<8x128xbf16>
    %cst_51 = arith.constant dense<0.000000e+00> : vector<8x512xf32>
    %97 = tpu.matmul %96, %14, %cst_51 {dimension_numbers = #tpu.dot_dimension_numbers<[1], [0], [0], [1], [0, 0, 1, 1], [], []>} : vector<8x128xbf16>, vector<128x512xbf16>, vector<8x512xf32> -> vector<8x512xf32>
    %98 = arith.addf %95, %97 : vector<8x512xf32>
    %99 = vector.extract_strided_slice %98 {offsets = [0, 0], sizes = [8, 128], strides = [1, 1]} : vector<8x512xf32> to vector<8x128xf32>
    %100 = arith.negf %99 : vector<8x128xf32>
    %101 = math.exp %100 : vector<8x128xf32>
    %cst_52 = arith.constant 1.000000e+00 : f32
    %102 = vector.broadcast %cst_52 : f32 to vector<8x128xf32>
    %103 = arith.addf %102, %101 : vector<8x128xf32>
    %104 = arith.divf %102, %103 : vector<8x128xf32>
    %105 = vector.extract_strided_slice %98 {offsets = [0, 128], sizes = [8, 128], strides = [1, 1]} : vector<8x512xf32> to vector<8x128xf32>
    %106 = arith.negf %105 : vector<8x128xf32>
    %107 = math.exp %106 : vector<8x128xf32>
    %cst_53 = arith.constant 1.000000e+00 : f32
    %108 = vector.broadcast %cst_53 : f32 to vector<8x128xf32>
    %109 = arith.addf %108, %107 : vector<8x128xf32>
    %110 = arith.divf %108, %109 : vector<8x128xf32>
    %111 = vector.extract_strided_slice %98 {offsets = [0, 256], sizes = [8, 128], strides = [1, 1]} : vector<8x512xf32> to vector<8x128xf32>
    %112 = math.tanh %111 : vector<8x128xf32>
    %113 = vector.extract_strided_slice %98 {offsets = [0, 384], sizes = [8, 128], strides = [1, 1]} : vector<8x512xf32> to vector<8x128xf32>
    %114 = arith.negf %113 : vector<8x128xf32>
    %115 = math.exp %114 : vector<8x128xf32>
    %cst_54 = arith.constant 1.000000e+00 : f32
    %116 = vector.broadcast %cst_54 : f32 to vector<8x128xf32>
    %117 = arith.addf %116, %115 : vector<8x128xf32>
    %118 = arith.divf %116, %117 : vector<8x128xf32>
    %c0_55 = arith.constant 0 : index
    %c0_56 = arith.constant 0 : index
    %119 = vector.load %arg11[%c0_55, %c0_56] : memref<8x128xf32, #tpu.memory_space<vmem>>, vector<8x128xf32>
    %120 = arith.mulf %110, %119 : vector<8x128xf32>
    %121 = arith.mulf %104, %112 : vector<8x128xf32>
    %122 = arith.addf %120, %121 : vector<8x128xf32>
    %123 = math.tanh %122 : vector<8x128xf32>
    %124 = arith.mulf %118, %123 : vector<8x128xf32>
    %c0_57 = arith.constant 0 : index
    %c0_58 = arith.constant 0 : index
    %125 = vector.load %arg11[%c0_57, %c0_58] : memref<8x128xf32, #tpu.memory_space<vmem>>, vector<8x128xf32>
    tpu.vector_store %arg11[%c0_57, %c0_58], %122 {strides = array<i32>} : memref<8x128xf32, #tpu.memory_space<vmem>>, vector<8x128xf32>,
    %c0_59 = arith.constant 0 : index
    %c0_60 = arith.constant 0 : index
    %126 = vector.load %arg10[%c0_59, %c0_60] : memref<8x128xf32, #tpu.memory_space<vmem>>, vector<8x128xf32>
    tpu.vector_store %arg10[%c0_59, %c0_60], %124 {strides = array<i32>} : memref<8x128xf32, #tpu.memory_space<vmem>>, vector<8x128xf32>,
    %127 = arith.index_cast %92 : i32 to index
    %c0_61 = arith.constant 0 : index
    %128 = vector.load %arg9[%127, %c0_61] : memref<64x128xf32, #tpu.memory_space<vmem>>, vector<8x128xf32>
    tpu.vector_store %arg9[%127, %c0_61], %124 {strides = array<i32>} : memref<64x128xf32, #tpu.memory_space<vmem>>, vector<8x128xf32>,
    %c3_i32 = arith.constant 3 : i32
    %c8_i32_62 = arith.constant 8 : i32
    %129 = arith.muli %c3_i32, %c8_i32_62 : i32
    %130 = tpu.assume_multiple %129, 8 : i32
    %c0_63 = arith.constant 0 : index
    %c0_64 = arith.constant 0 : index
    %131 = vector.load %arg10[%c0_63, %c0_64] : memref<8x128xf32, #tpu.memory_space<vmem>>, vector<8x128xf32>
    %132 = arith.index_cast %130 : i32 to index
    %c0_65 = arith.constant 0 : index
    %133 = vector.load %arg8[%132, %c0_65] : memref<64x512xf32, #tpu.memory_space<vmem>>, vector<8x512xf32>
    %134 = arith.truncf %131 : vector<8x128xf32> to vector<8x128xbf16>
    %cst_66 = arith.constant dense<0.000000e+00> : vector<8x512xf32>
    %135 = tpu.matmul %134, %14, %cst_66 {dimension_numbers = #tpu.dot_dimension_numbers<[1], [0], [0], [1], [0, 0, 1, 1], [], []>} : vector<8x128xbf16>, vector<128x512xbf16>, vector<8x512xf32> -> vector<8x512xf32>
    %136 = arith.addf %133, %135 : vector<8x512xf32>
    %137 = vector.extract_strided_slice %136 {offsets = [0, 0], sizes = [8, 128], strides = [1, 1]} : vector<8x512xf32> to vector<8x128xf32>
    %138 = arith.negf %137 : vector<8x128xf32>
    %139 = math.exp %138 : vector<8x128xf32>
    %cst_67 = arith.constant 1.000000e+00 : f32
    %140 = vector.broadcast %cst_67 : f32 to vector<8x128xf32>
    %141 = arith.addf %140, %139 : vector<8x128xf32>
    %142 = arith.divf %140, %141 : vector<8x128xf32>
    %143 = vector.extract_strided_slice %136 {offsets = [0, 128], sizes = [8, 128], strides = [1, 1]} : vector<8x512xf32> to vector<8x128xf32>
    %144 = arith.negf %143 : vector<8x128xf32>
    %145 = math.exp %144 : vector<8x128xf32>
    %cst_68 = arith.constant 1.000000e+00 : f32
    %146 = vector.broadcast %cst_68 : f32 to vector<8x128xf32>
    %147 = arith.addf %146, %145 : vector<8x128xf32>
    %148 = arith.divf %146, %147 : vector<8x128xf32>
    %149 = vector.extract_strided_slice %136 {offsets = [0, 256], sizes = [8, 128], strides = [1, 1]} : vector<8x512xf32> to vector<8x128xf32>
    %150 = math.tanh %149 : vector<8x128xf32>
    %151 = vector.extract_strided_slice %136 {offsets = [0, 384], sizes = [8, 128], strides = [1, 1]} : vector<8x512xf32> to vector<8x128xf32>
    %152 = arith.negf %151 : vector<8x128xf32>
    %153 = math.exp %152 : vector<8x128xf32>
    %cst_69 = arith.constant 1.000000e+00 : f32
    %154 = vector.broadcast %cst_69 : f32 to vector<8x128xf32>
    %155 = arith.addf %154, %153 : vector<8x128xf32>
    %156 = arith.divf %154, %155 : vector<8x128xf32>
    %c0_70 = arith.constant 0 : index
    %c0_71 = arith.constant 0 : index
    %157 = vector.load %arg11[%c0_70, %c0_71] : memref<8x128xf32, #tpu.memory_space<vmem>>, vector<8x128xf32>
    %158 = arith.mulf %148, %157 : vector<8x128xf32>
    %159 = arith.mulf %142, %150 : vector<8x128xf32>
    %160 = arith.addf %158, %159 : vector<8x128xf32>
    %161 = math.tanh %160 : vector<8x128xf32>
    %162 = arith.mulf %156, %161 : vector<8x128xf32>
    %c0_72 = arith.constant 0 : index
    %c0_73 = arith.constant 0 : index
    %163 = vector.load %arg11[%c0_72, %c0_73] : memref<8x128xf32, #tpu.memory_space<vmem>>, vector<8x128xf32>
    tpu.vector_store %arg11[%c0_72, %c0_73], %160 {strides = array<i32>} : memref<8x128xf32, #tpu.memory_space<vmem>>, vector<8x128xf32>,
    %c0_74 = arith.constant 0 : index
    %c0_75 = arith.constant 0 : index
    %164 = vector.load %arg10[%c0_74, %c0_75] : memref<8x128xf32, #tpu.memory_space<vmem>>, vector<8x128xf32>
    tpu.vector_store %arg10[%c0_74, %c0_75], %162 {strides = array<i32>} : memref<8x128xf32, #tpu.memory_space<vmem>>, vector<8x128xf32>,
    %165 = arith.index_cast %130 : i32 to index
    %c0_76 = arith.constant 0 : index
    %166 = vector.load %arg9[%165, %c0_76] : memref<64x128xf32, #tpu.memory_space<vmem>>, vector<8x128xf32>
    tpu.vector_store %arg9[%165, %c0_76], %162 {strides = array<i32>} : memref<64x128xf32, #tpu.memory_space<vmem>>, vector<8x128xf32>,
    %c4_i32 = arith.constant 4 : i32
    %c8_i32_77 = arith.constant 8 : i32
    %167 = arith.muli %c4_i32, %c8_i32_77 : i32
    %168 = tpu.assume_multiple %167, 8 : i32
    %c0_78 = arith.constant 0 : index
    %c0_79 = arith.constant 0 : index
    %169 = vector.load %arg10[%c0_78, %c0_79] : memref<8x128xf32, #tpu.memory_space<vmem>>, vector<8x128xf32>
    %170 = arith.index_cast %168 : i32 to index
    %c0_80 = arith.constant 0 : index
    %171 = vector.load %arg8[%170, %c0_80] : memref<64x512xf32, #tpu.memory_space<vmem>>, vector<8x512xf32>
    %172 = arith.truncf %169 : vector<8x128xf32> to vector<8x128xbf16>
    %cst_81 = arith.constant dense<0.000000e+00> : vector<8x512xf32>
    %173 = tpu.matmul %172, %14, %cst_81 {dimension_numbers = #tpu.dot_dimension_numbers<[1], [0], [0], [1], [0, 0, 1, 1], [], []>} : vector<8x128xbf16>, vector<128x512xbf16>, vector<8x512xf32> -> vector<8x512xf32>
    %174 = arith.addf %171, %173 : vector<8x512xf32>
    %175 = vector.extract_strided_slice %174 {offsets = [0, 0], sizes = [8, 128], strides = [1, 1]} : vector<8x512xf32> to vector<8x128xf32>
    %176 = arith.negf %175 : vector<8x128xf32>
    %177 = math.exp %176 : vector<8x128xf32>
    %cst_82 = arith.constant 1.000000e+00 : f32
    %178 = vector.broadcast %cst_82 : f32 to vector<8x128xf32>
    %179 = arith.addf %178, %177 : vector<8x128xf32>
    %180 = arith.divf %178, %179 : vector<8x128xf32>
    %181 = vector.extract_strided_slice %174 {offsets = [0, 128], sizes = [8, 128], strides = [1, 1]} : vector<8x512xf32> to vector<8x128xf32>
    %182 = arith.negf %181 : vector<8x128xf32>
    %183 = math.exp %182 : vector<8x128xf32>
    %cst_83 = arith.constant 1.000000e+00 : f32
    %184 = vector.broadcast %cst_83 : f32 to vector<8x128xf32>
    %185 = arith.addf %184, %183 : vector<8x128xf32>
    %186 = arith.divf %184, %185 : vector<8x128xf32>
    %187 = vector.extract_strided_slice %174 {offsets = [0, 256], sizes = [8, 128], strides = [1, 1]} : vector<8x512xf32> to vector<8x128xf32>
    %188 = math.tanh %187 : vector<8x128xf32>
    %189 = vector.extract_strided_slice %174 {offsets = [0, 384], sizes = [8, 128], strides = [1, 1]} : vector<8x512xf32> to vector<8x128xf32>
    %190 = arith.negf %189 : vector<8x128xf32>
    %191 = math.exp %190 : vector<8x128xf32>
    %cst_84 = arith.constant 1.000000e+00 : f32
    %192 = vector.broadcast %cst_84 : f32 to vector<8x128xf32>
    %193 = arith.addf %192, %191 : vector<8x128xf32>
    %194 = arith.divf %192, %193 : vector<8x128xf32>
    %c0_85 = arith.constant 0 : index
    %c0_86 = arith.constant 0 : index
    %195 = vector.load %arg11[%c0_85, %c0_86] : memref<8x128xf32, #tpu.memory_space<vmem>>, vector<8x128xf32>
    %196 = arith.mulf %186, %195 : vector<8x128xf32>
    %197 = arith.mulf %180, %188 : vector<8x128xf32>
    %198 = arith.addf %196, %197 : vector<8x128xf32>
    %199 = math.tanh %198 : vector<8x128xf32>
    %200 = arith.mulf %194, %199 : vector<8x128xf32>
    %c0_87 = arith.constant 0 : index
    %c0_88 = arith.constant 0 : index
    %201 = vector.load %arg11[%c0_87, %c0_88] : memref<8x128xf32, #tpu.memory_space<vmem>>, vector<8x128xf32>
    tpu.vector_store %arg11[%c0_87, %c0_88], %198 {strides = array<i32>} : memref<8x128xf32, #tpu.memory_space<vmem>>, vector<8x128xf32>,
    %c0_89 = arith.constant 0 : index
    %c0_90 = arith.constant 0 : index
    %202 = vector.load %arg10[%c0_89, %c0_90] : memref<8x128xf32, #tpu.memory_space<vmem>>, vector<8x128xf32>
    tpu.vector_store %arg10[%c0_89, %c0_90], %200 {strides = array<i32>} : memref<8x128xf32, #tpu.memory_space<vmem>>, vector<8x128xf32>,
    %203 = arith.index_cast %168 : i32 to index
    %c0_91 = arith.constant 0 : index
    %204 = vector.load %arg9[%203, %c0_91] : memref<64x128xf32, #tpu.memory_space<vmem>>, vector<8x128xf32>
    tpu.vector_store %arg9[%203, %c0_91], %200 {strides = array<i32>} : memref<64x128xf32, #tpu.memory_space<vmem>>, vector<8x128xf32>,
    %c5_i32 = arith.constant 5 : i32
    %c8_i32_92 = arith.constant 8 : i32
    %205 = arith.muli %c5_i32, %c8_i32_92 : i32
    %206 = tpu.assume_multiple %205, 8 : i32
    %c0_93 = arith.constant 0 : index
    %c0_94 = arith.constant 0 : index
    %207 = vector.load %arg10[%c0_93, %c0_94] : memref<8x128xf32, #tpu.memory_space<vmem>>, vector<8x128xf32>
    %208 = arith.index_cast %206 : i32 to index
    %c0_95 = arith.constant 0 : index
    %209 = vector.load %arg8[%208, %c0_95] : memref<64x512xf32, #tpu.memory_space<vmem>>, vector<8x512xf32>
    %210 = arith.truncf %207 : vector<8x128xf32> to vector<8x128xbf16>
    %cst_96 = arith.constant dense<0.000000e+00> : vector<8x512xf32>
    %211 = tpu.matmul %210, %14, %cst_96 {dimension_numbers = #tpu.dot_dimension_numbers<[1], [0], [0], [1], [0, 0, 1, 1], [], []>} : vector<8x128xbf16>, vector<128x512xbf16>, vector<8x512xf32> -> vector<8x512xf32>
    %212 = arith.addf %209, %211 : vector<8x512xf32>
    %213 = vector.extract_strided_slice %212 {offsets = [0, 0], sizes = [8, 128], strides = [1, 1]} : vector<8x512xf32> to vector<8x128xf32>
    %214 = arith.negf %213 : vector<8x128xf32>
    %215 = math.exp %214 : vector<8x128xf32>
    %cst_97 = arith.constant 1.000000e+00 : f32
    %216 = vector.broadcast %cst_97 : f32 to vector<8x128xf32>
    %217 = arith.addf %216, %215 : vector<8x128xf32>
    %218 = arith.divf %216, %217 : vector<8x128xf32>
    %219 = vector.extract_strided_slice %212 {offsets = [0, 128], sizes = [8, 128], strides = [1, 1]} : vector<8x512xf32> to vector<8x128xf32>
    %220 = arith.negf %219 : vector<8x128xf32>
    %221 = math.exp %220 : vector<8x128xf32>
    %cst_98 = arith.constant 1.000000e+00 : f32
    %222 = vector.broadcast %cst_98 : f32 to vector<8x128xf32>
    %223 = arith.addf %222, %221 : vector<8x128xf32>
    %224 = arith.divf %222, %223 : vector<8x128xf32>
    %225 = vector.extract_strided_slice %212 {offsets = [0, 256], sizes = [8, 128], strides = [1, 1]} : vector<8x512xf32> to vector<8x128xf32>
    %226 = math.tanh %225 : vector<8x128xf32>
    %227 = vector.extract_strided_slice %212 {offsets = [0, 384], sizes = [8, 128], strides = [1, 1]} : vector<8x512xf32> to vector<8x128xf32>
    %228 = arith.negf %227 : vector<8x128xf32>
    %229 = math.exp %228 : vector<8x128xf32>
    %cst_99 = arith.constant 1.000000e+00 : f32
    %230 = vector.broadcast %cst_99 : f32 to vector<8x128xf32>
    %231 = arith.addf %230, %229 : vector<8x128xf32>
    %232 = arith.divf %230, %231 : vector<8x128xf32>
    %c0_100 = arith.constant 0 : index
    %c0_101 = arith.constant 0 : index
    %233 = vector.load %arg11[%c0_100, %c0_101] : memref<8x128xf32, #tpu.memory_space<vmem>>, vector<8x128xf32>
    %234 = arith.mulf %224, %233 : vector<8x128xf32>
    %235 = arith.mulf %218, %226 : vector<8x128xf32>
    %236 = arith.addf %234, %235 : vector<8x128xf32>
    %237 = math.tanh %236 : vector<8x128xf32>
    %238 = arith.mulf %232, %237 : vector<8x128xf32>
    %c0_102 = arith.constant 0 : index
    %c0_103 = arith.constant 0 : index
    %239 = vector.load %arg11[%c0_102, %c0_103] : memref<8x128xf32, #tpu.memory_space<vmem>>, vector<8x128xf32>
    tpu.vector_store %arg11[%c0_102, %c0_103], %236 {strides = array<i32>} : memref<8x128xf32, #tpu.memory_space<vmem>>, vector<8x128xf32>,
    %c0_104 = arith.constant 0 : index
    %c0_105 = arith.constant 0 : index
    %240 = vector.load %arg10[%c0_104, %c0_105] : memref<8x128xf32, #tpu.memory_space<vmem>>, vector<8x128xf32>
    tpu.vector_store %arg10[%c0_104, %c0_105], %238 {strides = array<i32>} : memref<8x128xf32, #tpu.memory_space<vmem>>, vector<8x128xf32>,
    %241 = arith.index_cast %206 : i32 to index
    %c0_106 = arith.constant 0 : index
    %242 = vector.load %arg9[%241, %c0_106] : memref<64x128xf32, #tpu.memory_space<vmem>>, vector<8x128xf32>
    tpu.vector_store %arg9[%241, %c0_106], %238 {strides = array<i32>} : memref<64x128xf32, #tpu.memory_space<vmem>>, vector<8x128xf32>,
    %c6_i32 = arith.constant 6 : i32
    %c8_i32_107 = arith.constant 8 : i32
    %243 = arith.muli %c6_i32, %c8_i32_107 : i32
    %244 = tpu.assume_multiple %243, 8 : i32
    %c0_108 = arith.constant 0 : index
    %c0_109 = arith.constant 0 : index
    %245 = vector.load %arg10[%c0_108, %c0_109] : memref<8x128xf32, #tpu.memory_space<vmem>>, vector<8x128xf32>
    %246 = arith.index_cast %244 : i32 to index
    %c0_110 = arith.constant 0 : index
    %247 = vector.load %arg8[%246, %c0_110] : memref<64x512xf32, #tpu.memory_space<vmem>>, vector<8x512xf32>
    %248 = arith.truncf %245 : vector<8x128xf32> to vector<8x128xbf16>
    %cst_111 = arith.constant dense<0.000000e+00> : vector<8x512xf32>
    %249 = tpu.matmul %248, %14, %cst_111 {dimension_numbers = #tpu.dot_dimension_numbers<[1], [0], [0], [1], [0, 0, 1, 1], [], []>} : vector<8x128xbf16>, vector<128x512xbf16>, vector<8x512xf32> -> vector<8x512xf32>
    %250 = arith.addf %247, %249 : vector<8x512xf32>
    %251 = vector.extract_strided_slice %250 {offsets = [0, 0], sizes = [8, 128], strides = [1, 1]} : vector<8x512xf32> to vector<8x128xf32>
    %252 = arith.negf %251 : vector<8x128xf32>
    %253 = math.exp %252 : vector<8x128xf32>
    %cst_112 = arith.constant 1.000000e+00 : f32
    %254 = vector.broadcast %cst_112 : f32 to vector<8x128xf32>
    %255 = arith.addf %254, %253 : vector<8x128xf32>
    %256 = arith.divf %254, %255 : vector<8x128xf32>
    %257 = vector.extract_strided_slice %250 {offsets = [0, 128], sizes = [8, 128], strides = [1, 1]} : vector<8x512xf32> to vector<8x128xf32>
    %258 = arith.negf %257 : vector<8x128xf32>
    %259 = math.exp %258 : vector<8x128xf32>
    %cst_113 = arith.constant 1.000000e+00 : f32
    %260 = vector.broadcast %cst_113 : f32 to vector<8x128xf32>
    %261 = arith.addf %260, %259 : vector<8x128xf32>
    %262 = arith.divf %260, %261 : vector<8x128xf32>
    %263 = vector.extract_strided_slice %250 {offsets = [0, 256], sizes = [8, 128], strides = [1, 1]} : vector<8x512xf32> to vector<8x128xf32>
    %264 = math.tanh %263 : vector<8x128xf32>
    %265 = vector.extract_strided_slice %250 {offsets = [0, 384], sizes = [8, 128], strides = [1, 1]} : vector<8x512xf32> to vector<8x128xf32>
    %266 = arith.negf %265 : vector<8x128xf32>
    %267 = math.exp %266 : vector<8x128xf32>
    %cst_114 = arith.constant 1.000000e+00 : f32
    %268 = vector.broadcast %cst_114 : f32 to vector<8x128xf32>
    %269 = arith.addf %268, %267 : vector<8x128xf32>
    %270 = arith.divf %268, %269 : vector<8x128xf32>
    %c0_115 = arith.constant 0 : index
    %c0_116 = arith.constant 0 : index
    %271 = vector.load %arg11[%c0_115, %c0_116] : memref<8x128xf32, #tpu.memory_space<vmem>>, vector<8x128xf32>
    %272 = arith.mulf %262, %271 : vector<8x128xf32>
    %273 = arith.mulf %256, %264 : vector<8x128xf32>
    %274 = arith.addf %272, %273 : vector<8x128xf32>
    %275 = math.tanh %274 : vector<8x128xf32>
    %276 = arith.mulf %270, %275 : vector<8x128xf32>
    %c0_117 = arith.constant 0 : index
    %c0_118 = arith.constant 0 : index
    %277 = vector.load %arg11[%c0_117, %c0_118] : memref<8x128xf32, #tpu.memory_space<vmem>>, vector<8x128xf32>
    tpu.vector_store %arg11[%c0_117, %c0_118], %274 {strides = array<i32>} : memref<8x128xf32, #tpu.memory_space<vmem>>, vector<8x128xf32>,
    %c0_119 = arith.constant 0 : index
    %c0_120 = arith.constant 0 : index
    %278 = vector.load %arg10[%c0_119, %c0_120] : memref<8x128xf32, #tpu.memory_space<vmem>>, vector<8x128xf32>
    tpu.vector_store %arg10[%c0_119, %c0_120], %276 {strides = array<i32>} : memref<8x128xf32, #tpu.memory_space<vmem>>, vector<8x128xf32>,
    %279 = arith.index_cast %244 : i32 to index
    %c0_121 = arith.constant 0 : index
    %280 = vector.load %arg9[%279, %c0_121] : memref<64x128xf32, #tpu.memory_space<vmem>>, vector<8x128xf32>
    tpu.vector_store %arg9[%279, %c0_121], %276 {strides = array<i32>} : memref<64x128xf32, #tpu.memory_space<vmem>>, vector<8x128xf32>,
    %c7_i32 = arith.constant 7 : i32
    %c8_i32_122 = arith.constant 8 : i32
    %281 = arith.muli %c7_i32, %c8_i32_122 : i32
    %282 = tpu.assume_multiple %281, 8 : i32
    %c0_123 = arith.constant 0 : index
    %c0_124 = arith.constant 0 : index
    %283 = vector.load %arg10[%c0_123, %c0_124] : memref<8x128xf32, #tpu.memory_space<vmem>>, vector<8x128xf32>
    %284 = arith.index_cast %282 : i32 to index
    %c0_125 = arith.constant 0 : index
    %285 = vector.load %arg8[%284, %c0_125] : memref<64x512xf32, #tpu.memory_space<vmem>>, vector<8x512xf32>
    %286 = arith.truncf %283 : vector<8x128xf32> to vector<8x128xbf16>
    %cst_126 = arith.constant dense<0.000000e+00> : vector<8x512xf32>
    %287 = tpu.matmul %286, %14, %cst_126 {dimension_numbers = #tpu.dot_dimension_numbers<[1], [0], [0], [1], [0, 0, 1, 1], [], []>} : vector<8x128xbf16>, vector<128x512xbf16>, vector<8x512xf32> -> vector<8x512xf32>
    %288 = arith.addf %285, %287 : vector<8x512xf32>
    %289 = vector.extract_strided_slice %288 {offsets = [0, 0], sizes = [8, 128], strides = [1, 1]} : vector<8x512xf32> to vector<8x128xf32>
    %290 = arith.negf %289 : vector<8x128xf32>
    %291 = math.exp %290 : vector<8x128xf32>
    %cst_127 = arith.constant 1.000000e+00 : f32
    %292 = vector.broadcast %cst_127 : f32 to vector<8x128xf32>
    %293 = arith.addf %292, %291 : vector<8x128xf32>
    %294 = arith.divf %292, %293 : vector<8x128xf32>
    %295 = vector.extract_strided_slice %288 {offsets = [0, 128], sizes = [8, 128], strides = [1, 1]} : vector<8x512xf32> to vector<8x128xf32>
    %296 = arith.negf %295 : vector<8x128xf32>
    %297 = math.exp %296 : vector<8x128xf32>
    %cst_128 = arith.constant 1.000000e+00 : f32
    %298 = vector.broadcast %cst_128 : f32 to vector<8x128xf32>
    %299 = arith.addf %298, %297 : vector<8x128xf32>
    %300 = arith.divf %298, %299 : vector<8x128xf32>
    %301 = vector.extract_strided_slice %288 {offsets = [0, 256], sizes = [8, 128], strides = [1, 1]} : vector<8x512xf32> to vector<8x128xf32>
    %302 = math.tanh %301 : vector<8x128xf32>
    %303 = vector.extract_strided_slice %288 {offsets = [0, 384], sizes = [8, 128], strides = [1, 1]} : vector<8x512xf32> to vector<8x128xf32>
    %304 = arith.negf %303 : vector<8x128xf32>
    %305 = math.exp %304 : vector<8x128xf32>
    %cst_129 = arith.constant 1.000000e+00 : f32
    %306 = vector.broadcast %cst_129 : f32 to vector<8x128xf32>
    %307 = arith.addf %306, %305 : vector<8x128xf32>
    %308 = arith.divf %306, %307 : vector<8x128xf32>
    %c0_130 = arith.constant 0 : index
    %c0_131 = arith.constant 0 : index
    %309 = vector.load %arg11[%c0_130, %c0_131] : memref<8x128xf32, #tpu.memory_space<vmem>>, vector<8x128xf32>
    %310 = arith.mulf %300, %309 : vector<8x128xf32>
    %311 = arith.mulf %294, %302 : vector<8x128xf32>
    %312 = arith.addf %310, %311 : vector<8x128xf32>
    %313 = math.tanh %312 : vector<8x128xf32>
    %314 = arith.mulf %308, %313 : vector<8x128xf32>
    %c0_132 = arith.constant 0 : index
    %c0_133 = arith.constant 0 : index
    %315 = vector.load %arg11[%c0_132, %c0_133] : memref<8x128xf32, #tpu.memory_space<vmem>>, vector<8x128xf32>
    tpu.vector_store %arg11[%c0_132, %c0_133], %312 {strides = array<i32>} : memref<8x128xf32, #tpu.memory_space<vmem>>, vector<8x128xf32>,
    %c0_134 = arith.constant 0 : index
    %c0_135 = arith.constant 0 : index
    %316 = vector.load %arg10[%c0_134, %c0_135] : memref<8x128xf32, #tpu.memory_space<vmem>>, vector<8x128xf32>
    tpu.vector_store %arg10[%c0_134, %c0_135], %314 {strides = array<i32>} : memref<8x128xf32, #tpu.memory_space<vmem>>, vector<8x128xf32>,
    %317 = arith.index_cast %282 : i32 to index
    %c0_136 = arith.constant 0 : index
    %318 = vector.load %arg9[%317, %c0_136] : memref<64x128xf32, #tpu.memory_space<vmem>>, vector<8x128xf32>
    tpu.vector_store %arg9[%317, %c0_136], %314 {strides = array<i32>} : memref<64x128xf32, #tpu.memory_space<vmem>>, vector<8x128xf32>,
    %c8_i32_137 = arith.constant 8 : i32
    %c0_138 = arith.constant 0 : index
    %c0_139 = arith.constant 0 : index
    %319 = vector.load %arg9[%c0_138, %c0_139] : memref<64x128xf32, #tpu.memory_space<vmem>>, vector<64x128xf32>
    %320 = arith.truncf %319 : vector<64x128xf32> to vector<64x128xbf16>
    %c1 = arith.constant 1 : index
    %c0_140 = arith.constant 0 : index
    %c0_141 = arith.constant 0 : index
    %321 = vector.load %arg2[%c1, %c0_140, %c0_141] : memref<2x128x512xbf16, #tpu.memory_space<vmem>>, vector<1x128x512xbf16>
    %322 = vector.shape_cast %321 : vector<1x128x512xbf16> to vector<128x512xbf16>
    %cst_142 = arith.constant dense<0.000000e+00> : vector<64x512xf32>
    %323 = tpu.matmul %320, %322, %cst_142 {dimension_numbers = #tpu.dot_dimension_numbers<[1], [0], [0], [1], [0, 0, 1, 1], [], []>} : vector<64x128xbf16>, vector<128x512xbf16>, vector<64x512xf32> -> vector<64x512xf32>
    %c1_143 = arith.constant 1 : index
    %c0_144 = arith.constant 0 : index
    %c0_145 = arith.constant 0 : index
    %324 = vector.load %arg4[%c1_143, %c0_144, %c0_145] : memref<2x1x512xf32, #tpu.memory_space<vmem>>, vector<1x1x512xf32>
    %325 = vector.shape_cast %324 : vector<1x1x512xf32> to vector<1x512xf32>
    %326 = vector.broadcast %325 : vector<1x512xf32> to vector<64x512xf32>
    %327 = arith.addf %323, %326 : vector<64x512xf32>
    %c0_146 = arith.constant 0 : index
    %c0_147 = arith.constant 0 : index
    %328 = vector.load %arg8[%c0_146, %c0_147] : memref<64x512xf32, #tpu.memory_space<vmem>>, vector<64x512xf32>
    tpu.vector_store %arg8[%c0_146, %c0_147], %327 {strides = array<i32>} : memref<64x512xf32, #tpu.memory_space<vmem>>, vector<64x512xf32>,
    %cst_148 = arith.constant 0.000000e+00 : f32
    %329 = vector.broadcast %cst_148 : f32 to vector<8x128xf32>
    %c0_149 = arith.constant 0 : index
    %c0_150 = arith.constant 0 : index
    %330 = vector.load %arg10[%c0_149, %c0_150] : memref<8x128xf32, #tpu.memory_space<vmem>>, vector<8x128xf32>
    tpu.vector_store %arg10[%c0_149, %c0_150], %329 {strides = array<i32>} : memref<8x128xf32, #tpu.memory_space<vmem>>, vector<8x128xf32>,
    %cst_151 = arith.constant 0.000000e+00 : f32
    %331 = vector.broadcast %cst_151 : f32 to vector<8x128xf32>
    %c0_152 = arith.constant 0 : index
    %c0_153 = arith.constant 0 : index
    %332 = vector.load %arg11[%c0_152, %c0_153] : memref<8x128xf32, #tpu.memory_space<vmem>>, vector<8x128xf32>
    tpu.vector_store %arg11[%c0_152, %c0_153], %331 {strides = array<i32>} : memref<8x128xf32, #tpu.memory_space<vmem>>, vector<8x128xf32>,
    %c1_154 = arith.constant 1 : index
    %c0_155 = arith.constant 0 : index
    %c0_156 = arith.constant 0 : index
    %333 = vector.load %arg3[%c1_154, %c0_155, %c0_156] : memref<2x128x512xbf16, #tpu.memory_space<vmem>>, vector<1x128x512xbf16>
    %334 = vector.shape_cast %333 : vector<1x128x512xbf16> to vector<128x512xbf16>
    %c0_i32_157 = arith.constant 0 : i32
    %c8_i32_158 = arith.constant 8 : i32
    %335 = arith.muli %c0_i32_157, %c8_i32_158 : i32
    %336 = tpu.assume_multiple %335, 8 : i32
    %c0_159 = arith.constant 0 : index
    %c0_160 = arith.constant 0 : index
    %337 = vector.load %arg10[%c0_159, %c0_160] : memref<8x128xf32, #tpu.memory_space<vmem>>, vector<8x128xf32>
    %338 = arith.index_cast %336 : i32 to index
    %c0_161 = arith.constant 0 : index
    %339 = vector.load %arg8[%338, %c0_161] : memref<64x512xf32, #tpu.memory_space<vmem>>, vector<8x512xf32>
    %340 = arith.truncf %337 : vector<8x128xf32> to vector<8x128xbf16>
    %cst_162 = arith.constant dense<0.000000e+00> : vector<8x512xf32>
    %341 = tpu.matmul %340, %334, %cst_162 {dimension_numbers = #tpu.dot_dimension_numbers<[1], [0], [0], [1], [0, 0, 1, 1], [], []>} : vector<8x128xbf16>, vector<128x512xbf16>, vector<8x512xf32> -> vector<8x512xf32>
    %342 = arith.addf %339, %341 : vector<8x512xf32>
    %343 = vector.extract_strided_slice %342 {offsets = [0, 0], sizes = [8, 128], strides = [1, 1]} : vector<8x512xf32> to vector<8x128xf32>
    %344 = arith.negf %343 : vector<8x128xf32>
    %345 = math.exp %344 : vector<8x128xf32>
    %cst_163 = arith.constant 1.000000e+00 : f32
    %346 = vector.broadcast %cst_163 : f32 to vector<8x128xf32>
    %347 = arith.addf %346, %345 : vector<8x128xf32>
    %348 = arith.divf %346, %347 : vector<8x128xf32>
    %349 = vector.extract_strided_slice %342 {offsets = [0, 128], sizes = [8, 128], strides = [1, 1]} : vector<8x512xf32> to vector<8x128xf32>
    %350 = arith.negf %349 : vector<8x128xf32>
    %351 = math.exp %350 : vector<8x128xf32>
    %cst_164 = arith.constant 1.000000e+00 : f32
    %352 = vector.broadcast %cst_164 : f32 to vector<8x128xf32>
    %353 = arith.addf %352, %351 : vector<8x128xf32>
    %354 = arith.divf %352, %353 : vector<8x128xf32>
    %355 = vector.extract_strided_slice %342 {offsets = [0, 256], sizes = [8, 128], strides = [1, 1]} : vector<8x512xf32> to vector<8x128xf32>
    %356 = math.tanh %355 : vector<8x128xf32>
    %357 = vector.extract_strided_slice %342 {offsets = [0, 384], sizes = [8, 128], strides = [1, 1]} : vector<8x512xf32> to vector<8x128xf32>
    %358 = arith.negf %357 : vector<8x128xf32>
    %359 = math.exp %358 : vector<8x128xf32>
    %cst_165 = arith.constant 1.000000e+00 : f32
    %360 = vector.broadcast %cst_165 : f32 to vector<8x128xf32>
    %361 = arith.addf %360, %359 : vector<8x128xf32>
    %362 = arith.divf %360, %361 : vector<8x128xf32>
    %c0_166 = arith.constant 0 : index
    %c0_167 = arith.constant 0 : index
    %363 = vector.load %arg11[%c0_166, %c0_167] : memref<8x128xf32, #tpu.memory_space<vmem>>, vector<8x128xf32>
    %364 = arith.mulf %354, %363 : vector<8x128xf32>
    %365 = arith.mulf %348, %356 : vector<8x128xf32>
    %366 = arith.addf %364, %365 : vector<8x128xf32>
    %367 = math.tanh %366 : vector<8x128xf32>
    %368 = arith.mulf %362, %367 : vector<8x128xf32>
    %c0_168 = arith.constant 0 : index
    %c0_169 = arith.constant 0 : index
    %369 = vector.load %arg11[%c0_168, %c0_169] : memref<8x128xf32, #tpu.memory_space<vmem>>, vector<8x128xf32>
    tpu.vector_store %arg11[%c0_168, %c0_169], %366 {strides = array<i32>} : memref<8x128xf32, #tpu.memory_space<vmem>>, vector<8x128xf32>,
    %c0_170 = arith.constant 0 : index
    %c0_171 = arith.constant 0 : index
    %370 = vector.load %arg10[%c0_170, %c0_171] : memref<8x128xf32, #tpu.memory_space<vmem>>, vector<8x128xf32>
    tpu.vector_store %arg10[%c0_170, %c0_171], %368 {strides = array<i32>} : memref<8x128xf32, #tpu.memory_space<vmem>>, vector<8x128xf32>,
    %c1_i32_172 = arith.constant 1 : i32
    %c8_i32_173 = arith.constant 8 : i32
    %371 = arith.muli %c1_i32_172, %c8_i32_173 : i32
    %372 = tpu.assume_multiple %371, 8 : i32
    %c0_174 = arith.constant 0 : index
    %c0_175 = arith.constant 0 : index
    %373 = vector.load %arg10[%c0_174, %c0_175] : memref<8x128xf32, #tpu.memory_space<vmem>>, vector<8x128xf32>
    %374 = arith.index_cast %372 : i32 to index
    %c0_176 = arith.constant 0 : index
    %375 = vector.load %arg8[%374, %c0_176] : memref<64x512xf32, #tpu.memory_space<vmem>>, vector<8x512xf32>
    %376 = arith.truncf %373 : vector<8x128xf32> to vector<8x128xbf16>
    %cst_177 = arith.constant dense<0.000000e+00> : vector<8x512xf32>
    %377 = tpu.matmul %376, %334, %cst_177 {dimension_numbers = #tpu.dot_dimension_numbers<[1], [0], [0], [1], [0, 0, 1, 1], [], []>} : vector<8x128xbf16>, vector<128x512xbf16>, vector<8x512xf32> -> vector<8x512xf32>
    %378 = arith.addf %375, %377 : vector<8x512xf32>
    %379 = vector.extract_strided_slice %378 {offsets = [0, 0], sizes = [8, 128], strides = [1, 1]} : vector<8x512xf32> to vector<8x128xf32>
    %380 = arith.negf %379 : vector<8x128xf32>
    %381 = math.exp %380 : vector<8x128xf32>
    %cst_178 = arith.constant 1.000000e+00 : f32
    %382 = vector.broadcast %cst_178 : f32 to vector<8x128xf32>
    %383 = arith.addf %382, %381 : vector<8x128xf32>
    %384 = arith.divf %382, %383 : vector<8x128xf32>
    %385 = vector.extract_strided_slice %378 {offsets = [0, 128], sizes = [8, 128], strides = [1, 1]} : vector<8x512xf32> to vector<8x128xf32>
    %386 = arith.negf %385 : vector<8x128xf32>
    %387 = math.exp %386 : vector<8x128xf32>
    %cst_179 = arith.constant 1.000000e+00 : f32
    %388 = vector.broadcast %cst_179 : f32 to vector<8x128xf32>
    %389 = arith.addf %388, %387 : vector<8x128xf32>
    %390 = arith.divf %388, %389 : vector<8x128xf32>
    %391 = vector.extract_strided_slice %378 {offsets = [0, 256], sizes = [8, 128], strides = [1, 1]} : vector<8x512xf32> to vector<8x128xf32>
    %392 = math.tanh %391 : vector<8x128xf32>
    %393 = vector.extract_strided_slice %378 {offsets = [0, 384], sizes = [8, 128], strides = [1, 1]} : vector<8x512xf32> to vector<8x128xf32>
    %394 = arith.negf %393 : vector<8x128xf32>
    %395 = math.exp %394 : vector<8x128xf32>
    %cst_180 = arith.constant 1.000000e+00 : f32
    %396 = vector.broadcast %cst_180 : f32 to vector<8x128xf32>
    %397 = arith.addf %396, %395 : vector<8x128xf32>
    %398 = arith.divf %396, %397 : vector<8x128xf32>
    %c0_181 = arith.constant 0 : index
    %c0_182 = arith.constant 0 : index
    %399 = vector.load %arg11[%c0_181, %c0_182] : memref<8x128xf32, #tpu.memory_space<vmem>>, vector<8x128xf32>
    %400 = arith.mulf %390, %399 : vector<8x128xf32>
    %401 = arith.mulf %384, %392 : vector<8x128xf32>
    %402 = arith.addf %400, %401 : vector<8x128xf32>
    %403 = math.tanh %402 : vector<8x128xf32>
    %404 = arith.mulf %398, %403 : vector<8x128xf32>
    %c0_183 = arith.constant 0 : index
    %c0_184 = arith.constant 0 : index
    %405 = vector.load %arg11[%c0_183, %c0_184] : memref<8x128xf32, #tpu.memory_space<vmem>>, vector<8x128xf32>
    tpu.vector_store %arg11[%c0_183, %c0_184], %402 {strides = array<i32>} : memref<8x128xf32, #tpu.memory_space<vmem>>, vector<8x128xf32>,
    %c0_185 = arith.constant 0 : index
    %c0_186 = arith.constant 0 : index
    %406 = vector.load %arg10[%c0_185, %c0_186] : memref<8x128xf32, #tpu.memory_space<vmem>>, vector<8x128xf32>
    tpu.vector_store %arg10[%c0_185, %c0_186], %404 {strides = array<i32>} : memref<8x128xf32, #tpu.memory_space<vmem>>, vector<8x128xf32>,
    %c2_i32_187 = arith.constant 2 : i32
    %c8_i32_188 = arith.constant 8 : i32
    %407 = arith.muli %c2_i32_187, %c8_i32_188 : i32
    %408 = tpu.assume_multiple %407, 8 : i32
    %c0_189 = arith.constant 0 : index
    %c0_190 = arith.constant 0 : index
    %409 = vector.load %arg10[%c0_189, %c0_190] : memref<8x128xf32, #tpu.memory_space<vmem>>, vector<8x128xf32>
    %410 = arith.index_cast %408 : i32 to index
    %c0_191 = arith.constant 0 : index
    %411 = vector.load %arg8[%410, %c0_191] : memref<64x512xf32, #tpu.memory_space<vmem>>, vector<8x512xf32>
    %412 = arith.truncf %409 : vector<8x128xf32> to vector<8x128xbf16>
    %cst_192 = arith.constant dense<0.000000e+00> : vector<8x512xf32>
    %413 = tpu.matmul %412, %334, %cst_192 {dimension_numbers = #tpu.dot_dimension_numbers<[1], [0], [0], [1], [0, 0, 1, 1], [], []>} : vector<8x128xbf16>, vector<128x512xbf16>, vector<8x512xf32> -> vector<8x512xf32>
    %414 = arith.addf %411, %413 : vector<8x512xf32>
    %415 = vector.extract_strided_slice %414 {offsets = [0, 0], sizes = [8, 128], strides = [1, 1]} : vector<8x512xf32> to vector<8x128xf32>
    %416 = arith.negf %415 : vector<8x128xf32>
    %417 = math.exp %416 : vector<8x128xf32>
    %cst_193 = arith.constant 1.000000e+00 : f32
    %418 = vector.broadcast %cst_193 : f32 to vector<8x128xf32>
    %419 = arith.addf %418, %417 : vector<8x128xf32>
    %420 = arith.divf %418, %419 : vector<8x128xf32>
    %421 = vector.extract_strided_slice %414 {offsets = [0, 128], sizes = [8, 128], strides = [1, 1]} : vector<8x512xf32> to vector<8x128xf32>
    %422 = arith.negf %421 : vector<8x128xf32>
    %423 = math.exp %422 : vector<8x128xf32>
    %cst_194 = arith.constant 1.000000e+00 : f32
    %424 = vector.broadcast %cst_194 : f32 to vector<8x128xf32>
    %425 = arith.addf %424, %423 : vector<8x128xf32>
    %426 = arith.divf %424, %425 : vector<8x128xf32>
    %427 = vector.extract_strided_slice %414 {offsets = [0, 256], sizes = [8, 128], strides = [1, 1]} : vector<8x512xf32> to vector<8x128xf32>
    %428 = math.tanh %427 : vector<8x128xf32>
    %429 = vector.extract_strided_slice %414 {offsets = [0, 384], sizes = [8, 128], strides = [1, 1]} : vector<8x512xf32> to vector<8x128xf32>
    %430 = arith.negf %429 : vector<8x128xf32>
    %431 = math.exp %430 : vector<8x128xf32>
    %cst_195 = arith.constant 1.000000e+00 : f32
    %432 = vector.broadcast %cst_195 : f32 to vector<8x128xf32>
    %433 = arith.addf %432, %431 : vector<8x128xf32>
    %434 = arith.divf %432, %433 : vector<8x128xf32>
    %c0_196 = arith.constant 0 : index
    %c0_197 = arith.constant 0 : index
    %435 = vector.load %arg11[%c0_196, %c0_197] : memref<8x128xf32, #tpu.memory_space<vmem>>, vector<8x128xf32>
    %436 = arith.mulf %426, %435 : vector<8x128xf32>
    %437 = arith.mulf %420, %428 : vector<8x128xf32>
    %438 = arith.addf %436, %437 : vector<8x128xf32>
    %439 = math.tanh %438 : vector<8x128xf32>
    %440 = arith.mulf %434, %439 : vector<8x128xf32>
    %c0_198 = arith.constant 0 : index
    %c0_199 = arith.constant 0 : index
    %441 = vector.load %arg11[%c0_198, %c0_199] : memref<8x128xf32, #tpu.memory_space<vmem>>, vector<8x128xf32>
    tpu.vector_store %arg11[%c0_198, %c0_199], %438 {strides = array<i32>} : memref<8x128xf32, #tpu.memory_space<vmem>>, vector<8x128xf32>,
    %c0_200 = arith.constant 0 : index
    %c0_201 = arith.constant 0 : index
    %442 = vector.load %arg10[%c0_200, %c0_201] : memref<8x128xf32, #tpu.memory_space<vmem>>, vector<8x128xf32>
    tpu.vector_store %arg10[%c0_200, %c0_201], %440 {strides = array<i32>} : memref<8x128xf32, #tpu.memory_space<vmem>>, vector<8x128xf32>,
    %c3_i32_202 = arith.constant 3 : i32
    %c8_i32_203 = arith.constant 8 : i32
    %443 = arith.muli %c3_i32_202, %c8_i32_203 : i32
    %444 = tpu.assume_multiple %443, 8 : i32
    %c0_204 = arith.constant 0 : index
    %c0_205 = arith.constant 0 : index
    %445 = vector.load %arg10[%c0_204, %c0_205] : memref<8x128xf32, #tpu.memory_space<vmem>>, vector<8x128xf32>
    %446 = arith.index_cast %444 : i32 to index
    %c0_206 = arith.constant 0 : index
    %447 = vector.load %arg8[%446, %c0_206] : memref<64x512xf32, #tpu.memory_space<vmem>>, vector<8x512xf32>
    %448 = arith.truncf %445 : vector<8x128xf32> to vector<8x128xbf16>
    %cst_207 = arith.constant dense<0.000000e+00> : vector<8x512xf32>
    %449 = tpu.matmul %448, %334, %cst_207 {dimension_numbers = #tpu.dot_dimension_numbers<[1], [0], [0], [1], [0, 0, 1, 1], [], []>} : vector<8x128xbf16>, vector<128x512xbf16>, vector<8x512xf32> -> vector<8x512xf32>
    %450 = arith.addf %447, %449 : vector<8x512xf32>
    %451 = vector.extract_strided_slice %450 {offsets = [0, 0], sizes = [8, 128], strides = [1, 1]} : vector<8x512xf32> to vector<8x128xf32>
    %452 = arith.negf %451 : vector<8x128xf32>
    %453 = math.exp %452 : vector<8x128xf32>
    %cst_208 = arith.constant 1.000000e+00 : f32
    %454 = vector.broadcast %cst_208 : f32 to vector<8x128xf32>
    %455 = arith.addf %454, %453 : vector<8x128xf32>
    %456 = arith.divf %454, %455 : vector<8x128xf32>
    %457 = vector.extract_strided_slice %450 {offsets = [0, 128], sizes = [8, 128], strides = [1, 1]} : vector<8x512xf32> to vector<8x128xf32>
    %458 = arith.negf %457 : vector<8x128xf32>
    %459 = math.exp %458 : vector<8x128xf32>
    %cst_209 = arith.constant 1.000000e+00 : f32
    %460 = vector.broadcast %cst_209 : f32 to vector<8x128xf32>
    %461 = arith.addf %460, %459 : vector<8x128xf32>
    %462 = arith.divf %460, %461 : vector<8x128xf32>
    %463 = vector.extract_strided_slice %450 {offsets = [0, 256], sizes = [8, 128], strides = [1, 1]} : vector<8x512xf32> to vector<8x128xf32>
    %464 = math.tanh %463 : vector<8x128xf32>
    %465 = vector.extract_strided_slice %450 {offsets = [0, 384], sizes = [8, 128], strides = [1, 1]} : vector<8x512xf32> to vector<8x128xf32>
    %466 = arith.negf %465 : vector<8x128xf32>
    %467 = math.exp %466 : vector<8x128xf32>
    %cst_210 = arith.constant 1.000000e+00 : f32
    %468 = vector.broadcast %cst_210 : f32 to vector<8x128xf32>
    %469 = arith.addf %468, %467 : vector<8x128xf32>
    %470 = arith.divf %468, %469 : vector<8x128xf32>
    %c0_211 = arith.constant 0 : index
    %c0_212 = arith.constant 0 : index
    %471 = vector.load %arg11[%c0_211, %c0_212] : memref<8x128xf32, #tpu.memory_space<vmem>>, vector<8x128xf32>
    %472 = arith.mulf %462, %471 : vector<8x128xf32>
    %473 = arith.mulf %456, %464 : vector<8x128xf32>
    %474 = arith.addf %472, %473 : vector<8x128xf32>
    %475 = math.tanh %474 : vector<8x128xf32>
    %476 = arith.mulf %470, %475 : vector<8x128xf32>
    %c0_213 = arith.constant 0 : index
    %c0_214 = arith.constant 0 : index
    %477 = vector.load %arg11[%c0_213, %c0_214] : memref<8x128xf32, #tpu.memory_space<vmem>>, vector<8x128xf32>
    tpu.vector_store %arg11[%c0_213, %c0_214], %474 {strides = array<i32>} : memref<8x128xf32, #tpu.memory_space<vmem>>, vector<8x128xf32>,
    %c0_215 = arith.constant 0 : index
    %c0_216 = arith.constant 0 : index
    %478 = vector.load %arg10[%c0_215, %c0_216] : memref<8x128xf32, #tpu.memory_space<vmem>>, vector<8x128xf32>
    tpu.vector_store %arg10[%c0_215, %c0_216], %476 {strides = array<i32>} : memref<8x128xf32, #tpu.memory_space<vmem>>, vector<8x128xf32>,
    %c4_i32_217 = arith.constant 4 : i32
    %c8_i32_218 = arith.constant 8 : i32
    %479 = arith.muli %c4_i32_217, %c8_i32_218 : i32
    %480 = tpu.assume_multiple %479, 8 : i32
    %c0_219 = arith.constant 0 : index
    %c0_220 = arith.constant 0 : index
    %481 = vector.load %arg10[%c0_219, %c0_220] : memref<8x128xf32, #tpu.memory_space<vmem>>, vector<8x128xf32>
    %482 = arith.index_cast %480 : i32 to index
    %c0_221 = arith.constant 0 : index
    %483 = vector.load %arg8[%482, %c0_221] : memref<64x512xf32, #tpu.memory_space<vmem>>, vector<8x512xf32>
    %484 = arith.truncf %481 : vector<8x128xf32> to vector<8x128xbf16>
    %cst_222 = arith.constant dense<0.000000e+00> : vector<8x512xf32>
    %485 = tpu.matmul %484, %334, %cst_222 {dimension_numbers = #tpu.dot_dimension_numbers<[1], [0], [0], [1], [0, 0, 1, 1], [], []>} : vector<8x128xbf16>, vector<128x512xbf16>, vector<8x512xf32> -> vector<8x512xf32>
    %486 = arith.addf %483, %485 : vector<8x512xf32>
    %487 = vector.extract_strided_slice %486 {offsets = [0, 0], sizes = [8, 128], strides = [1, 1]} : vector<8x512xf32> to vector<8x128xf32>
    %488 = arith.negf %487 : vector<8x128xf32>
    %489 = math.exp %488 : vector<8x128xf32>
    %cst_223 = arith.constant 1.000000e+00 : f32
    %490 = vector.broadcast %cst_223 : f32 to vector<8x128xf32>
    %491 = arith.addf %490, %489 : vector<8x128xf32>
    %492 = arith.divf %490, %491 : vector<8x128xf32>
    %493 = vector.extract_strided_slice %486 {offsets = [0, 128], sizes = [8, 128], strides = [1, 1]} : vector<8x512xf32> to vector<8x128xf32>
    %494 = arith.negf %493 : vector<8x128xf32>
    %495 = math.exp %494 : vector<8x128xf32>
    %cst_224 = arith.constant 1.000000e+00 : f32
    %496 = vector.broadcast %cst_224 : f32 to vector<8x128xf32>
    %497 = arith.addf %496, %495 : vector<8x128xf32>
    %498 = arith.divf %496, %497 : vector<8x128xf32>
    %499 = vector.extract_strided_slice %486 {offsets = [0, 256], sizes = [8, 128], strides = [1, 1]} : vector<8x512xf32> to vector<8x128xf32>
    %500 = math.tanh %499 : vector<8x128xf32>
    %501 = vector.extract_strided_slice %486 {offsets = [0, 384], sizes = [8, 128], strides = [1, 1]} : vector<8x512xf32> to vector<8x128xf32>
    %502 = arith.negf %501 : vector<8x128xf32>
    %503 = math.exp %502 : vector<8x128xf32>
    %cst_225 = arith.constant 1.000000e+00 : f32
    %504 = vector.broadcast %cst_225 : f32 to vector<8x128xf32>
    %505 = arith.addf %504, %503 : vector<8x128xf32>
    %506 = arith.divf %504, %505 : vector<8x128xf32>
    %c0_226 = arith.constant 0 : index
    %c0_227 = arith.constant 0 : index
    %507 = vector.load %arg11[%c0_226, %c0_227] : memref<8x128xf32, #tpu.memory_space<vmem>>, vector<8x128xf32>
    %508 = arith.mulf %498, %507 : vector<8x128xf32>
    %509 = arith.mulf %492, %500 : vector<8x128xf32>
    %510 = arith.addf %508, %509 : vector<8x128xf32>
    %511 = math.tanh %510 : vector<8x128xf32>
    %512 = arith.mulf %506, %511 : vector<8x128xf32>
    %c0_228 = arith.constant 0 : index
    %c0_229 = arith.constant 0 : index
    %513 = vector.load %arg11[%c0_228, %c0_229] : memref<8x128xf32, #tpu.memory_space<vmem>>, vector<8x128xf32>
    tpu.vector_store %arg11[%c0_228, %c0_229], %510 {strides = array<i32>} : memref<8x128xf32, #tpu.memory_space<vmem>>, vector<8x128xf32>,
    %c0_230 = arith.constant 0 : index
    %c0_231 = arith.constant 0 : index
    %514 = vector.load %arg10[%c0_230, %c0_231] : memref<8x128xf32, #tpu.memory_space<vmem>>, vector<8x128xf32>
    tpu.vector_store %arg10[%c0_230, %c0_231], %512 {strides = array<i32>} : memref<8x128xf32, #tpu.memory_space<vmem>>, vector<8x128xf32>,
    %c5_i32_232 = arith.constant 5 : i32
    %c8_i32_233 = arith.constant 8 : i32
    %515 = arith.muli %c5_i32_232, %c8_i32_233 : i32
    %516 = tpu.assume_multiple %515, 8 : i32
    %c0_234 = arith.constant 0 : index
    %c0_235 = arith.constant 0 : index
    %517 = vector.load %arg10[%c0_234, %c0_235] : memref<8x128xf32, #tpu.memory_space<vmem>>, vector<8x128xf32>
    %518 = arith.index_cast %516 : i32 to index
    %c0_236 = arith.constant 0 : index
    %519 = vector.load %arg8[%518, %c0_236] : memref<64x512xf32, #tpu.memory_space<vmem>>, vector<8x512xf32>
    %520 = arith.truncf %517 : vector<8x128xf32> to vector<8x128xbf16>
    %cst_237 = arith.constant dense<0.000000e+00> : vector<8x512xf32>
    %521 = tpu.matmul %520, %334, %cst_237 {dimension_numbers = #tpu.dot_dimension_numbers<[1], [0], [0], [1], [0, 0, 1, 1], [], []>} : vector<8x128xbf16>, vector<128x512xbf16>, vector<8x512xf32> -> vector<8x512xf32>
    %522 = arith.addf %519, %521 : vector<8x512xf32>
    %523 = vector.extract_strided_slice %522 {offsets = [0, 0], sizes = [8, 128], strides = [1, 1]} : vector<8x512xf32> to vector<8x128xf32>
    %524 = arith.negf %523 : vector<8x128xf32>
    %525 = math.exp %524 : vector<8x128xf32>
    %cst_238 = arith.constant 1.000000e+00 : f32
    %526 = vector.broadcast %cst_238 : f32 to vector<8x128xf32>
    %527 = arith.addf %526, %525 : vector<8x128xf32>
    %528 = arith.divf %526, %527 : vector<8x128xf32>
    %529 = vector.extract_strided_slice %522 {offsets = [0, 128], sizes = [8, 128], strides = [1, 1]} : vector<8x512xf32> to vector<8x128xf32>
    %530 = arith.negf %529 : vector<8x128xf32>
    %531 = math.exp %530 : vector<8x128xf32>
    %cst_239 = arith.constant 1.000000e+00 : f32
    %532 = vector.broadcast %cst_239 : f32 to vector<8x128xf32>
    %533 = arith.addf %532, %531 : vector<8x128xf32>
    %534 = arith.divf %532, %533 : vector<8x128xf32>
    %535 = vector.extract_strided_slice %522 {offsets = [0, 256], sizes = [8, 128], strides = [1, 1]} : vector<8x512xf32> to vector<8x128xf32>
    %536 = math.tanh %535 : vector<8x128xf32>
    %537 = vector.extract_strided_slice %522 {offsets = [0, 384], sizes = [8, 128], strides = [1, 1]} : vector<8x512xf32> to vector<8x128xf32>
    %538 = arith.negf %537 : vector<8x128xf32>
    %539 = math.exp %538 : vector<8x128xf32>
    %cst_240 = arith.constant 1.000000e+00 : f32
    %540 = vector.broadcast %cst_240 : f32 to vector<8x128xf32>
    %541 = arith.addf %540, %539 : vector<8x128xf32>
    %542 = arith.divf %540, %541 : vector<8x128xf32>
    %c0_241 = arith.constant 0 : index
    %c0_242 = arith.constant 0 : index
    %543 = vector.load %arg11[%c0_241, %c0_242] : memref<8x128xf32, #tpu.memory_space<vmem>>, vector<8x128xf32>
    %544 = arith.mulf %534, %543 : vector<8x128xf32>
    %545 = arith.mulf %528, %536 : vector<8x128xf32>
    %546 = arith.addf %544, %545 : vector<8x128xf32>
    %547 = math.tanh %546 : vector<8x128xf32>
    %548 = arith.mulf %542, %547 : vector<8x128xf32>
    %c0_243 = arith.constant 0 : index
    %c0_244 = arith.constant 0 : index
    %549 = vector.load %arg11[%c0_243, %c0_244] : memref<8x128xf32, #tpu.memory_space<vmem>>, vector<8x128xf32>
    tpu.vector_store %arg11[%c0_243, %c0_244], %546 {strides = array<i32>} : memref<8x128xf32, #tpu.memory_space<vmem>>, vector<8x128xf32>,
    %c0_245 = arith.constant 0 : index
    %c0_246 = arith.constant 0 : index
    %550 = vector.load %arg10[%c0_245, %c0_246] : memref<8x128xf32, #tpu.memory_space<vmem>>, vector<8x128xf32>
    tpu.vector_store %arg10[%c0_245, %c0_246], %548 {strides = array<i32>} : memref<8x128xf32, #tpu.memory_space<vmem>>, vector<8x128xf32>,
    %c6_i32_247 = arith.constant 6 : i32
    %c8_i32_248 = arith.constant 8 : i32
    %551 = arith.muli %c6_i32_247, %c8_i32_248 : i32
    %552 = tpu.assume_multiple %551, 8 : i32
    %c0_249 = arith.constant 0 : index
    %c0_250 = arith.constant 0 : index
    %553 = vector.load %arg10[%c0_249, %c0_250] : memref<8x128xf32, #tpu.memory_space<vmem>>, vector<8x128xf32>
    %554 = arith.index_cast %552 : i32 to index
    %c0_251 = arith.constant 0 : index
    %555 = vector.load %arg8[%554, %c0_251] : memref<64x512xf32, #tpu.memory_space<vmem>>, vector<8x512xf32>
    %556 = arith.truncf %553 : vector<8x128xf32> to vector<8x128xbf16>
    %cst_252 = arith.constant dense<0.000000e+00> : vector<8x512xf32>
    %557 = tpu.matmul %556, %334, %cst_252 {dimension_numbers = #tpu.dot_dimension_numbers<[1], [0], [0], [1], [0, 0, 1, 1], [], []>} : vector<8x128xbf16>, vector<128x512xbf16>, vector<8x512xf32> -> vector<8x512xf32>
    %558 = arith.addf %555, %557 : vector<8x512xf32>
    %559 = vector.extract_strided_slice %558 {offsets = [0, 0], sizes = [8, 128], strides = [1, 1]} : vector<8x512xf32> to vector<8x128xf32>
    %560 = arith.negf %559 : vector<8x128xf32>
    %561 = math.exp %560 : vector<8x128xf32>
    %cst_253 = arith.constant 1.000000e+00 : f32
    %562 = vector.broadcast %cst_253 : f32 to vector<8x128xf32>
    %563 = arith.addf %562, %561 : vector<8x128xf32>
    %564 = arith.divf %562, %563 : vector<8x128xf32>
    %565 = vector.extract_strided_slice %558 {offsets = [0, 128], sizes = [8, 128], strides = [1, 1]} : vector<8x512xf32> to vector<8x128xf32>
    %566 = arith.negf %565 : vector<8x128xf32>
    %567 = math.exp %566 : vector<8x128xf32>
    %cst_254 = arith.constant 1.000000e+00 : f32
    %568 = vector.broadcast %cst_254 : f32 to vector<8x128xf32>
    %569 = arith.addf %568, %567 : vector<8x128xf32>
    %570 = arith.divf %568, %569 : vector<8x128xf32>
    %571 = vector.extract_strided_slice %558 {offsets = [0, 256], sizes = [8, 128], strides = [1, 1]} : vector<8x512xf32> to vector<8x128xf32>
    %572 = math.tanh %571 : vector<8x128xf32>
    %573 = vector.extract_strided_slice %558 {offsets = [0, 384], sizes = [8, 128], strides = [1, 1]} : vector<8x512xf32> to vector<8x128xf32>
    %574 = arith.negf %573 : vector<8x128xf32>
    %575 = math.exp %574 : vector<8x128xf32>
    %cst_255 = arith.constant 1.000000e+00 : f32
    %576 = vector.broadcast %cst_255 : f32 to vector<8x128xf32>
    %577 = arith.addf %576, %575 : vector<8x128xf32>
    %578 = arith.divf %576, %577 : vector<8x128xf32>
    %c0_256 = arith.constant 0 : index
    %c0_257 = arith.constant 0 : index
    %579 = vector.load %arg11[%c0_256, %c0_257] : memref<8x128xf32, #tpu.memory_space<vmem>>, vector<8x128xf32>
    %580 = arith.mulf %570, %579 : vector<8x128xf32>
    %581 = arith.mulf %564, %572 : vector<8x128xf32>
    %582 = arith.addf %580, %581 : vector<8x128xf32>
    %583 = math.tanh %582 : vector<8x128xf32>
    %584 = arith.mulf %578, %583 : vector<8x128xf32>
    %c0_258 = arith.constant 0 : index
    %c0_259 = arith.constant 0 : index
    %585 = vector.load %arg11[%c0_258, %c0_259] : memref<8x128xf32, #tpu.memory_space<vmem>>, vector<8x128xf32>
    tpu.vector_store %arg11[%c0_258, %c0_259], %582 {strides = array<i32>} : memref<8x128xf32, #tpu.memory_space<vmem>>, vector<8x128xf32>,
    %c0_260 = arith.constant 0 : index
    %c0_261 = arith.constant 0 : index
    %586 = vector.load %arg10[%c0_260, %c0_261] : memref<8x128xf32, #tpu.memory_space<vmem>>, vector<8x128xf32>
    tpu.vector_store %arg10[%c0_260, %c0_261], %584 {strides = array<i32>} : memref<8x128xf32, #tpu.memory_space<vmem>>, vector<8x128xf32>,
    %c7_i32_262 = arith.constant 7 : i32
    %c8_i32_263 = arith.constant 8 : i32
    %587 = arith.muli %c7_i32_262, %c8_i32_263 : i32
    %588 = tpu.assume_multiple %587, 8 : i32
    %c0_264 = arith.constant 0 : index
    %c0_265 = arith.constant 0 : index
    %589 = vector.load %arg10[%c0_264, %c0_265] : memref<8x128xf32, #tpu.memory_space<vmem>>, vector<8x128xf32>
    %590 = arith.index_cast %588 : i32 to index
    %c0_266 = arith.constant 0 : index
    %591 = vector.load %arg8[%590, %c0_266] : memref<64x512xf32, #tpu.memory_space<vmem>>, vector<8x512xf32>
    %592 = arith.truncf %589 : vector<8x128xf32> to vector<8x128xbf16>
    %cst_267 = arith.constant dense<0.000000e+00> : vector<8x512xf32>
    %593 = tpu.matmul %592, %334, %cst_267 {dimension_numbers = #tpu.dot_dimension_numbers<[1], [0], [0], [1], [0, 0, 1, 1], [], []>} : vector<8x128xbf16>, vector<128x512xbf16>, vector<8x512xf32> -> vector<8x512xf32>
    %594 = arith.addf %591, %593 : vector<8x512xf32>
    %595 = vector.extract_strided_slice %594 {offsets = [0, 0], sizes = [8, 128], strides = [1, 1]} : vector<8x512xf32> to vector<8x128xf32>
    %596 = arith.negf %595 : vector<8x128xf32>
    %597 = math.exp %596 : vector<8x128xf32>
    %cst_268 = arith.constant 1.000000e+00 : f32
    %598 = vector.broadcast %cst_268 : f32 to vector<8x128xf32>
    %599 = arith.addf %598, %597 : vector<8x128xf32>
    %600 = arith.divf %598, %599 : vector<8x128xf32>
    %601 = vector.extract_strided_slice %594 {offsets = [0, 128], sizes = [8, 128], strides = [1, 1]} : vector<8x512xf32> to vector<8x128xf32>
    %602 = arith.negf %601 : vector<8x128xf32>
    %603 = math.exp %602 : vector<8x128xf32>
    %cst_269 = arith.constant 1.000000e+00 : f32
    %604 = vector.broadcast %cst_269 : f32 to vector<8x128xf32>
    %605 = arith.addf %604, %603 : vector<8x128xf32>
    %606 = arith.divf %604, %605 : vector<8x128xf32>
    %607 = vector.extract_strided_slice %594 {offsets = [0, 256], sizes = [8, 128], strides = [1, 1]} : vector<8x512xf32> to vector<8x128xf32>
    %608 = math.tanh %607 : vector<8x128xf32>
    %609 = vector.extract_strided_slice %594 {offsets = [0, 384], sizes = [8, 128], strides = [1, 1]} : vector<8x512xf32> to vector<8x128xf32>
    %610 = arith.negf %609 : vector<8x128xf32>
    %611 = math.exp %610 : vector<8x128xf32>
    %cst_270 = arith.constant 1.000000e+00 : f32
    %612 = vector.broadcast %cst_270 : f32 to vector<8x128xf32>
    %613 = arith.addf %612, %611 : vector<8x128xf32>
    %614 = arith.divf %612, %613 : vector<8x128xf32>
    %c0_271 = arith.constant 0 : index
    %c0_272 = arith.constant 0 : index
    %615 = vector.load %arg11[%c0_271, %c0_272] : memref<8x128xf32, #tpu.memory_space<vmem>>, vector<8x128xf32>
    %616 = arith.mulf %606, %615 : vector<8x128xf32>
    %617 = arith.mulf %600, %608 : vector<8x128xf32>
    %618 = arith.addf %616, %617 : vector<8x128xf32>
    %619 = math.tanh %618 : vector<8x128xf32>
    %620 = arith.mulf %614, %619 : vector<8x128xf32>
    %c0_273 = arith.constant 0 : index
    %c0_274 = arith.constant 0 : index
    %621 = vector.load %arg11[%c0_273, %c0_274] : memref<8x128xf32, #tpu.memory_space<vmem>>, vector<8x128xf32>
    tpu.vector_store %arg11[%c0_273, %c0_274], %618 {strides = array<i32>} : memref<8x128xf32, #tpu.memory_space<vmem>>, vector<8x128xf32>,
    %c0_275 = arith.constant 0 : index
    %c0_276 = arith.constant 0 : index
    %622 = vector.load %arg10[%c0_275, %c0_276] : memref<8x128xf32, #tpu.memory_space<vmem>>, vector<8x128xf32>
    tpu.vector_store %arg10[%c0_275, %c0_276], %620 {strides = array<i32>} : memref<8x128xf32, #tpu.memory_space<vmem>>, vector<8x128xf32>,
    %c8_i32_277 = arith.constant 8 : i32
    %c0_278 = arith.constant 0 : index
    %c0_279 = arith.constant 0 : index
    %623 = vector.load %arg10[%c0_278, %c0_279] : memref<8x128xf32, #tpu.memory_space<vmem>>, vector<8x128xf32>
    %c0_280 = arith.constant 0 : index
    %c0_281 = arith.constant 0 : index
    %624 = vector.load %arg5[%c0_280, %c0_281] : memref<128x128xf32, #tpu.memory_space<vmem>>, vector<128x128xf32>
    %cst_282 = arith.constant dense<0.000000e+00> : vector<8x128xf32>
    %625 = tpu.matmul %623, %624, %cst_282 {dimension_numbers = #tpu.dot_dimension_numbers<[1], [0], [0], [1], [0, 0, 1, 1], [], []>} : vector<8x128xf32>, vector<128x128xf32>, vector<8x128xf32> -> vector<8x128xf32>
    %c0_283 = arith.constant 0 : index
    %c0_284 = arith.constant 0 : index
    %626 = vector.load %arg6[%c0_283, %c0_284] : memref<1x128xf32, #tpu.memory_space<vmem>>, vector<1x128xf32>
    %627 = vector.broadcast %626 : vector<1x128xf32> to vector<8x128xf32>
    %628 = arith.addf %625, %627 : vector<8x128xf32>
    %c0_285 = arith.constant 0 : index
    %c0_286 = arith.constant 0 : index
    %629 = vector.load %arg7[%c0_285, %c0_286] : memref<8x128xf32, #tpu.memory_space<vmem>>, vector<8x128xf32>
    tpu.vector_store %arg7[%c0_285, %c0_286], %628 {strides = array<i32>} : memref<8x128xf32, #tpu.memory_space<vmem>>, vector<8x128xf32>,
    return
  }
  func.func @transform_0(%arg0: i32) -> (i32, i32) {
    %c0_i32 = arith.constant 0 : i32
    %c0_i32_0 = arith.constant 0 : i32
    %c0_i32_1 = arith.constant 0 : i32
    return %c0_i32, %c0_i32_0 : i32, i32
  }
  func.func @transform_1(%arg0: i32) -> (i32, i32, i32) {
    %c0_i32 = arith.constant 0 : i32
    %c0_i32_0 = arith.constant 0 : i32
    %c0_i32_1 = arith.constant 0 : i32
    %c0_i32_2 = arith.constant 0 : i32
    return %c0_i32, %c0_i32_0, %c0_i32_1 : i32, i32, i32
  }
  func.func @transform_2(%arg0: i32) -> (i32, i32, i32) {
    %c0_i32 = arith.constant 0 : i32
    %c0_i32_0 = arith.constant 0 : i32
    %c0_i32_1 = arith.constant 0 : i32
    %c0_i32_2 = arith.constant 0 : i32
    return %c0_i32, %c0_i32_0, %c0_i32_1 : i32, i32, i32
  }
  func.func @transform_3(%arg0: i32) -> (i32, i32, i32) {
    %c0_i32 = arith.constant 0 : i32
    %c0_i32_0 = arith.constant 0 : i32
    %c0_i32_1 = arith.constant 0 : i32
    %c0_i32_2 = arith.constant 0 : i32
    return %c0_i32, %c0_i32_0, %c0_i32_1 : i32, i32, i32
  }
  func.func @transform_4(%arg0: i32) -> (i32, i32) {
    %c0_i32 = arith.constant 0 : i32
    %c0_i32_0 = arith.constant 0 : i32
    %c0_i32_1 = arith.constant 0 : i32
    return %c0_i32, %c0_i32_0 : i32, i32
  }
  func.func @transform_5(%arg0: i32) -> (i32, i32) {
    %c0_i32 = arith.constant 0 : i32
    %c0_i32_0 = arith.constant 0 : i32
    %c0_i32_1 = arith.constant 0 : i32
    return %c0_i32, %c0_i32_0 : i32, i32
  }
  func.func @transform_6(%arg0: i32) -> (i32, i32) {
    %c0_i32 = arith.constant 0 : i32
    %c0_i32_0 = arith.constant 0 : i32
    %c0_i32_1 = arith.constant 0 : i32
    return %c0_i32, %c0_i32_0 : i32, i32
  }
}

</mosaic_0001>

<bundles_post_ra>
// kernel: lstm_regression_forward.1
= control target key start
LH: loop header
LB: loop body
LE: loop exit
PB: predicated region body
PF: predicated region fallthrough
CT: control target
= control target key end

     0   :  { %11 = vsyncpa [#allocation7], 0  ;;  %s5664_s0 = inlined_call_operand.hbm [shape: bf16[64,128], index: 0, kind: input, shape index: {}]   ;;  %s5665_s1 = inlined_call_operand.hbm [shape: bf16[2,128,512], index: 1, kind: input, shape index: {}]   ;;  %s5666_s2 = inlined_call_operand.hbm [shape: bf16[2,128,512], index: 2, kind: input, shape index: {}]   ;;  %s5667_s3 = inlined_call_operand.hbm [shape: f32[2,1,512], index: 3, kind: input, shape index: {}]   ;;  %s5668_s4 = inlined_call_operand.hbm [shape: f32[128,128], index: 4, kind: input, shape index: {}]   ;;  %s5669_s5 = inlined_call_operand.hbm [shape: f32[1,128], index: 5, kind: input, shape index: {}]   ;;  %s5670_s6 = inlined_call_operand.hbm [shape: f32[8,128], index: 6, kind: output, shape index: {}]  }
   0x1   :  { %12 = vsyncpa [#allocation10], 0 }
   0x2   :  { %13 = vsyncpa [#allocation13], 0 }
   0x3   :  { %14 = vsyncpa [#allocation16], 0 }
   0x4   :  { %15 = vsyncpa [#allocation8], 0  ;;  %s4341_s21 = smov [#allocation9]   ;;  %s4177_s25 = scalar_lea.hbm %s5665_s1, 8192 }
   0x5   :  { %s33_s22 = sshll.u32 %s4341_s21, 4  ;;  %p4178_p0 = scmp.ne.s32.totalorder %s5665_s1, %s4177_s25  ;;  %s34_s22 = int_to_ptr.vmem [resolvable:$true] %s33_s22 }
   0x6   :  { %p4181_p1 = scmp.lt.u32.totalorder %s4177_s25, %s5665_s1 }
   0x8   :  { %p4183_p2 = pnand %p4181_p1, %p4178_p0 }
   0xa   :  { %4186 = shalt.err (!%p4183_p2)
}
   0xb   :  { %s4187_s30 = scalar_lea.vmem %s34_s22, 8192  ;;  %p4192_p4 = scmp.lt.s32.totalorder %s34_s22, %s34_s22 }
   0xc   :  { %p4188_p3 = scmp.ne.s32.totalorder %s34_s22, %s4187_s30  ;;  %p4193_p5 = scmp.lt.s32.totalorder %s4187_s30, %s4187_s30 }
   0xe   :  { %p4194_p6 = por %p4193_p5, %p4192_p4 }
  0x10   :  { %p4195_p7 = pnand %p4194_p6, %p4188_p3 }
  0x12   :  { %4198 = shalt.err (!%p4195_p7)
}
  0x13   :  { %s4342_s7 = smov 256   ;;  %s4343_s8 = smov 16  }
  0x14   :  { %39 = dma.hbm_to_vmem [thread:$0]  %s5665_s1, 8192, %s34_s22, [#allocation10], %s4342_s7, %s4342_s7, %s4343_s8  }
  0x15   :  { %s4344_s11 = smov [#allocation12]   ;;  %s4345_s13 = smov [#allocation6]  }
  0x16   :  { %s57_s12 = sshll.u32 %s4344_s11, 4  ;;  %s21_s14 = sshll.u32 %s4345_s13, 4  ;;  %s58_s12 = int_to_ptr.vmem [resolvable:$true] %s57_s12  ;;  %s22_s14 = int_to_ptr.vmem [resolvable:$true] %s21_s14 }
  0x17   :  { %s4199_s17 = scalar_lea.hbm %s5667_s3, 128 }
  0x18   :  { %p4200_p8 = scmp.ne.s32.totalorder %s5667_s3, %s4199_s17  ;;  %p4203_p9 = scmp.lt.u32.totalorder %s4199_s17, %s5667_s3 }
  0x1a   :  { %p4205_p10 = pnand %p4203_p9, %p4200_p8 }
  0x1c   :  { %4208 = shalt.err (!%p4205_p10)
}
  0x1d   :  { %s4209_s1 = scalar_lea.vmem %s58_s12, 128  ;;  %p4214_p12 = scmp.lt.s32.totalorder %s58_s12, %s58_s12 }
  0x1e   :  { %p4210_p11 = scmp.ne.s32.totalorder %s58_s12, %s4209_s1  ;;  %p4215_p13 = scmp.lt.s32.totalorder %s4209_s1, %s4209_s1 }
  0x20   :  { %p4216_p0 = por %p4215_p13, %p4214_p12 }
  0x22   :  { %p4217_p1 = pnand %p4216_p0, %p4210_p11 }
  0x24   :  { %4220 = shalt.err (!%p4217_p1)
}
  0x25   :  { %s4346_s22 = smov 64   ;;  %s4347_s23 = smov 4  }
  0x26   :  { %63 = dma.hbm_to_vmem [thread:$0]  %s5667_s3, 128, %s58_s12, [#allocation13], %s4346_s22, %s4346_s22, %s4347_s23  }
  0x27   :  { %s4221_s28 = scalar_lea.hbm %s5664_s0, 512 }
  0x28   :  { %p4222_p2 = scmp.ne.s32.totalorder %s5664_s0, %s4221_s28  ;;  %p4225_p3 = scmp.lt.u32.totalorder %s4221_s28, %s5664_s0 }
  0x2a   :  { %p4227_p4 = pnand %p4225_p3, %p4222_p2 }
  0x2c   :  { %4230 = shalt.err (!%p4227_p4)
}
  0x2d   :  { %s4231_s11 = scalar_lea.vmem %s22_s14, 512  ;;  %p4236_p6 = scmp.lt.s32.totalorder %s22_s14, %s22_s14 }
  0x2e   :  { %p4232_p5 = scmp.ne.s32.totalorder %s22_s14, %s4231_s11  ;;  %p4237_p7 = scmp.lt.s32.totalorder %s4231_s11, %s4231_s11 }
  0x30   :  { %p4238_p8 = por %p4237_p7, %p4236_p6 }
  0x32   :  { %p4239_p9 = pnand %p4238_p8, %p4232_p5 }
  0x34   :  { %4242 = shalt.err (!%p4239_p9)
}
  0x35   :  { %27 = dma.hbm_to_vmem [thread:$0]  %s5664_s0, 512, %s22_s14, [#allocation7], %s4346_s22, %s4346_s22, %s4347_s23  }
  0x36   :  { %s4348_s13 = smov [#allocation11]   ;;  %s4349_s16 = smov [#allocation14]  }
  0x37   :  { %s45_s15 = sshll.u32 %s4348_s13, 4  ;;  %s69_s17 = sshll.u32 %s4349_s16, 4  ;;  %s46_s15 = int_to_ptr.vmem [resolvable:$true] %s45_s15  ;;  %s70_s17 = int_to_ptr.vmem [resolvable:$true] %s69_s17 }
  0x38   :  { %s4243_s20 = scalar_lea.hbm %s5666_s2, 8192 }
  0x39   :  { %p4244_p10 = scmp.ne.s32.totalorder %s5666_s2, %s4243_s20  ;;  %p4247_p11 = scmp.lt.u32.totalorder %s4243_s20, %s5666_s2 }
  0x3b   :  { %p4249_p12 = pnand %p4247_p11, %p4244_p10 }
  0x3d   :  { %4252 = shalt.err (!%p4249_p12)
}
  0x3e   :  { %s4253_s0 = scalar_lea.vmem %s46_s15, 8192  ;;  %p4258_p0 = scmp.lt.s32.totalorder %s46_s15, %s46_s15 }
  0x3f   :  { %p4254_p13 = scmp.ne.s32.totalorder %s46_s15, %s4253_s0  ;;  %p4259_p1 = scmp.lt.s32.totalorder %s4253_s0, %s4253_s0 }
  0x41   :  { %p4260_p2 = por %p4259_p1, %p4258_p0 }
  0x43   :  { %p4261_p3 = pnand %p4260_p2, %p4254_p13 }
  0x45   :  { %4264 = shalt.err (!%p4261_p3)
}
  0x46   :  { %51 = dma.hbm_to_vmem [thread:$0]  %s5666_s2, 8192, %s46_s15, [#allocation10], %s4342_s7, %s4342_s7, %s4343_s8  }
  0x47   :  { %s4265_s27 = scalar_lea.hbm %s5668_s4, 2048 }
  0x48   :  { %p4266_p4 = scmp.ne.s32.totalorder %s5668_s4, %s4265_s27  ;;  %p4269_p5 = scmp.lt.u32.totalorder %s4265_s27, %s5668_s4 }
  0x4a   :  { %p4271_p6 = pnand %p4269_p5, %p4266_p4 }
  0x4c   :  { %4274 = shalt.err (!%p4271_p6)
}
  0x4d   :  { %s4275_s10 = scalar_lea.vmem %s70_s17, 2048  ;;  %p4280_p8 = scmp.lt.s32.totalorder %s70_s17, %s70_s17 }
  0x4e   :  { %p4276_p7 = scmp.ne.s32.totalorder %s70_s17, %s4275_s10  ;;  %p4281_p9 = scmp.lt.s32.totalorder %s4275_s10, %s4275_s10 }
  0x50   :  { %p4282_p10 = por %p4281_p9, %p4280_p8 }
  0x52   :  { %p4283_p11 = pnand %p4282_p10, %p4276_p7 }
  0x54   :  { %4286 = shalt.err (!%p4283_p11)
}
  0x55   :  { %s4350_s2 = smov 128   ;;  %s4351_s7 = smov 8  }
  0x56   :  { %75 = dma.hbm_to_vmem [thread:$0]  %s5668_s4, 2048, %s70_s17, [#allocation13], %s4350_s2, %s4350_s2, %s4351_s7  }
  0x57   :  { %s4352_s3 = smov [#allocation15]   ;;  %s4287_s16 = scalar_lea.hbm %s5669_s5, 16 }
  0x58   :  { %s82_s12 = sshll.u32 %s4352_s3, 4  ;;  %p4288_p12 = scmp.ne.s32.totalorder %s5669_s5, %s4287_s16  ;;  %s83_s12 = int_to_ptr.vmem [resolvable:$true] %s82_s12 }
  0x59   :  { %p4291_p13 = scmp.lt.u32.totalorder %s4287_s16, %s5669_s5 }
  0x5b   :  { %p4293_p0 = pnand %p4291_p13, %p4288_p12 }
  0x5d   :  { %4296 = shalt.err (!%p4293_p0)
}
  0x5e   :  { %s4297_s1 = scalar_lea.vmem %s83_s12, 16  ;;  %s4301_s4 = scalar_lea.vmem %s83_s12, 32 }
  0x5f   :  { %p4298_p1 = scmp.ne.s32.totalorder %s83_s12, %s4297_s1  ;;  %p4302_p2 = scmp.lt.s32.totalorder %s83_s12, %s83_s12 }
  0x60   :  { %p4303_p3 = scmp.lt.s32.totalorder %s4301_s4, %s4297_s1 }
  0x62   :  { %p4304_p4 = por %p4303_p3, %p4302_p2 }
  0x64   :  { %p4305_p5 = pnand %p4304_p4, %p4298_p1 }
  0x66   :  { %4308 = shalt.err (!%p4305_p5)
}
  0x67   :  { %85 = dma.hbm_to_vmem [thread:$0]  %s5669_s5, 16, %s83_s12, [#allocation16]  }
  0x68   :  { %4331 = dma.done.wait [#allocation7], 512  }
  0x69   :  { %4332 = vsyncadd [#allocation7], 4294966784 }
  0x6a   :  { %4333 = dma.done.wait [#allocation10], 16384  }
  0x6b   :  { %4334 = vsyncadd [#allocation10], 4294950912 }
  0x6c   :  { %4335 = dma.done.wait [#allocation13], 2176  }
  0x6d   :  { %4336 = vsyncadd [#allocation13], 4294965120 }
  0x6e   :  { %4337 = dma.done.wait [#allocation16], 16  }
  0x6f   :  { %4338 = vsyncadd [#allocation16], 4294967280  ;;  %v5677_v0 = vmov 0   ;;  %v3661_v1 = vld [vmem:[#allocation9 + $0x4] ss:$16 sps:$4 sm:$0xff]   ;;  %v3722_v44 = vld [vmem:[#allocation6 + $0x8] sm:$0xff]  }
  0x70   :  { %383 = vmatprep.mubr.bf16.mxu0 %v5677_v0  ;;  %456 = vmatprep.mubr.bf16.mxu1 %v5677_v0  ;;  %v3663_v2 = vld [vmem:[#allocation9 + $0xc] ss:$16 sps:$4 sm:$0xff]   ;;  %v3665_v3 = vld [vmem:[#allocation9] ss:$16 sps:$4 sm:$0xff]   ;;  %v3666_v4 = vld [vmem:[#allocation9 + $0x8] ss:$16 sps:$4 sm:$0xff]  }
  0x71   :  { %351 = vmatprep.subr.bf16.mxu0 %v3661_v1  ;;  %424 = vmatprep.subr.bf16.mxu1 %v3663_v2  ;;  %v3667_v5 = vld [vmem:[#allocation9 + $0x24] ss:$16 sps:$4 sm:$0xff]   ;;  %v3669_v6 = vld [vmem:[#allocation9 + $0x2c] ss:$16 sps:$4 sm:$0xff]   ;;  %v3671_v7 = vld [vmem:[#allocation9 + $0x20] ss:$16 sps:$4 sm:$0xff]  }
  0x72   :  { %352 = vmatpush1.bf16.msra.mxu0 %v3665_v3  ;;  %425 = vmatpush1.bf16.msra.mxu1 %v3666_v4  ;;  %v3672_v8 = vld [vmem:[#allocation9 + $0x28] ss:$16 sps:$4 sm:$0xff]   ;;  %v3673_v9 = vld [vmem:[#allocation9 + $0x44] ss:$16 sps:$4 sm:$0xff]   ;;  %v3675_v10 = vld [vmem:[#allocation9 + $0x4c] ss:$16 sps:$4 sm:$0xff]  }
  0x73   :  { %353 = vmatprep.subr.bf16.mxu0 %v3667_v5  ;;  %426 = vmatprep.subr.bf16.mxu1 %v3669_v6  ;;  %v3677_v11 = vld [vmem:[#allocation9 + $0x40] ss:$16 sps:$4 sm:$0xff]   ;;  %v3678_v12 = vld [vmem:[#allocation9 + $0x48] ss:$16 sps:$4 sm:$0xff]   ;;  %v3679_v13 = vld [vmem:[#allocation9 + $0x64] ss:$16 sps:$4 sm:$0xff]  }
  0x74   :  { %v3681_v14 = vld [vmem:[#allocation9 + $0x6c] ss:$16 sps:$4 sm:$0xff]   ;;  %v3683_v15 = vld [vmem:[#allocation9 + $0x60] ss:$16 sps:$4 sm:$0xff]   ;;  %v3684_v16 = vld [vmem:[#allocation9 + $0x68] ss:$16 sps:$4 sm:$0xff]  }
  0x75   :  { %v3685_v17 = vld [vmem:[#allocation9 + $0x84] ss:$16 sps:$4 sm:$0xff]   ;;  %v3687_v18 = vld [vmem:[#allocation9 + $0x8c] ss:$16 sps:$4 sm:$0xff]   ;;  %v3689_v19 = vld [vmem:[#allocation9 + $0x80] ss:$16 sps:$4 sm:$0xff]  }
  0x76   :  { %354 = vmatpush1.bf16.msra.mxu0 %v3671_v7  ;;  %427 = vmatpush1.bf16.msra.mxu1 %v3672_v8  ;;  %v3690_v20 = vld [vmem:[#allocation9 + $0x88] ss:$16 sps:$4 sm:$0xff]   ;;  %v3691_v21 = vld [vmem:[#allocation9 + $0xa4] ss:$16 sps:$4 sm:$0xff]   ;;  %v3693_v22 = vld [vmem:[#allocation9 + $0xac] ss:$16 sps:$4 sm:$0xff]   ;;  %v147_v7 = vlaneseq }
  0x77   :  { %355 = vmatprep.subr.bf16.mxu0 %v3673_v9  ;;  %428 = vmatprep.subr.bf16.mxu1 %v3675_v10  ;;  %v3695_v23 = vld [vmem:[#allocation9 + $0xa0] ss:$16 sps:$4 sm:$0xff]   ;;  %v3696_v24 = vld [vmem:[#allocation9 + $0xa8] ss:$16 sps:$4 sm:$0xff]   ;;  %v3697_v25 = vld [vmem:[#allocation9 + $0xc4] ss:$16 sps:$4 sm:$0xff]  }
  0x78   :  { %v3699_v26 = vld [vmem:[#allocation9 + $0xcc] ss:$16 sps:$4 sm:$0xff]   ;;  %v3701_v27 = vld [vmem:[#allocation9 + $0xc0] ss:$16 sps:$4 sm:$0xff]   ;;  %v3702_v28 = vld [vmem:[#allocation9 + $0xc8] ss:$16 sps:$4 sm:$0xff]  }
  0x79   :  { %v3703_v29 = vld [vmem:[#allocation9 + $0xe4] ss:$16 sps:$4 sm:$0xff]   ;;  %v3705_v30 = vld [vmem:[#allocation9 + $0xec] ss:$16 sps:$4 sm:$0xff]   ;;  %v3707_v31 = vld [vmem:[#allocation9 + $0xe0] ss:$16 sps:$4 sm:$0xff]  }
  0x7a   :  { %356 = vmatpush1.bf16.msra.mxu0 %v3677_v11  ;;  %429 = vmatpush1.bf16.msra.mxu1 %v3678_v12  ;;  %v3708_v32 = vld [vmem:[#allocation9 + $0xe8] ss:$16 sps:$4 sm:$0xff]   ;;  %v4473_v33 = vld [vmem:[#allocation11 + $0x4] ss:$16 sps:$4 sm:$0xff]   ;;  %v4475_v34 = vld [vmem:[#allocation11 + $0xc] ss:$16 sps:$4 sm:$0xff]  }
  0x7b   :  { %357 = vmatprep.subr.bf16.mxu0 %v3679_v13  ;;  %430 = vmatprep.subr.bf16.mxu1 %v3681_v14  ;;  %v3709_v35 = vld [vmem:[#allocation6] sm:$0xff]   ;;  %v4479_v37 = vld [vmem:[#allocation11 + $0x8] ss:$16 sps:$4 sm:$0xff]   ;;  %v4485_v39 = vld [vmem:[#allocation11 + $0x2c] ss:$16 sps:$4 sm:$0xff]   ;;  %v5675_v6 = vmov 0.0|0.0  }
  0x7c   :  { %v4477_v36 = vld [vmem:[#allocation11] ss:$16 sps:$4 sm:$0xff]   ;;  %v4483_v38 = vld [vmem:[#allocation11 + $0x24] ss:$16 sps:$4 sm:$0xff]   ;;  %v4491_v41 = vld [vmem:[#allocation11 + $0x28] ss:$16 sps:$4 sm:$0xff]  }
  0x7d   :  { %v4487_v40 = vld [vmem:[#allocation11 + $0x20] ss:$16 sps:$4 sm:$0xff]   ;;  %v4495_v42 = vld [vmem:[#allocation11 + $0x44] ss:$16 sps:$4 sm:$0xff]   ;;  %v4497_v43 = vld [vmem:[#allocation11 + $0x4c] ss:$16 sps:$4 sm:$0xff]  }
  0x7e   :  { %358 = vmatpush1.bf16.msra.mxu0 %v3683_v15  ;;  %431 = vmatpush1.bf16.msra.mxu1 %v3684_v16  ;;  %v4501_v45 = vld [vmem:[#allocation11 + $0x40] ss:$16 sps:$4 sm:$0xff]   ;;  %v4503_v46 = vld [vmem:[#allocation11 + $0x48] ss:$16 sps:$4 sm:$0xff]   ;;  %v4507_v47 = vld [vmem:[#allocation11 + $0x64] ss:$16 sps:$4 sm:$0xff]  }
  0x7f   :  { %359 = vmatprep.subr.bf16.mxu0 %v3685_v17  ;;  %432 = vmatprep.subr.bf16.mxu1 %v3687_v18  ;;  %v4511_v48 = vld [vmem:[#allocation11 + $0x6c] ss:$16 sps:$4 sm:$0xff]   ;;  %v4513_v49 = vld [vmem:[#allocation11 + $0x60] ss:$16 sps:$4 sm:$0xff]   ;;  %v4515_v50 = vld [vmem:[#allocation11 + $0x68] ss:$16 sps:$4 sm:$0xff]  }
  0x80   :  { %v4519_v51 = vld [vmem:[#allocation11 + $0x84] ss:$16 sps:$4 sm:$0xff]   ;;  %v4523_v52 = vld [vmem:[#allocation11 + $0x8c] ss:$16 sps:$4 sm:$0xff]   ;;  %v4527_v54 = vld [vmem:[#allocation11 + $0x80] ss:$16 sps:$4 sm:$0xff]  }
  0x81   :  { %v3735_v53 = vld [vmem:[#allocation6 + $0x10] sm:$0xff]   ;;  %v4529_v55 = vld [vmem:[#allocation11 + $0x88] ss:$16 sps:$4 sm:$0xff]   ;;  %v4533_v57 = vld [vmem:[#allocation11 + $0xac] ss:$16 sps:$4 sm:$0xff]   ;;  %v4615_v8 = vshrl.u32 %v147_v7, 7 }
  0x82   :  { %360 = vmatpush1.bf16.msra.mxu0 %v3689_v19  ;;  %433 = vmatpush1.bf16.msra.mxu1 %v3690_v20  ;;  %v4531_v56 = vld [vmem:[#allocation11 + $0xa4] ss:$16 sps:$4 sm:$0xff]   ;;  %v4539_v58 = vld [vmem:[#allocation11 + $0xa0] ss:$16 sps:$4 sm:$0xff]   ;;  %v4541_v59 = vld [vmem:[#allocation11 + $0xa8] ss:$16 sps:$4 sm:$0xff]  }
  0x83   :  { %361 = vmatprep.subr.bf16.mxu0 %v3691_v21  ;;  %434 = vmatprep.subr.bf16.mxu1 %v3693_v22  ;;  %v4543_v60 = vld [vmem:[#allocation11 + $0xc4] ss:$16 sps:$4 sm:$0xff]   ;;  %v4545_v61 = vld [vmem:[#allocation11 + $0xcc] ss:$16 sps:$4 sm:$0xff]   ;;  %v4553_v63 = vld [vmem:[#allocation11 + $0xc0] ss:$16 sps:$4 sm:$0xff]  }
  0x84   :  { %v3748_v62 = vld [vmem:[#allocation6 + $0x18] sm:$0xff]   ;;  %v4557_v2 = vld [vmem:[#allocation11 + $0xe4] ss:$16 sps:$4 sm:$0xff]   ;;  %v4565_v4 = vld [vmem:[#allocation11 + $0xe0] ss:$16 sps:$4 sm:$0xff]   ;;  %5682 = vst [vmem:[#allocation23_spill] sm:$0xff] %v4615_v8 }
  0x85   :  { %v4555_v1 = vld [vmem:[#allocation11 + $0xc8] ss:$16 sps:$4 sm:$0xff]   ;;  %v4559_v3 = vld [vmem:[#allocation11 + $0xec] ss:$16 sps:$4 sm:$0xff]   ;;  %v5673_v9 = vsub.s32 2, %v4615_v8  ;;  %v5671_v10 = vsub.s32 3, %v4615_v8 }
  0x86   :  { %362 = vmatpush1.bf16.msra.mxu0 %v3695_v23  ;;  %435 = vmatpush1.bf16.msra.mxu1 %v3696_v24  ;;  %v4567_v5 = vld [vmem:[#allocation11 + $0xe8] ss:$16 sps:$4 sm:$0xff]   ;;  %v5674_v11 = vsub.s32 0, %v4615_v8  ;;  %v145_v12 = vld [vmem:[#allocation12] sm:$0xf]  ;;  %v5672_v13 = vsub.s32 1, %v4615_v8 }
  0x87   :  { %363 = vmatprep.subr.bf16.mxu0 %v3697_v25  ;;  %436 = vmatprep.subr.bf16.mxu1 %v3699_v26  ;;  %v4623_v14 = vrot.slane %v145_v12, %v5673_v9  ;;  %v4631_v17 = vrot.slane %v145_v12, %v5671_v10  ;;  %vm4355_vm0 = vmmov 0   ;;  %s4357_s5 = smov [#allocation17]  }
  0x88   :  { %v150_v18 = vrot.slane %v145_v12, %v5674_v11  ;;  %v154_v21 = vrot.slane %v145_v12, %v5672_v13  ;;  %s3368_s25 = sshll.u32 %s4357_s5, 4  ;;  %s3369_s25 = int_to_ptr.vmem [resolvable:$true] %s3368_s25 }
  0x89   :  { %s4309_s0 = scalar_lea.vmem %s3369_s25, 128  ;;  %p4314_p7 = scmp.lt.s32.totalorder %s3369_s25, %s3369_s25 }
  0x8a   :  { %364 = vmatpush1.bf16.msra.mxu0 %v3701_v27  ;;  %437 = vmatpush1.bf16.msra.mxu1 %v3702_v28  ;;  %p4310_p6 = scmp.ne.s32.totalorder %s3369_s25, %s4309_s0  ;;  %p4315_p8 = scmp.lt.s32.totalorder %s4309_s0, %s4309_s0 }
  0x8b   :  { %365 = vmatprep.subr.bf16.mxu0 %v3703_v29  ;;  %438 = vmatprep.subr.bf16.mxu1 %v3705_v30 }
  0x8c   :  { %p4316_p9 = por %p4315_p8, %p4314_p7 }
  0x8e   :  { %366 = vmatpush1.bf16.msra.mxu0 %v3707_v31  ;;  %439 = vmatpush1.bf16.msra.mxu1 %v3708_v32  ;;  %p4317_p10 = pnand %p4316_p9, %p4310_p6 }
  0x8f   :  { %732 = vmatprep.subr.bf16.mxu0 %v4473_v33  ;;  %773 = vmatprep.subr.bf16.mxu1 %v4475_v34 }
  0x91   :  { %384 = vmatmul.mubr.bf16.vlgmr.msra.gmra.mrb[0].mxu0 %v3709_v35  ;;  %457 = vmatmul.mubr.bf16.vlgmr.msra.gmra.mrb[0].mxu1 %v3709_v35 }
  0x92   :  { %733 = vmatpush1.bf16.msra.mxu0 %v4477_v36  ;;  %774 = vmatpush1.bf16.msra.mxu1 %v4479_v37 }
  0x93   :  { %734 = vmatprep.subr.bf16.mxu0 %v4483_v38  ;;  %775 = vmatprep.subr.bf16.mxu1 %v4485_v39 }
  0x94   :  { %393 = vmatprep.mubr.bf16.mxu0 %v5677_v0  ;;  %466 = vmatprep.mubr.bf16.mxu1 %v5677_v0 }
  0x96   :  { %735 = vmatpush1.bf16.msra.mxu0 %v4487_v40  ;;  %776 = vmatpush1.bf16.msra.mxu1 %v4491_v41 }
  0x97   :  { %736 = vmatprep.subr.bf16.mxu0 %v4495_v42  ;;  %777 = vmatprep.subr.bf16.mxu1 %v4497_v43 }
  0x99   :  { %394 = vmatmul.mubr.bf16.gmra.mrb[4].mxu0 %v3722_v44  ;;  %467 = vmatmul.mubr.bf16.gmra.mrb[4].mxu1 %v3722_v44 }
  0x9a   :  { %737 = vmatpush1.bf16.msra.mxu0 %v4501_v45  ;;  %778 = vmatpush1.bf16.msra.mxu1 %v4503_v46 }
  0x9b   :  { %738 = vmatprep.subr.bf16.mxu0 %v4507_v47  ;;  %779 = vmatprep.subr.bf16.mxu1 %v4511_v48 }
  0x9c   :  { %403 = vmatprep.mubr.bf16.mxu0 %v5677_v0  ;;  %476 = vmatprep.mubr.bf16.mxu1 %v5677_v0 }
  0x9e   :  { %739 = vmatpush1.bf16.msra.mxu0 %v4513_v49  ;;  %780 = vmatpush1.bf16.msra.mxu1 %v4515_v50 }
  0x9f   :  { %740 = vmatprep.subr.bf16.mxu0 %v4519_v51  ;;  %781 = vmatprep.subr.bf16.mxu1 %v4523_v52 }
  0xa1   :  { %404 = vmatmul.mubr.bf16.gmra.mrb[8].mxu0 %v3735_v53  ;;  %477 = vmatmul.mubr.bf16.gmra.mrb[8].mxu1 %v3735_v53 }
  0xa2   :  { %741 = vmatpush1.bf16.msra.mxu0 %v4527_v54  ;;  %782 = vmatpush1.bf16.msra.mxu1 %v4529_v55 }
  0xa3   :  { %742 = vmatprep.subr.bf16.mxu0 %v4531_v56  ;;  %783 = vmatprep.subr.bf16.mxu1 %v4533_v57 }
  0xa4   :  { %413 = vmatprep.mubr.bf16.mxu0 %v5677_v0  ;;  %486 = vmatprep.mubr.bf16.mxu1 %v5677_v0 }
  0xa6   :  { %743 = vmatpush1.bf16.msra.mxu0 %v4539_v58  ;;  %784 = vmatpush1.bf16.msra.mxu1 %v4541_v59 }
  0xa7   :  { %744 = vmatprep.subr.bf16.mxu0 %v4543_v60  ;;  %785 = vmatprep.subr.bf16.mxu1 %v4545_v61 }
  0xa9   :  { %414 = vmatmul.mubr.bf16.gmra.mrb[12].mxu0 %v3748_v62  ;;  %487 = vmatmul.mubr.bf16.gmra.mrb[12].mxu1 %v3748_v62 }
  0xaa   :  { %745 = vmatpush1.bf16.msra.mxu0 %v4553_v63  ;;  %786 = vmatpush1.bf16.msra.mxu1 %v4555_v1 }
  0xab   :  { %746 = vmatprep.subr.bf16.mxu0 %v4557_v2  ;;  %787 = vmatprep.subr.bf16.mxu1 %v4559_v3 }
  0xac   :  { %764 = vmatprep.mubr.bf16.mxu0 %v5677_v0  ;;  %805 = vmatprep.mubr.bf16.mxu1 %v5677_v0 }
  0xae   :  { %747 = vmatpush1.bf16.msra.mxu0 %v4565_v4  ;;  %788 = vmatpush1.bf16.msra.mxu1 %v4567_v5 }
  0xaf   :  { %855 = vmatprep.subr.bf16.mxu0 %v4473_v33  ;;  %896 = vmatprep.subr.bf16.mxu1 %v4475_v34 }
  0xb1   :  { %765 = vmatmul.mubr.bf16.vlgmr.msra.gmra.mrb[16].mxu0 %v5675_v6  ;;  %806 = vmatmul.mubr.bf16.vlgmr.msra.gmra.mrb[16].mxu1 %v5675_v6 }
  0xb2   :  { %856 = vmatpush1.bf16.msra.mxu0 %v4477_v36  ;;  %897 = vmatpush1.bf16.msra.mxu1 %v4479_v37 }
  0xb3   :  { %857 = vmatprep.subr.bf16.mxu0 %v4483_v38  ;;  %898 = vmatprep.subr.bf16.mxu1 %v4485_v39 }
  0xb4   :  { %887 = vmatprep.mubr.bf16.mxu0 %v5677_v0  ;;  %928 = vmatprep.mubr.bf16.mxu1 %v5677_v0 }
  0xb6   :  { %858 = vmatpush1.bf16.msra.mxu0 %v4487_v40  ;;  %899 = vmatpush1.bf16.msra.mxu1 %v4491_v41 }
  0xb7   :  { %859 = vmatprep.subr.bf16.mxu0 %v4495_v42  ;;  %900 = vmatprep.subr.bf16.mxu1 %v4497_v43 }
  0xba   :  { %860 = vmatpush1.bf16.msra.mxu0 %v4501_v45  ;;  %901 = vmatpush1.bf16.msra.mxu1 %v4503_v46 }
  0xbb   :  { %861 = vmatprep.subr.bf16.mxu0 %v4507_v47  ;;  %902 = vmatprep.subr.bf16.mxu1 %v4511_v48 }
  0xbe   :  { %862 = vmatpush1.bf16.msra.mxu0 %v4513_v49  ;;  %903 = vmatpush1.bf16.msra.mxu1 %v4515_v50 }
  0xbf   :  { %863 = vmatprep.subr.bf16.mxu0 %v4519_v51  ;;  %904 = vmatprep.subr.bf16.mxu1 %v4523_v52 }
  0xc2   :  { %864 = vmatpush1.bf16.msra.mxu0 %v4527_v54  ;;  %905 = vmatpush1.bf16.msra.mxu1 %v4529_v55 }
  0xc3   :  { %865 = vmatprep.subr.bf16.mxu0 %v4531_v56  ;;  %906 = vmatprep.subr.bf16.mxu1 %v4533_v57 }
  0xc6   :  { %866 = vmatpush1.bf16.msra.mxu0 %v4539_v58  ;;  %907 = vmatpush1.bf16.msra.mxu1 %v4541_v59 }
  0xc7   :  { %867 = vmatprep.subr.bf16.mxu0 %v4543_v60  ;;  %908 = vmatprep.subr.bf16.mxu1 %v4545_v61 }
  0xca   :  { %868 = vmatpush1.bf16.msra.mxu0 %v4553_v63  ;;  %909 = vmatpush1.bf16.msra.mxu1 %v4555_v1 }
  0xcb   :  { %869 = vmatprep.subr.bf16.mxu0 %v4557_v2  ;;  %910 = vmatprep.subr.bf16.mxu1 %v4559_v3 }
  0xce   :  { %870 = vmatpush1.bf16.msra.mxu0 %v4565_v4  ;;  %911 = vmatpush1.bf16.msra.mxu1 %v4567_v5 }
  0xcf   :  { %979 = vmatprep.subr.bf16.mxu0 %v4473_v33  ;;  %1020 = vmatprep.subr.bf16.mxu1 %v4475_v34 }
 0x164   :  { %v4625_v15 = vpop.f32.mrb[0].mxu0  ;;  %v4627_v16 = vpop.f32.mrb[0].mxu1 }
 0x165   :  { %v387_v19 = vpop.f32.mrb[1].mxu0  ;;  %v460_v20 = vpop.f32.mrb[1].mxu1 }
 0x166   :  { %v389_v22 = vpop.f32.mrb[2].mxu0  ;;  %v462_v23 = vpop.f32.mrb[2].mxu1 }
 0x167   :  { %v4637_v24 = vadd.f32 %v389_v22, %v150_v18  ;;  %v391_v25 = vpop.f32.mrb[3].mxu0  ;;  %v4640_v26 = vadd.f32 %v462_v23, %v4623_v14  ;;  %v464_v27 = vpop.f32.mrb[3].mxu1 }
 0x168   :  { %v4642_v28 = vadd.f32 %v391_v25, %v154_v21  ;;  %v4645_v29 = vadd.f32 %v464_v27, %v4631_v17 }
 0x16c   :  { %v395_v30 = vpop.f32.mrb[4].mxu0  ;;  %v468_v31 = vpop.f32.mrb[4].mxu1 }
 0x16d   :  { %v4647_v32 = vadd.f32 %v395_v30, %v150_v18  ;;  %v397_v35 = vpop.f32.mrb[5].mxu0  ;;  %v4650_v44 = vadd.f32 %v468_v31, %v4623_v14  ;;  %v470_v53 = vpop.f32.mrb[5].mxu1 }
 0x16e   :  { %v4652_v62 = vadd.f32 %v397_v35, %v154_v21  ;;  %v399_v7 = vpop.f32.mrb[6].mxu0  ;;  %v4655_v12 = vadd.f32 %v470_v53, %v4631_v17  ;;  %v472_v22 = vpop.f32.mrb[6].mxu1 }
 0x16f   :  { %v4657_v23 = vadd.f32 %v399_v7, %v150_v18  ;;  %v401_v25 = vpop.f32.mrb[7].mxu0  ;;  %v4660_v27 = vadd.f32 %v472_v22, %v4623_v14  ;;  %v474_v30 = vpop.f32.mrb[7].mxu1 }
 0x170   :  { %5683 = vst [vmem:[#allocation24_spill] sm:$0xff] %v4655_v12  ;;  %v4662_v10 = vadd.f32 %v401_v25, %v154_v21  ;;  %v4665_v31 = vadd.f32 %v474_v30, %v4631_v17 }
 0x171   :  { %5684 = vst [vmem:[#allocation25_spill] sm:$0xff] %v4657_v23  ;;  %5685 = vst [vmem:[#allocation26_spill] sm:$0xff] %v4660_v27 }
 0x172   :  { %5686 = vst [vmem:[#allocation27_spill] sm:$0xff] %v4662_v10  ;;  %5687 = vst [vmem:[#allocation28_spill] sm:$0xff] %v4665_v31 }
 0x174   :  { %v405_v13 = vpop.f32.mrb[8].mxu0  ;;  %v478_v35 = vpop.f32.mrb[8].mxu1 }
 0x175   :  { %v4667_v9 = vadd.f32 %v405_v13, %v150_v18  ;;  %v407_v11 = vpop.f32.mrb[9].mxu0  ;;  %v4670_v53 = vadd.f32 %v478_v35, %v4623_v14  ;;  %v480_v7 = vpop.f32.mrb[9].mxu1 }
 0x176   :  { %v4672_v6 = vadd.f32 %v407_v11, %v154_v21  ;;  %v409_v0 = vpop.f32.mrb[10].mxu0  ;;  %v4675_v22 = vadd.f32 %v480_v7, %v4631_v17  ;;  %v482_v25 = vpop.f32.mrb[10].mxu1 }
 0x177   :  { %5688 = vst [vmem:[#allocation29_spill] sm:$0xff] %v4667_v9  ;;  %5689 = vst [vmem:[#allocation30_spill] sm:$0xff] %v4670_v53  ;;  %v4677_v8 = vadd.f32 %v409_v0, %v150_v18  ;;  %v411_v30 = vpop.f32.mrb[11].mxu0  ;;  %v4680_v31 = vadd.f32 %v482_v25, %v4623_v14  ;;  %v484_v13 = vpop.f32.mrb[11].mxu1 }
 0x178   :  { %5690 = vst [vmem:[#allocation31_spill] sm:$0xff] %v4672_v6  ;;  %5691 = vst [vmem:[#allocation32_spill] sm:$0xff] %v4675_v22  ;;  %v4682_v9 = vadd.f32 %v411_v30, %v154_v21  ;;  %v4685_v35 = vadd.f32 %v484_v13, %v4631_v17 }
 0x179   :  { %5692 = vst [vmem:[#allocation33_spill] sm:$0xff] %v4677_v8  ;;  %5693 = vst [vmem:[#allocation34_spill] sm:$0xff] %v4680_v31 }
 0x17a   :  { %5694 = vst [vmem:[#allocation35_spill] sm:$0xff] %v4682_v9  ;;  %5695 = vst [vmem:[#allocation36_spill] sm:$0xff] %v4685_v35 }
 0x17c   :  { %v415_v53 = vpop.f32.mrb[12].mxu0  ;;  %v488_v11 = vpop.f32.mrb[12].mxu1 }
 0x17d   :  { %v4687_v6 = vadd.f32 %v415_v53, %v150_v18  ;;  %v417_v10 = vpop.f32.mrb[13].mxu0  ;;  %v4690_v7 = vadd.f32 %v488_v11, %v4623_v14  ;;  %v490_v0 = vpop.f32.mrb[13].mxu1 }
 0x17e   :  { %v4692_v8 = vadd.f32 %v417_v10, %v154_v21  ;;  %v419_v22 = vpop.f32.mrb[14].mxu0  ;;  %v4695_v25 = vadd.f32 %v490_v0, %v4631_v17  ;;  %v492_v30 = vpop.f32.mrb[14].mxu1  ;;  %v386_v10 = vadd.f32 %v4625_v15, %v150_v18  ;;  %v388_v0 = vadd.f32 %v387_v19, %v154_v21 }
 0x17f   :  { %5696 = vst [vmem:[#allocation37_spill] sm:$0xff] %v4687_v6  ;;  %5697 = vst [vmem:[#allocation38_spill] sm:$0xff] %v4690_v7  ;;  %v4697_v9 = vadd.f32 %v419_v22, %v150_v18  ;;  %v421_v13 = vpop.f32.mrb[15].mxu0  ;;  %v4700_v35 = vadd.f32 %v492_v30, %v4623_v14  ;;  %v494_v53 = vpop.f32.mrb[15].mxu1 }
 0x180   :  { %5698 = vst [vmem:[#allocation39_spill] sm:$0xff] %v4692_v8  ;;  %5699 = vst [vmem:[#allocation40_spill] sm:$0xff] %v4695_v25  ;;  %v4702_v6 = vadd.f32 %v421_v13, %v154_v21  ;;  %v4705_v11 = vadd.f32 %v494_v53, %v4631_v17  ;;  %v459_v8 = vadd.f32 %v4627_v16, %v4623_v14 }
 0x181   :  { %5700 = vst [vmem:[#allocation41_spill] sm:$0xff] %v4697_v9  ;;  %5701 = vst [vmem:[#allocation42_spill] sm:$0xff] %v4700_v35  ;;  %v461_v25 = vadd.f32 %v460_v20, %v4631_v17 }
 0x182   :  { %5702 = vst [vmem:[#allocation43_spill] sm:$0xff] %v4702_v6  ;;  %5703 = vst [vmem:[#allocation44_spill] sm:$0xff] %v4705_v11 }
 0x184   :  { %v766_v22 = vpop.f32.mrb[16].mxu0  ;;  %v807_v9 = vpop.f32.mrb[16].mxu1 }
 0x185   :  { %v814_v7 = vadd.f32 %v766_v22, %v386_v10  ;;  %v816_v31 = vadd.f32 %v807_v9, %v459_v8  ;;  %v768_v30 = vpop.f32.mrb[17].mxu0  ;;  %v809_v35 = vpop.f32.mrb[17].mxu1 }
 0x186   :  { %v815_v27 = vadd.f32 %v768_v30, %v388_v0  ;;  %v817_v13 = vadd.f32 %v809_v35, %v461_v25  ;;  %v770_v6 = vpop.f32.mrb[18].mxu0  ;;  %v811_v23 = vpop.f32.mrb[18].mxu1 }
 0x187   :  { %v3455_v53 = vmul.f32 -1.442695, %v814_v7  ;;  %v771_v11 = vpop.f32.mrb[19].mxu0  ;;  %v812_v12 = vpop.f32.mrb[19].mxu1 }
 0x188   :  { %v3456_v15 = vmul.f32 -1.442695, %v815_v27  ;;  %v3457_v14 = vmul.f32 -1.442695, %v817_v13  ;;  %v5704_v11 = vmov 0  }
 0x189   :  { %3857 = vpow2.f32 %v3455_v53 }
 0x18a   :  { %3859 = vpow2.f32 %v3456_v15 }
 0x18b   :  { %3861 = vpow2.f32 %v3457_v14 }
 0x18c   :  { %3863 = vtanh.f32 %v816_v31 }
 0x193   :  { %v3858_v16 = vpop.eup %3857 }
 0x194   :  { %v3860_v18 = vpop.eup %3859  ;;  %v821_v17 = vadd.f32 1.0, %v3858_v16 }
 0x195   :  { %v827_v19 = vadd.f32 1.0, %v3860_v18  ;;  %v3862_v8 = vpop.eup %3861 }
 0x196   :  { %3865 = vrcp.f32 %v821_v17  ;;  %v3864_v9 = vpop.eup %3863  ;;  %v834_v23 = vadd.f32 1.0, %v3862_v8 }
 0x197   :  { %3867 = vrcp.f32 %v827_v19 }
 0x198   :  { %3869 = vrcp.f32 %v834_v23 }
 0x1a0   :  { %v3866_v20 = vpop.eup %3865 }
 0x1a1   :  { %v3868_v6 = vpop.eup %3867  ;;  %v839_v21 = vmul.f32 %v3866_v20, %v3864_v9 }
 0x1a2   :  { %v838_v35 = vmul.f32 0.0, %v3868_v6  ;;  %v3870_v27 = vpop.eup %3869 }
 0x1a4   :  { %v4711_v12 = vadd.f32 %v839_v21, %v838_v35 }
 0x1a6   :  { %3871 = vtanh.f32 %v4711_v12 }
 0x1b0   :  { %v3872_v7 = vpop.eup %3871 }
 0x1b1   :  { %v4714_v25 = vmul.f32 %v3872_v7, %v3870_v27 }
 0x1b3   :  { %v854_v31 = vpack.c.bf16 %v4714_v25, %v4714_v25 }
 0x1b5   :  { %888 = vmatmul.mubr.bf16.vlgmr.msra.gmra.mrb[20].mxu0 %v854_v31  ;;  %929 = vmatmul.mubr.bf16.vlgmr.msra.gmra.mrb[20].mxu1 %v854_v31 }
 0x1b6   :  { %980 = vmatpush1.bf16.msra.mxu0 %v4477_v36  ;;  %1021 = vmatpush1.bf16.msra.mxu1 %v4479_v37 }
 0x1b7   :  { %981 = vmatprep.subr.bf16.mxu0 %v4483_v38  ;;  %1022 = vmatprep.subr.bf16.mxu1 %v4485_v39 }
 0x1b8   :  { %1011 = vmatprep.mubr.bf16.mxu0 %v5704_v11  ;;  %1052 = vmatprep.mubr.bf16.mxu1 %v5704_v11 }
 0x1ba   :  { %982 = vmatpush1.bf16.msra.mxu0 %v4487_v40  ;;  %1023 = vmatpush1.bf16.msra.mxu1 %v4491_v41 }
 0x1bb   :  { %983 = vmatprep.subr.bf16.mxu0 %v4495_v42  ;;  %1024 = vmatprep.subr.bf16.mxu1 %v4497_v43 }
 0x1be   :  { %984 = vmatpush1.bf16.msra.mxu0 %v4501_v45  ;;  %1025 = vmatpush1.bf16.msra.mxu1 %v4503_v46 }
 0x1bf   :  { %985 = vmatprep.subr.bf16.mxu0 %v4507_v47  ;;  %1026 = vmatprep.subr.bf16.mxu1 %v4511_v48 }
 0x1c2   :  { %986 = vmatpush1.bf16.msra.mxu0 %v4513_v49  ;;  %1027 = vmatpush1.bf16.msra.mxu1 %v4515_v50 }
 0x1c3   :  { %987 = vmatprep.subr.bf16.mxu0 %v4519_v51  ;;  %1028 = vmatprep.subr.bf16.mxu1 %v4523_v52 }
 0x1c6   :  { %988 = vmatpush1.bf16.msra.mxu0 %v4527_v54  ;;  %1029 = vmatpush1.bf16.msra.mxu1 %v4529_v55 }
 0x1c7   :  { %989 = vmatprep.subr.bf16.mxu0 %v4531_v56  ;;  %1030 = vmatprep.subr.bf16.mxu1 %v4533_v57 }
 0x1ca   :  { %990 = vmatpush1.bf16.msra.mxu0 %v4539_v58  ;;  %1031 = vmatpush1.bf16.msra.mxu1 %v4541_v59 }
 0x1cb   :  { %991 = vmatprep.subr.bf16.mxu0 %v4543_v60  ;;  %1032 = vmatprep.subr.bf16.mxu1 %v4545_v61 }
 0x1ce   :  { %992 = vmatpush1.bf16.msra.mxu0 %v4553_v63  ;;  %1033 = vmatpush1.bf16.msra.mxu1 %v4555_v1 }
 0x1cf   :  { %993 = vmatprep.subr.bf16.mxu0 %v4557_v2  ;;  %1034 = vmatprep.subr.bf16.mxu1 %v4559_v3 }
 0x1d2   :  { %994 = vmatpush1.bf16.msra.mxu0 %v4565_v4  ;;  %1035 = vmatpush1.bf16.msra.mxu1 %v4567_v5 }
 0x1d3   :  { %1103 = vmatprep.subr.bf16.mxu0 %v4473_v33  ;;  %1144 = vmatprep.subr.bf16.mxu1 %v4475_v34 }
 0x288   :  { %v889_v10 = vpop.f32.mrb[20].mxu0  ;;  %v930_v0 = vpop.f32.mrb[20].mxu1 }
 0x289   :  { %v937_v22 = vadd.f32 %v889_v10, %v4637_v24  ;;  %v939_v30 = vadd.f32 %v930_v0, %v4640_v26  ;;  %v891_v13 = vpop.f32.mrb[21].mxu0  ;;  %v932_v53 = vpop.f32.mrb[21].mxu1 }
 0x28a   :  { %v938_v15 = vadd.f32 %v891_v13, %v4642_v28  ;;  %v940_v14 = vadd.f32 %v932_v53, %v4645_v29  ;;  %v893_v16 = vpop.f32.mrb[22].mxu0  ;;  %v934_v18 = vpop.f32.mrb[22].mxu1 }
 0x28b   :  { %v3458_v17 = vmul.f32 -1.442695, %v937_v22  ;;  %v894_v19 = vpop.f32.mrb[23].mxu0  ;;  %v935_v8 = vpop.f32.mrb[23].mxu1 }
 0x28c   :  { %v3459_v9 = vmul.f32 -1.442695, %v938_v15  ;;  %v3460_v20 = vmul.f32 -1.442695, %v940_v14  ;;  %v5705_v19 = vld [vmem:[#allocation24_spill] sm:$0xff] }
 0x28d   :  { %3873 = vpow2.f32 %v3458_v17 }
 0x28e   :  { %3875 = vpow2.f32 %v3459_v9 }
 0x28f   :  { %3877 = vpow2.f32 %v3460_v20 }
 0x290   :  { %3879 = vtanh.f32 %v939_v30 }
 0x297   :  { %v3874_v6 = vpop.eup %3873 }
 0x298   :  { %v3876_v21 = vpop.eup %3875  ;;  %v944_v24 = vadd.f32 1.0, %v3874_v6 }
 0x299   :  { %v950_v26 = vadd.f32 1.0, %v3876_v21  ;;  %v3878_v28 = vpop.eup %3877 }
 0x29a   :  { %3881 = vrcp.f32 %v944_v24  ;;  %v3880_v23 = vpop.eup %3879  ;;  %v957_v7 = vadd.f32 1.0, %v3878_v28 }
 0x29b   :  { %3883 = vrcp.f32 %v950_v26 }
 0x29c   :  { %3885 = vrcp.f32 %v957_v7 }
 0x2a4   :  { %v3882_v29 = vpop.eup %3881 }
 0x2a5   :  { %v3884_v35 = vpop.eup %3883  ;;  %v962_v27 = vmul.f32 %v3882_v29, %v3880_v23 }
 0x2a6   :  { %v961_v31 = vmul.f32 %v3884_v35, %v4711_v12  ;;  %v3886_v0 = vpop.eup %3885 }
 0x2a8   :  { %v4757_v10 = vadd.f32 %v962_v27, %v961_v31 }
 0x2aa   :  { %3887 = vtanh.f32 %v4757_v10 }
 0x2b4   :  { %v3888_v22 = vpop.eup %3887 }
 0x2b5   :  { %v4760_v13 = vmul.f32 %v3888_v22, %v3886_v0 }
 0x2b7   :  { %v978_v30 = vpack.c.bf16 %v4760_v13, %v4760_v13 }
 0x2b9   :  { %1012 = vmatmul.mubr.bf16.vlgmr.msra.gmra.mrb[24].mxu0 %v978_v30  ;;  %1053 = vmatmul.mubr.bf16.vlgmr.msra.gmra.mrb[24].mxu1 %v978_v30 }
 0x2ba   :  { %1104 = vmatpush1.bf16.msra.mxu0 %v4477_v36  ;;  %1145 = vmatpush1.bf16.msra.mxu1 %v4479_v37 }
 0x2bb   :  { %1105 = vmatprep.subr.bf16.mxu0 %v4483_v38  ;;  %1146 = vmatprep.subr.bf16.mxu1 %v4485_v39 }
 0x2bc   :  { %1135 = vmatprep.mubr.bf16.mxu0 %v5704_v11  ;;  %1176 = vmatprep.mubr.bf16.mxu1 %v5704_v11 }
 0x2be   :  { %1106 = vmatpush1.bf16.msra.mxu0 %v4487_v40  ;;  %1147 = vmatpush1.bf16.msra.mxu1 %v4491_v41 }
 0x2bf   :  { %1107 = vmatprep.subr.bf16.mxu0 %v4495_v42  ;;  %1148 = vmatprep.subr.bf16.mxu1 %v4497_v43 }
 0x2c2   :  { %1108 = vmatpush1.bf16.msra.mxu0 %v4501_v45  ;;  %1149 = vmatpush1.bf16.msra.mxu1 %v4503_v46 }
 0x2c3   :  { %1109 = vmatprep.subr.bf16.mxu0 %v4507_v47  ;;  %1150 = vmatprep.subr.bf16.mxu1 %v4511_v48 }
 0x2c6   :  { %1110 = vmatpush1.bf16.msra.mxu0 %v4513_v49  ;;  %1151 = vmatpush1.bf16.msra.mxu1 %v4515_v50 }
 0x2c7   :  { %1111 = vmatprep.subr.bf16.mxu0 %v4519_v51  ;;  %1152 = vmatprep.subr.bf16.mxu1 %v4523_v52 }
 0x2ca   :  { %1112 = vmatpush1.bf16.msra.mxu0 %v4527_v54  ;;  %1153 = vmatpush1.bf16.msra.mxu1 %v4529_v55 }
 0x2cb   :  { %1113 = vmatprep.subr.bf16.mxu0 %v4531_v56  ;;  %1154 = vmatprep.subr.bf16.mxu1 %v4533_v57 }
 0x2ce   :  { %1114 = vmatpush1.bf16.msra.mxu0 %v4539_v58  ;;  %1155 = vmatpush1.bf16.msra.mxu1 %v4541_v59 }
 0x2cf   :  { %1115 = vmatprep.subr.bf16.mxu0 %v4543_v60  ;;  %1156 = vmatprep.subr.bf16.mxu1 %v4545_v61 }
 0x2d2   :  { %1116 = vmatpush1.bf16.msra.mxu0 %v4553_v63  ;;  %1157 = vmatpush1.bf16.msra.mxu1 %v4555_v1 }
 0x2d3   :  { %1117 = vmatprep.subr.bf16.mxu0 %v4557_v2  ;;  %1158 = vmatprep.subr.bf16.mxu1 %v4559_v3 }
 0x2d6   :  { %1118 = vmatpush1.bf16.msra.mxu0 %v4565_v4  ;;  %1159 = vmatpush1.bf16.msra.mxu1 %v4567_v5 }
 0x2d7   :  { %1227 = vmatprep.subr.bf16.mxu0 %v4473_v33  ;;  %1268 = vmatprep.subr.bf16.mxu1 %v4475_v34 }
 0x38c   :  { %v1013_v12 = vpop.f32.mrb[24].mxu0  ;;  %v1054_v53 = vpop.f32.mrb[24].mxu1 }
 0x38d   :  { %v1061_v15 = vadd.f32 %v1013_v12, %v4647_v32  ;;  %v1063_v14 = vadd.f32 %v1054_v53, %v4650_v44  ;;  %v1015_v16 = vpop.f32.mrb[25].mxu0  ;;  %v1056_v18 = vpop.f32.mrb[25].mxu1 }
 0x38e   :  { %v1062_v17 = vadd.f32 %v1015_v16, %v4652_v62  ;;  %v1064_v8 = vadd.f32 %v1056_v18, %v5705_v19  ;;  %v1017_v9 = vpop.f32.mrb[26].mxu0  ;;  %v1058_v20 = vpop.f32.mrb[26].mxu1 }
 0x38f   :  { %v3461_v6 = vmul.f32 -1.442695, %v1061_v15  ;;  %v1018_v21 = vpop.f32.mrb[27].mxu0  ;;  %v1059_v24 = vpop.f32.mrb[27].mxu1 }
 0x390   :  { %v3462_v33 = vmul.f32 -1.442695, %v1062_v17  ;;  %v3463_v34 = vmul.f32 -1.442695, %v1064_v8 }
 0x391   :  { %3889 = vpow2.f32 %v3461_v6 }
 0x392   :  { %3891 = vpow2.f32 %v3462_v33 }
 0x393   :  { %3893 = vpow2.f32 %v3463_v34 }
 0x394   :  { %3895 = vtanh.f32 %v1063_v14 }
 0x39b   :  { %v3890_v26 = vpop.eup %3889 }
 0x39c   :  { %v3892_v28 = vpop.eup %3891  ;;  %v1068_v32 = vadd.f32 1.0, %v3890_v26 }
 0x39d   :  { %v1074_v44 = vadd.f32 1.0, %v3892_v28  ;;  %v3894_v62 = vpop.eup %3893 }
 0x39e   :  { %3897 = vrcp.f32 %v1068_v32  ;;  %v3896_v23 = vpop.eup %3895  ;;  %v1081_v7 = vadd.f32 1.0, %v3894_v62 }
 0x39f   :  { %3899 = vrcp.f32 %v1074_v44 }
 0x3a0   :  { %3901 = vrcp.f32 %v1081_v7  ;;  %v4866_v7 = vld [vmem:[#allocation11 + $0x24] ss:$16 sps:$4 sm:$0xff]  }
 0x3a8   :  { %v3898_v29 = vpop.eup %3897 }
 0x3a9   :  { %v3900_v35 = vpop.eup %3899  ;;  %v1086_v27 = vmul.f32 %v3898_v29, %v3896_v23 }
 0x3aa   :  { %v1085_v31 = vmul.f32 %v3900_v35, %v4757_v10  ;;  %v3902_v22 = vpop.eup %3901  ;;  %v4860_v35 = vld [vmem:[#allocation11] ss:$16 sps:$4 sm:$0xff]  }
 0x3ac   :  { %v4803_v0 = vadd.f32 %v1086_v27, %v1085_v31  ;;  %v4863_v27 = vld [vmem:[#allocation11 + $0x8] ss:$16 sps:$4 sm:$0xff]   ;;  %v4869_v31 = vld [vmem:[#allocation11 + $0x2c] ss:$16 sps:$4 sm:$0xff]  }
 0x3ae   :  { %3903 = vtanh.f32 %v4803_v0 }
 0x3b8   :  { %v3904_v30 = vpop.eup %3903 }
 0x3b9   :  { %v4806_v12 = vmul.f32 %v3904_v30, %v3902_v22  ;;  %v4877_v22 = vld [vmem:[#allocation11 + $0x28] ss:$16 sps:$4 sm:$0xff]   ;;  %v4880_v30 = vld [vmem:[#allocation11 + $0x44] ss:$16 sps:$4 sm:$0xff]  }
 0x3bb   :  { %v1102_v53 = vpack.c.bf16 %v4806_v12, %v4806_v12 }
 0x3bd   :  { %1136 = vmatmul.mubr.bf16.vlgmr.msra.gmra.mrb[28].mxu0 %v1102_v53  ;;  %1177 = vmatmul.mubr.bf16.vlgmr.msra.gmra.mrb[28].mxu1 %v1102_v53  ;;  %v4883_v53 = vld [vmem:[#allocation11 + $0x4c] ss:$16 sps:$4 sm:$0xff]  }
 0x3be   :  { %1228 = vmatpush1.bf16.msra.mxu0 %v4477_v36  ;;  %1269 = vmatpush1.bf16.msra.mxu1 %v4479_v37  ;;  %v4842_v36 = vld [vmem:[#allocation11 + $0x4] ss:$16 sps:$4 sm:$0xff]   ;;  %v4845_v37 = vld [vmem:[#allocation11 + $0xc] ss:$16 sps:$4 sm:$0xff]  }
 0x3bf   :  { %1229 = vmatprep.subr.bf16.mxu0 %v4483_v38  ;;  %1270 = vmatprep.subr.bf16.mxu1 %v4485_v39 }
 0x3c0   :  { %1259 = vmatprep.mubr.bf16.mxu0 %v5704_v11  ;;  %1300 = vmatprep.mubr.bf16.mxu1 %v5704_v11 }
 0x3c2   :  { %1230 = vmatpush1.bf16.msra.mxu0 %v4487_v40  ;;  %1271 = vmatpush1.bf16.msra.mxu1 %v4491_v41  ;;  %v5706_v40 = vld [vmem:[#allocation25_spill] sm:$0xff] }
 0x3c3   :  { %1231 = vmatprep.subr.bf16.mxu0 %v4495_v42  ;;  %1272 = vmatprep.subr.bf16.mxu1 %v4497_v43  ;;  %v5707_v42 = vld [vmem:[#allocation26_spill] sm:$0xff] }
 0x3c6   :  { %1232 = vmatpush1.bf16.msra.mxu0 %v4501_v45  ;;  %1273 = vmatpush1.bf16.msra.mxu1 %v4503_v46 }
 0x3c7   :  { %1233 = vmatprep.subr.bf16.mxu0 %v4507_v47  ;;  %1274 = vmatprep.subr.bf16.mxu1 %v4511_v48  ;;  %v5708_v47 = vld [vmem:[#allocation27_spill] sm:$0xff] }
 0x3ca   :  { %1234 = vmatpush1.bf16.msra.mxu0 %v4513_v49  ;;  %1275 = vmatpush1.bf16.msra.mxu1 %v4515_v50  ;;  %v5709_v49 = vld [vmem:[#allocation28_spill] sm:$0xff] }
 0x3cb   :  { %1235 = vmatprep.subr.bf16.mxu0 %v4519_v51  ;;  %1276 = vmatprep.subr.bf16.mxu1 %v4523_v52 }
 0x3ce   :  { %1236 = vmatpush1.bf16.msra.mxu0 %v4527_v54  ;;  %1277 = vmatpush1.bf16.msra.mxu1 %v4529_v55 }
 0x3cf   :  { %1237 = vmatprep.subr.bf16.mxu0 %v4531_v56  ;;  %1278 = vmatprep.subr.bf16.mxu1 %v4533_v57 }
 0x3d2   :  { %1238 = vmatpush1.bf16.msra.mxu0 %v4539_v58  ;;  %1279 = vmatpush1.bf16.msra.mxu1 %v4541_v59 }
 0x3d3   :  { %1239 = vmatprep.subr.bf16.mxu0 %v4543_v60  ;;  %1280 = vmatprep.subr.bf16.mxu1 %v4545_v61 }
 0x3d6   :  { %1240 = vmatpush1.bf16.msra.mxu0 %v4553_v63  ;;  %1281 = vmatpush1.bf16.msra.mxu1 %v4555_v1 }
 0x3d7   :  { %1241 = vmatprep.subr.bf16.mxu0 %v4557_v2  ;;  %1282 = vmatprep.subr.bf16.mxu1 %v4559_v3 }
 0x3da   :  { %1242 = vmatpush1.bf16.msra.mxu0 %v4565_v4  ;;  %1283 = vmatpush1.bf16.msra.mxu1 %v4567_v5 }
 0x3db   :  { %1351 = vmatprep.subr.bf16.mxu0 %v4842_v36  ;;  %1392 = vmatprep.subr.bf16.mxu1 %v4845_v37 }
 0x490   :  { %v1137_v38 = vpop.f32.mrb[28].mxu0  ;;  %v1178_v39 = vpop.f32.mrb[28].mxu1 }
 0x491   :  { %v1185_v41 = vadd.f32 %v1137_v38, %v5706_v40  ;;  %v1187_v43 = vadd.f32 %v1178_v39, %v5707_v42  ;;  %v1139_v45 = vpop.f32.mrb[29].mxu0  ;;  %v1180_v46 = vpop.f32.mrb[29].mxu1  ;;  %v4886_v38 = vld [vmem:[#allocation11 + $0x40] ss:$16 sps:$4 sm:$0xff]   ;;  %v4889_v39 = vld [vmem:[#allocation11 + $0x48] ss:$16 sps:$4 sm:$0xff]  }
 0x492   :  { %v1186_v48 = vadd.f32 %v1139_v45, %v5708_v47  ;;  %v1188_v50 = vadd.f32 %v1180_v46, %v5709_v49  ;;  %v1141_v51 = vpop.f32.mrb[30].mxu0  ;;  %v1182_v10 = vpop.f32.mrb[30].mxu1  ;;  %v4892_v40 = vld [vmem:[#allocation11 + $0x64] ss:$16 sps:$4 sm:$0xff]   ;;  %v4898_v42 = vld [vmem:[#allocation11 + $0x60] ss:$16 sps:$4 sm:$0xff]  }
 0x493   :  { %v3464_v15 = vmul.f32 -1.442695, %v1185_v41  ;;  %v1142_v14 = vpop.f32.mrb[31].mxu0  ;;  %v1183_v16 = vpop.f32.mrb[31].mxu1  ;;  %v4895_v41 = vld [vmem:[#allocation11 + $0x6c] ss:$16 sps:$4 sm:$0xff]  }
 0x494   :  { %v3465_v18 = vmul.f32 -1.442695, %v1186_v48  ;;  %v3466_v17 = vmul.f32 -1.442695, %v1188_v50  ;;  %v4904_v45 = vld [vmem:[#allocation11 + $0x84] ss:$16 sps:$4 sm:$0xff]  }
 0x495   :  { %3905 = vpow2.f32 %v3464_v15 }
 0x496   :  { %3907 = vpow2.f32 %v3465_v18 }
 0x497   :  { %3909 = vpow2.f32 %v3466_v17 }
 0x498   :  { %3911 = vtanh.f32 %v1187_v43  ;;  %v4901_v43 = vld [vmem:[#allocation11 + $0x68] ss:$16 sps:$4 sm:$0xff]  }
 0x49f   :  { %v3906_v19 = vpop.eup %3905 }
 0x4a0   :  { %v3908_v8 = vpop.eup %3907  ;;  %v1192_v9 = vadd.f32 1.0, %v3906_v19 }
 0x4a1   :  { %v1198_v20 = vadd.f32 1.0, %v3908_v8  ;;  %v3910_v6 = vpop.eup %3909 }
 0x4a2   :  { %3913 = vrcp.f32 %v1192_v9  ;;  %v3912_v21 = vpop.eup %3911  ;;  %v1205_v26 = vadd.f32 1.0, %v3910_v6 }
 0x4a3   :  { %3915 = vrcp.f32 %v1198_v20 }
 0x4a4   :  { %3917 = vrcp.f32 %v1205_v26  ;;  %v4956_v26 = vld [vmem:[#allocation11 + $0x80] ss:$16 sps:$4 sm:$0xff]  }
 0x4ac   :  { %v3914_v24 = vpop.eup %3913 }
 0x4ad   :  { %v3916_v33 = vpop.eup %3915  ;;  %v1210_v34 = vmul.f32 %v3914_v24, %v3912_v21 }
 0x4ae   :  { %v1209_v28 = vmul.f32 %v3916_v33, %v4803_v0  ;;  %v3918_v44 = vpop.eup %3917  ;;  %v4874_v0 = vld [vmem:[#allocation11 + $0x20] ss:$16 sps:$4 sm:$0xff]  }
 0x4b0   :  { %v4853_v32 = vadd.f32 %v1210_v34, %v1209_v28  ;;  %v4953_v34 = vld [vmem:[#allocation11 + $0x8c] ss:$16 sps:$4 sm:$0xff]   ;;  %v4959_v28 = vld [vmem:[#allocation11 + $0x88] ss:$16 sps:$4 sm:$0xff]  }
 0x4b2   :  { %3919 = vtanh.f32 %v4853_v32 }
 0x4bc   :  { %v3920_v62 = vpop.eup %3919 }
 0x4bd   :  { %v4856_v23 = vmul.f32 %v3920_v62, %v3918_v44  ;;  %v4965_v44 = vld [vmem:[#allocation11 + $0xac] ss:$16 sps:$4 sm:$0xff]   ;;  %v4968_v62 = vld [vmem:[#allocation11 + $0xa0] ss:$16 sps:$4 sm:$0xff]  }
 0x4bf   :  { %v1226_v29 = vpack.c.bf16 %v4856_v23, %v4856_v23 }
 0x4c1   :  { %1260 = vmatmul.mubr.bf16.vlgmr.msra.gmra.mrb[32].mxu0 %v1226_v29  ;;  %1301 = vmatmul.mubr.bf16.vlgmr.msra.gmra.mrb[32].mxu1 %v1226_v29  ;;  %v4971_v29 = vld [vmem:[#allocation11 + $0xa8] ss:$16 sps:$4 sm:$0xff]  }
 0x4c2   :  { %1352 = vmatpush1.bf16.msra.mxu0 %v4860_v35  ;;  %1393 = vmatpush1.bf16.msra.mxu1 %v4863_v27 }
 0x4c3   :  { %1353 = vmatprep.subr.bf16.mxu0 %v4866_v7  ;;  %1394 = vmatprep.subr.bf16.mxu1 %v4869_v31 }
 0x4c4   :  { %1383 = vmatprep.mubr.bf16.mxu0 %v5704_v11  ;;  %1424 = vmatprep.mubr.bf16.mxu1 %v5704_v11 }
 0x4c6   :  { %1354 = vmatpush1.bf16.msra.mxu0 %v4874_v0  ;;  %1395 = vmatpush1.bf16.msra.mxu1 %v4877_v22 }
 0x4c7   :  { %1355 = vmatprep.subr.bf16.mxu0 %v4880_v30  ;;  %1396 = vmatprep.subr.bf16.mxu1 %v4883_v53 }
 0x4ca   :  { %1356 = vmatpush1.bf16.msra.mxu0 %v4886_v38  ;;  %1397 = vmatpush1.bf16.msra.mxu1 %v4889_v39 }
 0x4cb   :  { %1357 = vmatprep.subr.bf16.mxu0 %v4892_v40  ;;  %1398 = vmatprep.subr.bf16.mxu1 %v4895_v41 }
 0x4ce   :  { %1358 = vmatpush1.bf16.msra.mxu0 %v4898_v42  ;;  %1399 = vmatpush1.bf16.msra.mxu1 %v4901_v43 }
 0x4cf   :  { %1359 = vmatprep.subr.bf16.mxu0 %v4904_v45  ;;  %1400 = vmatprep.subr.bf16.mxu1 %v4523_v52 }
 0x4d2   :  { %1360 = vmatpush1.bf16.msra.mxu0 %v4527_v54  ;;  %1401 = vmatpush1.bf16.msra.mxu1 %v4529_v55  ;;  %v5710_v55 = vld [vmem:[#allocation29_spill] sm:$0xff] }
 0x4d3   :  { %1361 = vmatprep.subr.bf16.mxu0 %v4531_v56  ;;  %1402 = vmatprep.subr.bf16.mxu1 %v4533_v57  ;;  %v5711_v57 = vld [vmem:[#allocation30_spill] sm:$0xff] }
 0x4d6   :  { %1362 = vmatpush1.bf16.msra.mxu0 %v4539_v58  ;;  %1403 = vmatpush1.bf16.msra.mxu1 %v4541_v59 }
 0x4d7   :  { %1363 = vmatprep.subr.bf16.mxu0 %v4543_v60  ;;  %1404 = vmatprep.subr.bf16.mxu1 %v4545_v61  ;;  %v5712_v61 = vld [vmem:[#allocation31_spill] sm:$0xff] }
 0x4da   :  { %1364 = vmatpush1.bf16.msra.mxu0 %v4553_v63  ;;  %1405 = vmatpush1.bf16.msra.mxu1 %v4555_v1  ;;  %v5713_v1 = vld [vmem:[#allocation32_spill] sm:$0xff] }
 0x4db   :  { %1365 = vmatprep.subr.bf16.mxu0 %v4557_v2  ;;  %1406 = vmatprep.subr.bf16.mxu1 %v4559_v3 }
 0x4de   :  { %1366 = vmatpush1.bf16.msra.mxu0 %v4565_v4  ;;  %1407 = vmatpush1.bf16.msra.mxu1 %v4567_v5 }
 0x4df   :  { %1475 = vmatprep.subr.bf16.mxu0 %v4842_v36  ;;  %1516 = vmatprep.subr.bf16.mxu1 %v4845_v37 }
 0x594   :  { %v1261_v52 = vpop.f32.mrb[32].mxu0  ;;  %v1302_v54 = vpop.f32.mrb[32].mxu1 }
 0x595   :  { %v1309_v56 = vadd.f32 %v1261_v52, %v5710_v55  ;;  %v1311_v58 = vadd.f32 %v1302_v54, %v5711_v57  ;;  %v1263_v59 = vpop.f32.mrb[33].mxu0  ;;  %v1304_v60 = vpop.f32.mrb[33].mxu1  ;;  %v4974_v52 = vld [vmem:[#allocation11 + $0xc4] ss:$16 sps:$4 sm:$0xff]   ;;  %v4977_v54 = vld [vmem:[#allocation11 + $0xcc] ss:$16 sps:$4 sm:$0xff]  }
 0x596   :  { %v1310_v63 = vadd.f32 %v1263_v59, %v5712_v61  ;;  %v1312_v2 = vadd.f32 %v1304_v60, %v5713_v1  ;;  %v1265_v3 = vpop.f32.mrb[34].mxu0  ;;  %v1306_v4 = vpop.f32.mrb[34].mxu1  ;;  %v4980_v55 = vld [vmem:[#allocation11 + $0xc0] ss:$16 sps:$4 sm:$0xff]   ;;  %v4986_v57 = vld [vmem:[#allocation11 + $0xe4] ss:$16 sps:$4 sm:$0xff]  }
 0x597   :  { %v3467_v46 = vmul.f32 -1.442695, %v1309_v56  ;;  %v1266_v5 = vpop.f32.mrb[35].mxu0  ;;  %v1307_v47 = vpop.f32.mrb[35].mxu1  ;;  %v4983_v56 = vld [vmem:[#allocation11 + $0xc8] ss:$16 sps:$4 sm:$0xff]  }
 0x598   :  { %v3468_v48 = vmul.f32 -1.442695, %v1310_v63  ;;  %v3469_v49 = vmul.f32 -1.442695, %v1312_v2  ;;  %v4992_v59 = vld [vmem:[#allocation11 + $0xe0] ss:$16 sps:$4 sm:$0xff]  }
 0x599   :  { %3921 = vpow2.f32 %v3467_v46  ;;  %v4995_v60 = vld [vmem:[#allocation11 + $0xe8] ss:$16 sps:$4 sm:$0xff]  }
 0x59a   :  { %3923 = vpow2.f32 %v3468_v48  ;;  %v5714_v1 = vld [vmem:[#allocation33_spill] sm:$0xff]  ;;  %v5715_v3 = vld [vmem:[#allocation34_spill] sm:$0xff]  ;;  %v5716_v47 = vld [vmem:[#allocation35_spill] sm:$0xff] }
 0x59b   :  { %3925 = vpow2.f32 %v3469_v49  ;;  %v5717_v49 = vld [vmem:[#allocation36_spill] sm:$0xff] }
 0x59c   :  { %3927 = vtanh.f32 %v1311_v58  ;;  %v4989_v58 = vld [vmem:[#allocation11 + $0xec] ss:$16 sps:$4 sm:$0xff]  }
 0x5a3   :  { %v3922_v50 = vpop.eup %3921 }
 0x5a4   :  { %v3924_v51 = vpop.eup %3923  ;;  %v1316_v10 = vadd.f32 1.0, %v3922_v50 }
 0x5a5   :  { %v1322_v15 = vadd.f32 1.0, %v3924_v51  ;;  %v3926_v14 = vpop.eup %3925 }
 0x5a6   :  { %3929 = vrcp.f32 %v1316_v10  ;;  %v3928_v16 = vpop.eup %3927  ;;  %v1329_v8 = vadd.f32 1.0, %v3926_v14 }
 0x5a7   :  { %3931 = vrcp.f32 %v1322_v15 }
 0x5a8   :  { %3933 = vrcp.f32 %v1329_v8 }
 0x5b0   :  { %v3930_v18 = vpop.eup %3929 }
 0x5b1   :  { %v3932_v17 = vpop.eup %3931  ;;  %v1334_v19 = vmul.f32 %v3930_v18, %v3928_v16 }
 0x5b2   :  { %v1333_v9 = vmul.f32 %v3932_v17, %v4853_v32  ;;  %v3934_v6 = vpop.eup %3933  ;;  %v4962_v32 = vld [vmem:[#allocation11 + $0xa4] ss:$16 sps:$4 sm:$0xff]  }
 0x5b4   :  { %v4929_v20 = vadd.f32 %v1334_v19, %v1333_v9 }
 0x5b6   :  { %3935 = vtanh.f32 %v4929_v20 }
 0x5c0   :  { %v3936_v21 = vpop.eup %3935 }
 0x5c1   :  { %v4932_v24 = vmul.f32 %v3936_v21, %v3934_v6 }
 0x5c3   :  { %v1350_v33 = vpack.c.bf16 %v4932_v24, %v4932_v24 }
 0x5c5   :  { %1384 = vmatmul.mubr.bf16.vlgmr.msra.gmra.mrb[36].mxu0 %v1350_v33  ;;  %1425 = vmatmul.mubr.bf16.vlgmr.msra.gmra.mrb[36].mxu1 %v1350_v33 }
 0x5c6   :  { %1476 = vmatpush1.bf16.msra.mxu0 %v4860_v35  ;;  %1517 = vmatpush1.bf16.msra.mxu1 %v4863_v27 }
 0x5c7   :  { %1477 = vmatprep.subr.bf16.mxu0 %v4866_v7  ;;  %1518 = vmatprep.subr.bf16.mxu1 %v4869_v31 }
 0x5c8   :  { %1507 = vmatprep.mubr.bf16.mxu0 %v5704_v11  ;;  %1548 = vmatprep.mubr.bf16.mxu1 %v5704_v11 }
 0x5ca   :  { %1478 = vmatpush1.bf16.msra.mxu0 %v4874_v0  ;;  %1519 = vmatpush1.bf16.msra.mxu1 %v4877_v22 }
 0x5cb   :  { %1479 = vmatprep.subr.bf16.mxu0 %v4880_v30  ;;  %1520 = vmatprep.subr.bf16.mxu1 %v4883_v53 }
 0x5ce   :  { %1480 = vmatpush1.bf16.msra.mxu0 %v4886_v38  ;;  %1521 = vmatpush1.bf16.msra.mxu1 %v4889_v39 }
 0x5cf   :  { %1481 = vmatprep.subr.bf16.mxu0 %v4892_v40  ;;  %1522 = vmatprep.subr.bf16.mxu1 %v4895_v41 }
 0x5d2   :  { %1482 = vmatpush1.bf16.msra.mxu0 %v4898_v42  ;;  %1523 = vmatpush1.bf16.msra.mxu1 %v4901_v43 }
 0x5d3   :  { %1483 = vmatprep.subr.bf16.mxu0 %v4904_v45  ;;  %1524 = vmatprep.subr.bf16.mxu1 %v4953_v34 }
 0x5d6   :  { %1484 = vmatpush1.bf16.msra.mxu0 %v4956_v26  ;;  %1525 = vmatpush1.bf16.msra.mxu1 %v4959_v28 }
 0x5d7   :  { %1485 = vmatprep.subr.bf16.mxu0 %v4962_v32  ;;  %1526 = vmatprep.subr.bf16.mxu1 %v4965_v44 }
 0x5da   :  { %1486 = vmatpush1.bf16.msra.mxu0 %v4968_v62  ;;  %1527 = vmatpush1.bf16.msra.mxu1 %v4971_v29 }
 0x5db   :  { %1487 = vmatprep.subr.bf16.mxu0 %v4974_v52  ;;  %1528 = vmatprep.subr.bf16.mxu1 %v4977_v54 }
 0x5de   :  { %1488 = vmatpush1.bf16.msra.mxu0 %v4980_v55  ;;  %1529 = vmatpush1.bf16.msra.mxu1 %v4983_v56 }
 0x5df   :  { %1489 = vmatprep.subr.bf16.mxu0 %v4986_v57  ;;  %1530 = vmatprep.subr.bf16.mxu1 %v4989_v58 }
 0x5e2   :  { %1490 = vmatpush1.bf16.msra.mxu0 %v4992_v59  ;;  %1531 = vmatpush1.bf16.msra.mxu1 %v4995_v60 }
 0x5e3   :  { %1599 = vmatprep.subr.bf16.mxu0 %v4842_v36  ;;  %1640 = vmatprep.subr.bf16.mxu1 %v4845_v37 }
 0x698   :  { %v1385_v61 = vpop.f32.mrb[36].mxu0  ;;  %v1426_v63 = vpop.f32.mrb[36].mxu1 }
 0x699   :  { %v1433_v2 = vadd.f32 %v1385_v61, %v5714_v1  ;;  %v1435_v4 = vadd.f32 %v1426_v63, %v5715_v3  ;;  %v1387_v46 = vpop.f32.mrb[37].mxu0  ;;  %v1428_v5 = vpop.f32.mrb[37].mxu1 }
 0x69a   :  { %v1434_v48 = vadd.f32 %v1387_v46, %v5716_v47  ;;  %v1436_v50 = vadd.f32 %v1428_v5, %v5717_v49  ;;  %v1389_v51 = vpop.f32.mrb[38].mxu0  ;;  %v1430_v10 = vpop.f32.mrb[38].mxu1 }
 0x69b   :  { %v3470_v15 = vmul.f32 -1.442695, %v1433_v2  ;;  %v1390_v14 = vpop.f32.mrb[39].mxu0  ;;  %v1431_v16 = vpop.f32.mrb[39].mxu1  ;;  %v3761_v10 = vld [vmem:[#allocation9 + $0x100] ss:$16 sps:$4 sm:$0xff]  }
 0x69c   :  { %v3471_v36 = vmul.f32 -1.442695, %v1434_v48  ;;  %v3472_v37 = vmul.f32 -1.442695, %v1436_v50  ;;  %v3769_v16 = vld [vmem:[#allocation9 + $0x124] ss:$16 sps:$4 sm:$0xff]  }
 0x69d   :  { %3937 = vpow2.f32 %v3470_v15  ;;  %v3764_v15 = vld [vmem:[#allocation9 + $0x108] ss:$16 sps:$4 sm:$0xff]  }
 0x69e   :  { %3939 = vpow2.f32 %v3471_v36  ;;  %v3772_v36 = vld [vmem:[#allocation9 + $0x12c] ss:$16 sps:$4 sm:$0xff]  }
 0x69f   :  { %3941 = vpow2.f32 %v3472_v37  ;;  %v3767_v37 = vld [vmem:[#allocation9 + $0x120] ss:$16 sps:$4 sm:$0xff]  }
 0x6a0   :  { %3943 = vtanh.f32 %v1435_v4 }
 0x6a7   :  { %v3938_v18 = vpop.eup %3937 }
 0x6a8   :  { %v3940_v17 = vpop.eup %3939  ;;  %v1440_v19 = vadd.f32 1.0, %v3938_v18  ;;  %v3770_v18 = vld [vmem:[#allocation9 + $0x128] ss:$16 sps:$4 sm:$0xff]  }
 0x6a9   :  { %v1446_v8 = vadd.f32 1.0, %v3940_v17  ;;  %v3942_v9 = vpop.eup %3941  ;;  %v3775_v17 = vld [vmem:[#allocation9 + $0x144] ss:$16 sps:$4 sm:$0xff]  }
 0x6aa   :  { %3945 = vrcp.f32 %v1440_v19  ;;  %v3944_v6 = vpop.eup %3943  ;;  %v1453_v63 = vadd.f32 1.0, %v3942_v9  ;;  %v3778_v19 = vld [vmem:[#allocation9 + $0x14c] ss:$16 sps:$4 sm:$0xff]   ;;  %v3776_v9 = vld [vmem:[#allocation9 + $0x148] ss:$16 sps:$4 sm:$0xff]  }
 0x6ab   :  { %3947 = vrcp.f32 %v1446_v8  ;;  %v3773_v8 = vld [vmem:[#allocation9 + $0x140] ss:$16 sps:$4 sm:$0xff]  }
 0x6ac   :  { %3949 = vrcp.f32 %v1453_v63  ;;  %v3787_v63 = vld [vmem:[#allocation9 + $0x184] ss:$16 sps:$4 sm:$0xff]  }
 0x6b4   :  { %v3946_v21 = vpop.eup %3945 }
 0x6b5   :  { %v3948_v33 = vpop.eup %3947  ;;  %v1458_v61 = vmul.f32 %v3946_v21, %v3944_v6  ;;  %v3781_v6 = vld [vmem:[#allocation9 + $0x164] ss:$16 sps:$4 sm:$0xff]   ;;  %v3784_v21 = vld [vmem:[#allocation9 + $0x16c] ss:$16 sps:$4 sm:$0xff]  }
 0x6b6   :  { %v1457_v1 = vmul.f32 %v3948_v33, %v4929_v20  ;;  %v3950_v3 = vpop.eup %3949  ;;  %v3779_v33 = vld [vmem:[#allocation9 + $0x160] ss:$16 sps:$4 sm:$0xff]  }
 0x6b8   :  { %v5005_v2 = vadd.f32 %v1458_v61, %v1457_v1  ;;  %v3782_v61 = vld [vmem:[#allocation9 + $0x168] ss:$16 sps:$4 sm:$0xff]   ;;  %v3790_v1 = vld [vmem:[#allocation9 + $0x18c] ss:$16 sps:$4 sm:$0xff]  }
 0x6ba   :  { %3951 = vtanh.f32 %v5005_v2 }
 0x6c4   :  { %v3952_v46 = vpop.eup %3951 }
 0x6c5   :  { %v5008_v5 = vmul.f32 %v3952_v46, %v3950_v3  ;;  %v3788_v3 = vld [vmem:[#allocation9 + $0x188] ss:$16 sps:$4 sm:$0xff]   ;;  %v3793_v46 = vld [vmem:[#allocation9 + $0x1a4] ss:$16 sps:$4 sm:$0xff]  }
 0x6c7   :  { %v1474_v4 = vpack.c.bf16 %v5008_v5, %v5008_v5 }
 0x6c9   :  { %1508 = vmatmul.mubr.bf16.vlgmr.msra.gmra.mrb[40].mxu0 %v1474_v4  ;;  %1549 = vmatmul.mubr.bf16.vlgmr.msra.gmra.mrb[40].mxu1 %v1474_v4  ;;  %v3796_v4 = vld [vmem:[#allocation9 + $0x1ac] ss:$16 sps:$4 sm:$0xff]  }
 0x6ca   :  { %1600 = vmatpush1.bf16.msra.mxu0 %v4860_v35  ;;  %1641 = vmatpush1.bf16.msra.mxu1 %v4863_v27  ;;  %v3763_v35 = vld [vmem:[#allocation9 + $0x104] ss:$16 sps:$4 sm:$0xff]   ;;  %v3766_v27 = vld [vmem:[#allocation9 + $0x10c] ss:$16 sps:$4 sm:$0xff]  }
 0x6cb   :  { %1601 = vmatprep.subr.bf16.mxu0 %v4866_v7  ;;  %1642 = vmatprep.subr.bf16.mxu1 %v4869_v31 }
 0x6cc   :  { %1631 = vmatprep.mubr.bf16.mxu0 %v5704_v11  ;;  %1672 = vmatprep.mubr.bf16.mxu1 %v5704_v11 }
 0x6ce   :  { %1602 = vmatpush1.bf16.msra.mxu0 %v4874_v0  ;;  %1643 = vmatpush1.bf16.msra.mxu1 %v4877_v22  ;;  %v5718_v0 = vld [vmem:[#allocation37_spill] sm:$0xff] }
 0x6cf   :  { %1603 = vmatprep.subr.bf16.mxu0 %v4880_v30  ;;  %1644 = vmatprep.subr.bf16.mxu1 %v4883_v53  ;;  %v5719_v30 = vld [vmem:[#allocation38_spill] sm:$0xff] }
 0x6d2   :  { %1604 = vmatpush1.bf16.msra.mxu0 %v4886_v38  ;;  %1645 = vmatpush1.bf16.msra.mxu1 %v4889_v39 }
 0x6d3   :  { %1605 = vmatprep.subr.bf16.mxu0 %v4892_v40  ;;  %1646 = vmatprep.subr.bf16.mxu1 %v4895_v41  ;;  %v5720_v40 = vld [vmem:[#allocation39_spill] sm:$0xff] }
 0x6d6   :  { %1606 = vmatpush1.bf16.msra.mxu0 %v4898_v42  ;;  %1647 = vmatpush1.bf16.msra.mxu1 %v4901_v43  ;;  %v5721_v42 = vld [vmem:[#allocation40_spill] sm:$0xff] }
 0x6d7   :  { %1607 = vmatprep.subr.bf16.mxu0 %v4904_v45  ;;  %1648 = vmatprep.subr.bf16.mxu1 %v4953_v34 }
 0x6da   :  { %1608 = vmatpush1.bf16.msra.mxu0 %v4956_v26  ;;  %1649 = vmatpush1.bf16.msra.mxu1 %v4959_v28 }
 0x6db   :  { %1609 = vmatprep.subr.bf16.mxu0 %v4962_v32  ;;  %1650 = vmatprep.subr.bf16.mxu1 %v4965_v44 }
 0x6de   :  { %1610 = vmatpush1.bf16.msra.mxu0 %v4968_v62  ;;  %1651 = vmatpush1.bf16.msra.mxu1 %v4971_v29 }
 0x6df   :  { %1611 = vmatprep.subr.bf16.mxu0 %v4974_v52  ;;  %1652 = vmatprep.subr.bf16.mxu1 %v4977_v54 }
 0x6e2   :  { %1612 = vmatpush1.bf16.msra.mxu0 %v4980_v55  ;;  %1653 = vmatpush1.bf16.msra.mxu1 %v4983_v56 }
 0x6e3   :  { %1613 = vmatprep.subr.bf16.mxu0 %v4986_v57  ;;  %1654 = vmatprep.subr.bf16.mxu1 %v4989_v58 }
 0x6e6   :  { %1614 = vmatpush1.bf16.msra.mxu0 %v4992_v59  ;;  %1655 = vmatpush1.bf16.msra.mxu1 %v4995_v60 }
 0x6e7   :  { %1942 = vmatprep.subr.bf16.mxu0 %v3763_v35  ;;  %2015 = vmatprep.subr.bf16.mxu1 %v3766_v27  ;;  %v3791_v35 = vld [vmem:[#allocation9 + $0x1a0] ss:$16 sps:$4 sm:$0xff]   ;;  %v3794_v27 = vld [vmem:[#allocation9 + $0x1a8] ss:$16 sps:$4 sm:$0xff]  }
 0x79c   :  { %v1509_v7 = vpop.f32.mrb[40].mxu0  ;;  %v1550_v31 = vpop.f32.mrb[40].mxu1 }
 0x79d   :  { %v1557_v22 = vadd.f32 %v1509_v7, %v5718_v0  ;;  %v1559_v53 = vadd.f32 %v1550_v31, %v5719_v30  ;;  %v1511_v38 = vpop.f32.mrb[41].mxu0  ;;  %v1552_v39 = vpop.f32.mrb[41].mxu1  ;;  %v3799_v7 = vld [vmem:[#allocation9 + $0x1c4] ss:$16 sps:$4 sm:$0xff]   ;;  %v3802_v31 = vld [vmem:[#allocation9 + $0x1cc] ss:$16 sps:$4 sm:$0xff]  }
 0x79e   :  { %v1558_v41 = vadd.f32 %v1511_v38, %v5720_v40  ;;  %v1560_v43 = vadd.f32 %v1552_v39, %v5721_v42  ;;  %v1513_v45 = vpop.f32.mrb[42].mxu0  ;;  %v1554_v20 = vpop.f32.mrb[42].mxu1  ;;  %v3797_v0 = vld [vmem:[#allocation9 + $0x1c0] ss:$16 sps:$4 sm:$0xff]   ;;  %v3805_v30 = vld [vmem:[#allocation9 + $0x1e4] ss:$16 sps:$4 sm:$0xff]   ;;  %v1722_v40 = vpack.c.bf16 %v4760_v13, %v4714_v25  ;;  %v1724_v42 = vpack.c.bf16 %v5008_v5, %v4932_v24 }
 0x79f   :  { %v3473_v34 = vmul.f32 -1.442695, %v1557_v22  ;;  %v1514_v26 = vpop.f32.mrb[43].mxu0  ;;  %v1555_v28 = vpop.f32.mrb[43].mxu1  ;;  %v3800_v22 = vld [vmem:[#allocation9 + $0x1c8] ss:$16 sps:$4 sm:$0xff]  }
 0x7a0   :  { %v3474_v32 = vmul.f32 -1.442695, %v1558_v41  ;;  %v3475_v44 = vmul.f32 -1.442695, %v1560_v43  ;;  %v3803_v38 = vld [vmem:[#allocation9 + $0x1e0] ss:$16 sps:$4 sm:$0xff]   ;;  %v1723_v41 = vpack.c.bf16 %v4856_v23, %v4806_v12 }
 0x7a1   :  { %3953 = vpow2.f32 %v3473_v34  ;;  %v3806_v39 = vld [vmem:[#allocation9 + $0x1e8] ss:$16 sps:$4 sm:$0xff]   ;;  %v5070_v25 = vld [vmem:[#allocation11 + $0x104] ss:$16 sps:$4 sm:$0xff]   ;;  %v5072_v13 = vld [vmem:[#allocation11 + $0x10c] ss:$16 sps:$4 sm:$0xff]  }
 0x7a2   :  { %3955 = vpow2.f32 %v3474_v32  ;;  %v5074_v12 = vld [vmem:[#allocation11 + $0x100] ss:$16 sps:$4 sm:$0xff]   ;;  %v5076_v23 = vld [vmem:[#allocation11 + $0x108] ss:$16 sps:$4 sm:$0xff]   ;;  %v5082_v24 = vld [vmem:[#allocation11 + $0x124] ss:$16 sps:$4 sm:$0xff]  }
 0x7a3   :  { %3957 = vpow2.f32 %v3475_v44  ;;  %v5084_v5 = vld [vmem:[#allocation11 + $0x12c] ss:$16 sps:$4 sm:$0xff]   ;;  %v5086_v43 = vld [vmem:[#allocation11 + $0x120] ss:$16 sps:$4 sm:$0xff]   ;;  %v5088_v45 = vld [vmem:[#allocation11 + $0x128] ss:$16 sps:$4 sm:$0xff]  }
 0x7a4   :  { %3959 = vtanh.f32 %v1559_v53  ;;  %v3808_v53 = vld [vmem:[#allocation9 + $0x1ec] ss:$16 sps:$4 sm:$0xff]   ;;  %v5094_v20 = vld [vmem:[#allocation11 + $0x144] ss:$16 sps:$4 sm:$0xff]   ;;  %v5098_v26 = vld [vmem:[#allocation11 + $0x140] ss:$16 sps:$4 sm:$0xff]  }
 0x7a5   :  { %v5096_v34 = vld [vmem:[#allocation11 + $0x14c] ss:$16 sps:$4 sm:$0xff]   ;;  %v5100_v28 = vld [vmem:[#allocation11 + $0x148] ss:$16 sps:$4 sm:$0xff]   ;;  %v5106_v32 = vld [vmem:[#allocation11 + $0x164] ss:$16 sps:$4 sm:$0xff]  }
 0x7a6   :  { %v5108_v44 = vld [vmem:[#allocation11 + $0x16c] ss:$16 sps:$4 sm:$0xff]  }
 0x7ab   :  { %v3954_v62 = vpop.eup %3953 }
 0x7ac   :  { %v3956_v29 = vpop.eup %3955  ;;  %v1564_v52 = vadd.f32 1.0, %v3954_v62  ;;  %v5110_v62 = vld [vmem:[#allocation11 + $0x160] ss:$16 sps:$4 sm:$0xff]  }
 0x7ad   :  { %v1570_v54 = vadd.f32 1.0, %v3956_v29  ;;  %v3958_v55 = vpop.eup %3957  ;;  %v5112_v29 = vld [vmem:[#allocation11 + $0x168] ss:$16 sps:$4 sm:$0xff]  }
 0x7ae   :  { %3961 = vrcp.f32 %v1564_v52  ;;  %v3960_v56 = vpop.eup %3959  ;;  %v1577_v60 = vadd.f32 1.0, %v3958_v55  ;;  %v5118_v52 = vld [vmem:[#allocation11 + $0x184] ss:$16 sps:$4 sm:$0xff]   ;;  %v5122_v55 = vld [vmem:[#allocation11 + $0x180] ss:$16 sps:$4 sm:$0xff]  }
 0x7af   :  { %3963 = vrcp.f32 %v1570_v54  ;;  %v5120_v54 = vld [vmem:[#allocation11 + $0x18c] ss:$16 sps:$4 sm:$0xff]  }
 0x7b0   :  { %3965 = vrcp.f32 %v1577_v60  ;;  %v5136_v60 = vld [vmem:[#allocation11 + $0x1a8] ss:$16 sps:$4 sm:$0xff]  }
 0x7b8   :  { %v3962_v57 = vpop.eup %3961 }
 0x7b9   :  { %v3964_v58 = vpop.eup %3963  ;;  %v1582_v59 = vmul.f32 %v3962_v57, %v3960_v56  ;;  %v5124_v56 = vld [vmem:[#allocation11 + $0x188] ss:$16 sps:$4 sm:$0xff]   ;;  %v5130_v57 = vld [vmem:[#allocation11 + $0x1a4] ss:$16 sps:$4 sm:$0xff]  }
 0x7ba   :  { %v1581_v47 = vmul.f32 %v3964_v58, %v5005_v2  ;;  %v3966_v49 = vpop.eup %3965  ;;  %v3785_v2 = vld [vmem:[#allocation9 + $0x180] ss:$16 sps:$4 sm:$0xff]   ;;  %v5132_v58 = vld [vmem:[#allocation11 + $0x1ac] ss:$16 sps:$4 sm:$0xff]  }
 0x7bc   :  { %v5049_v48 = vadd.f32 %v1582_v59, %v1581_v47  ;;  %v5134_v59 = vld [vmem:[#allocation11 + $0x1a0] ss:$16 sps:$4 sm:$0xff]   ;;  %v5142_v47 = vld [vmem:[#allocation11 + $0x1c4] ss:$16 sps:$4 sm:$0xff]  }
 0x7be   :  { %3967 = vtanh.f32 %v5049_v48 }
 0x7c8   :  { %v3968_v50 = vpop.eup %3967 }
 0x7c9   :  { %v5052_v51 = vmul.f32 %v3968_v50, %v3966_v49  ;;  %v5144_v49 = vld [vmem:[#allocation11 + $0x1cc] ss:$16 sps:$4 sm:$0xff]   ;;  %v5146_v50 = vld [vmem:[#allocation11 + $0x1c0] ss:$16 sps:$4 sm:$0xff]  }
 0x7cb   :  { %v1598_v14 = vpack.c.bf16 %v5052_v51, %v5052_v51 }
 0x7cd   :  { %1632 = vmatmul.mubr.bf16.vlgmr.msra.gmra.mrb[44].mxu0 %v1598_v14  ;;  %1673 = vmatmul.mubr.bf16.vlgmr.msra.gmra.mrb[44].mxu1 %v1598_v14  ;;  %v5156_v14 = vld [vmem:[#allocation11 + $0x1ec] ss:$16 sps:$4 sm:$0xff]  }
 0x7ce   :  { %1943 = vmatpush1.bf16.msra.mxu0 %v3761_v10  ;;  %2016 = vmatpush1.bf16.msra.mxu1 %v3764_v15  ;;  %v5148_v10 = vld [vmem:[#allocation11 + $0x1c8] ss:$16 sps:$4 sm:$0xff]   ;;  %v5154_v15 = vld [vmem:[#allocation11 + $0x1e4] ss:$16 sps:$4 sm:$0xff]  }
 0x7cf   :  { %1944 = vmatprep.subr.bf16.mxu0 %v3769_v16  ;;  %2017 = vmatprep.subr.bf16.mxu1 %v3772_v36  ;;  %v5158_v16 = vld [vmem:[#allocation11 + $0x1e0] ss:$16 sps:$4 sm:$0xff]   ;;  %v5160_v36 = vld [vmem:[#allocation11 + $0x1e8] ss:$16 sps:$4 sm:$0xff]  }
 0x7d0   :  { %1974 = vmatprep.mubr.bf16.mxu0 %v5704_v11  ;;  %2047 = vmatprep.mubr.bf16.mxu1 %v5704_v11 }
 0x7d2   :  { %1945 = vmatpush1.bf16.msra.mxu0 %v3767_v37  ;;  %2018 = vmatpush1.bf16.msra.mxu1 %v3770_v18 }
 0x7d3   :  { %1946 = vmatprep.subr.bf16.mxu0 %v3775_v17  ;;  %2019 = vmatprep.subr.bf16.mxu1 %v3778_v19  ;;  %v5722_v17 = vld [vmem:[#allocation41_spill] sm:$0xff] }
 0x7d6   :  { %1947 = vmatpush1.bf16.msra.mxu0 %v3773_v8  ;;  %2020 = vmatpush1.bf16.msra.mxu1 %v3776_v9  ;;  %v5723_v8 = vld [vmem:[#allocation42_spill] sm:$0xff] }
 0x7d7   :  { %1948 = vmatprep.subr.bf16.mxu0 %v3781_v6  ;;  %2021 = vmatprep.subr.bf16.mxu1 %v3784_v21 }
 0x7da   :  { %1949 = vmatpush1.bf16.msra.mxu0 %v3779_v33  ;;  %2022 = vmatpush1.bf16.msra.mxu1 %v3782_v61  ;;  %v5724_v33 = vld [vmem:[#allocation43_spill] sm:$0xff] }
 0x7db   :  { %1950 = vmatprep.subr.bf16.mxu0 %v3787_v63  ;;  %2023 = vmatprep.subr.bf16.mxu1 %v3790_v1  ;;  %v5725_v63 = vld [vmem:[#allocation44_spill] sm:$0xff] }
 0x7de   :  { %1951 = vmatpush1.bf16.msra.mxu0 %v3785_v2  ;;  %2024 = vmatpush1.bf16.msra.mxu1 %v3788_v3 }
 0x7df   :  { %1952 = vmatprep.subr.bf16.mxu0 %v3793_v46  ;;  %2025 = vmatprep.subr.bf16.mxu1 %v3796_v4 }
 0x7e2   :  { %1953 = vmatpush1.bf16.msra.mxu0 %v3791_v35  ;;  %2026 = vmatpush1.bf16.msra.mxu1 %v3794_v27 }
 0x7e3   :  { %1954 = vmatprep.subr.bf16.mxu0 %v3799_v7  ;;  %2027 = vmatprep.subr.bf16.mxu1 %v3802_v31 }
 0x7e6   :  { %1955 = vmatpush1.bf16.msra.mxu0 %v3797_v0  ;;  %2028 = vmatpush1.bf16.msra.mxu1 %v3800_v22 }
 0x7e7   :  { %1956 = vmatprep.subr.bf16.mxu0 %v3805_v30  ;;  %2029 = vmatprep.subr.bf16.mxu1 %v3808_v53 }
 0x7ea   :  { %1957 = vmatpush1.bf16.msra.mxu0 %v3803_v38  ;;  %2030 = vmatpush1.bf16.msra.mxu1 %v3806_v39 }
 0x7eb   :  { %2321 = vmatprep.subr.bf16.mxu0 %v5070_v25  ;;  %2362 = vmatprep.subr.bf16.mxu1 %v5072_v13 }
 0x7ed   :  { %1975 = vmatmul.mubr.bf16.vlgmr.msra.gmra.mrb[48].mxu0 %v1722_v40  ;;  %2048 = vmatmul.mubr.bf16.vlgmr.msra.gmra.mrb[48].mxu1 %v1722_v40 }
 0x7ee   :  { %1984 = vmatprep.mubr.bf16.mxu0 %v5704_v11  ;;  %2057 = vmatprep.mubr.bf16.mxu1 %v5704_v11 }
 0x7ef   :  { %2322 = vmatpush1.bf16.msra.mxu0 %v5074_v12  ;;  %2363 = vmatpush1.bf16.msra.mxu1 %v5076_v23 }
 0x7f0   :  { %2323 = vmatprep.subr.bf16.mxu0 %v5082_v24  ;;  %2364 = vmatprep.subr.bf16.mxu1 %v5084_v5 }
 0x7f3   :  { %2324 = vmatpush1.bf16.msra.mxu0 %v5086_v43  ;;  %2365 = vmatpush1.bf16.msra.mxu1 %v5088_v45 }
 0x7f4   :  { %2325 = vmatprep.subr.bf16.mxu0 %v5094_v20  ;;  %2366 = vmatprep.subr.bf16.mxu1 %v5096_v34 }
 0x7f5   :  { %1985 = vmatmul.mubr.bf16.gmra.mrb[52].mxu0 %v1723_v41  ;;  %2058 = vmatmul.mubr.bf16.gmra.mrb[52].mxu1 %v1723_v41 }
 0x7f6   :  { %1994 = vmatprep.mubr.bf16.mxu0 %v5704_v11  ;;  %2067 = vmatprep.mubr.bf16.mxu1 %v5704_v11 }
 0x7f7   :  { %2326 = vmatpush1.bf16.msra.mxu0 %v5098_v26  ;;  %2367 = vmatpush1.bf16.msra.mxu1 %v5100_v28 }
 0x7f8   :  { %2327 = vmatprep.subr.bf16.mxu0 %v5106_v32  ;;  %2368 = vmatprep.subr.bf16.mxu1 %v5108_v44 }
 0x7fb   :  { %2328 = vmatpush1.bf16.msra.mxu0 %v5110_v62  ;;  %2369 = vmatpush1.bf16.msra.mxu1 %v5112_v29 }
 0x7fc   :  { %2329 = vmatprep.subr.bf16.mxu0 %v5118_v52  ;;  %2370 = vmatprep.subr.bf16.mxu1 %v5120_v54 }
 0x7fd   :  { %1995 = vmatmul.mubr.bf16.gmra.mrb[56].mxu0 %v1724_v42  ;;  %2068 = vmatmul.mubr.bf16.gmra.mrb[56].mxu1 %v1724_v42 }
 0x7fe   :  { %2004 = vmatprep.mubr.bf16.mxu0 %v5704_v11  ;;  %2077 = vmatprep.mubr.bf16.mxu1 %v5704_v11 }
 0x7ff   :  { %2330 = vmatpush1.bf16.msra.mxu0 %v5122_v55  ;;  %2371 = vmatpush1.bf16.msra.mxu1 %v5124_v56 }
 0x800   :  { %2331 = vmatprep.subr.bf16.mxu0 %v5130_v57  ;;  %2372 = vmatprep.subr.bf16.mxu1 %v5132_v58 }
 0x803   :  { %2332 = vmatpush1.bf16.msra.mxu0 %v5134_v59  ;;  %2373 = vmatpush1.bf16.msra.mxu1 %v5136_v60 }
 0x804   :  { %2333 = vmatprep.subr.bf16.mxu0 %v5142_v47  ;;  %2374 = vmatprep.subr.bf16.mxu1 %v5144_v49 }
 0x807   :  { %2334 = vmatpush1.bf16.msra.mxu0 %v5146_v50  ;;  %2375 = vmatpush1.bf16.msra.mxu1 %v5148_v10 }
 0x808   :  { %2335 = vmatprep.subr.bf16.mxu0 %v5154_v15  ;;  %2376 = vmatprep.subr.bf16.mxu1 %v5156_v14 }
 0x80b   :  { %2336 = vmatpush1.bf16.msra.mxu0 %v5158_v16  ;;  %2377 = vmatpush1.bf16.msra.mxu1 %v5160_v36 }
 0x80c   :  { %2440 = vmatprep.subr.bf16.mxu0 %v5070_v25  ;;  %2481 = vmatprep.subr.bf16.mxu1 %v5072_v13 }
 0x8a0   :  { %v1633_v37 = vpop.f32.mrb[44].mxu0  ;;  %v1674_v18 = vpop.f32.mrb[44].mxu1 }
 0x8a1   :  { %v1681_v19 = vadd.f32 %v1633_v37, %v5722_v17  ;;  %v1683_v9 = vadd.f32 %v1674_v18, %v5723_v8  ;;  %v1635_v6 = vpop.f32.mrb[45].mxu0  ;;  %v1676_v21 = vpop.f32.mrb[45].mxu1 }
 0x8a2   :  { %v1682_v61 = vadd.f32 %v1635_v6, %v5724_v33  ;;  %v1684_v1 = vadd.f32 %v1676_v21, %v5725_v63  ;;  %v1637_v2 = vpop.f32.mrb[46].mxu0  ;;  %v1678_v3 = vpop.f32.mrb[46].mxu1 }
 0x8a3   :  { %v3476_v46 = vmul.f32 -1.442695, %v1681_v19  ;;  %v1638_v4 = vpop.f32.mrb[47].mxu0  ;;  %v1679_v35 = vpop.f32.mrb[47].mxu1 }
 0x8a4   :  { %v3477_v27 = vmul.f32 -1.442695, %v1682_v61  ;;  %v3478_v7 = vmul.f32 -1.442695, %v1684_v1 }
 0x8a5   :  { %3969 = vpow2.f32 %v3476_v46 }
 0x8a6   :  { %3971 = vpow2.f32 %v3477_v27 }
 0x8a7   :  { %3973 = vpow2.f32 %v3478_v7 }
 0x8a8   :  { %3975 = vtanh.f32 %v1683_v9 }
 0x8af   :  { %v3970_v31 = vpop.eup %3969 }
 0x8b0   :  { %v3972_v0 = vpop.eup %3971  ;;  %v1688_v22 = vadd.f32 1.0, %v3970_v31 }
 0x8b1   :  { %v1694_v30 = vadd.f32 1.0, %v3972_v0  ;;  %v3974_v53 = vpop.eup %3973 }
 0x8b2   :  { %3977 = vrcp.f32 %v1688_v22  ;;  %v3976_v38 = vpop.eup %3975  ;;  %v1701_v42 = vadd.f32 1.0, %v3974_v53 }
 0x8b3   :  { %3979 = vrcp.f32 %v1694_v30 }
 0x8b4   :  { %3981 = vrcp.f32 %v1701_v42  ;;  %v5741_v42 = vmov 0.0|0.0  }
 0x8bc   :  { %v3978_v39 = vpop.eup %3977 }
 0x8bd   :  { %v3980_v40 = vpop.eup %3979  ;;  %v1706_v41 = vmul.f32 %v3978_v39, %v3976_v38 }
 0x8be   :  { %v1705_v37 = vmul.f32 %v3980_v40, %v5049_v48  ;;  %v3982_v4 = vpop.eup %3981 }
 0x8c0   :  { %v5173_v18 = vpop.f32.mrb[48].mxu0  ;;  %v5175_v17 = vpop.f32.mrb[48].mxu1  ;;  %v1707_v19 = vadd.f32 %v1706_v41, %v1705_v37  ;;  %v1760_v37 = vld [vmem:[#allocation12 + $0x4] sm:$0xf] }
 0x8c1   :  { %v5177_v8 = vpop.f32.mrb[49].mxu0  ;;  %v5179_v9 = vpop.f32.mrb[49].mxu1 }
 0x8c2   :  { %v5181_v6 = vpop.f32.mrb[50].mxu0  ;;  %v5183_v21 = vpop.f32.mrb[50].mxu1  ;;  %3983 = vtanh.f32 %v1707_v19 }
 0x8c3   :  { %v5185_v33 = vpop.f32.mrb[51].mxu0  ;;  %v5187_v61 = vpop.f32.mrb[51].mxu1 }
 0x8c8   :  { %v5189_v48 = vpop.f32.mrb[52].mxu0  ;;  %v5191_v63 = vpop.f32.mrb[52].mxu1 }
 0x8c9   :  { %5726 = vst [vmem:[#allocation24_spill] sm:$0xff] %v5191_v63  ;;  %v5193_v1 = vpop.f32.mrb[53].mxu0  ;;  %v5195_v2 = vpop.f32.mrb[53].mxu1 }
 0x8ca   :  { %5727 = vst [vmem:[#allocation25_spill] sm:$0xff] %v5193_v1  ;;  %5728 = vst [vmem:[#allocation26_spill] sm:$0xff] %v5195_v2  ;;  %v5197_v3 = vpop.f32.mrb[54].mxu0  ;;  %v5199_v46 = vpop.f32.mrb[54].mxu1 }
 0x8cb   :  { %5729 = vst [vmem:[#allocation27_spill] sm:$0xff] %v5197_v3  ;;  %5730 = vst [vmem:[#allocation28_spill] sm:$0xff] %v5199_v46  ;;  %v5201_v35 = vpop.f32.mrb[55].mxu0  ;;  %v5203_v27 = vpop.f32.mrb[55].mxu1 }
 0x8cc   :  { %5731 = vst [vmem:[#allocation29_spill] sm:$0xff] %v5201_v35  ;;  %5732 = vst [vmem:[#allocation30_spill] sm:$0xff] %v5203_v27  ;;  %v3984_v7 = vpop.eup %3983 }
 0x8cd   :  { %v1709_v31 = vmul.f32 %v3984_v7, %v3982_v4 }
 0x8cf   :  { %v1725_v0 = vpack.c.bf16 %v1709_v31, %v5052_v51 }
 0x8d0   :  { %v5206_v22 = vpop.f32.mrb[56].mxu0  ;;  %v5208_v30 = vpop.f32.mrb[56].mxu1 }
 0x8d1   :  { %5733 = vst [vmem:[#allocation31_spill] sm:$0xff] %v5206_v22  ;;  %5734 = vst [vmem:[#allocation32_spill] sm:$0xff] %v5208_v30  ;;  %v5210_v53 = vpop.f32.mrb[57].mxu0  ;;  %v5212_v38 = vpop.f32.mrb[57].mxu1  ;;  %2005 = vmatmul.mubr.bf16.gmra.mrb[60].mxu0 %v1725_v0  ;;  %2078 = vmatmul.mubr.bf16.gmra.mrb[60].mxu1 %v1725_v0 }
 0x8d2   :  { %5735 = vst [vmem:[#allocation33_spill] sm:$0xff] %v5210_v53  ;;  %5736 = vst [vmem:[#allocation34_spill] sm:$0xff] %v5212_v38  ;;  %v5214_v39 = vpop.f32.mrb[58].mxu0  ;;  %v5216_v40 = vpop.f32.mrb[58].mxu1  ;;  %2353 = vmatprep.mubr.bf16.mxu0 %v5704_v11  ;;  %2394 = vmatprep.mubr.bf16.mxu1 %v5704_v11 }
 0x8d3   :  { %5737 = vst [vmem:[#allocation35_spill] sm:$0xff] %v5214_v39  ;;  %5738 = vst [vmem:[#allocation36_spill] sm:$0xff] %v5216_v40  ;;  %v5220_v41 = vpop.f32.mrb[59].mxu0  ;;  %v5222_v51 = vpop.f32.mrb[59].mxu1 }
 0x8d4   :  { %5739 = vst [vmem:[#allocation37_spill] sm:$0xff] %v5220_v41  ;;  %5740 = vst [vmem:[#allocation38_spill] sm:$0xff] %v5222_v51  ;;  %v5748_v51 = vld [vmem:[#allocation23_spill] sm:$0xff] }
 0x8d5   :  { %v5749_v41 = vsub.s32 0, %v5748_v51  ;;  %v5750_v39 = vsub.s32 2, %v5748_v51 }
 0x8d7   :  { %v5274_v40 = vrot.slane %v1760_v37, %v5749_v41  ;;  %v5278_v38 = vrot.slane %v1760_v37, %v5750_v39 }
 0x8d9   :  { %2354 = vmatmul.mubr.bf16.vlgmr.msra.gmra.mrb[64].mxu0 %v5741_v42  ;;  %2395 = vmatmul.mubr.bf16.vlgmr.msra.gmra.mrb[64].mxu1 %v5741_v42  ;;  %v1977_v41 = vadd.f32 %v5173_v18, %v5274_v40 }
 0x8da   :  { %2441 = vmatpush1.bf16.msra.mxu0 %v5074_v12  ;;  %2482 = vmatpush1.bf16.msra.mxu1 %v5076_v23 }
 0x8db   :  { %2442 = vmatprep.subr.bf16.mxu0 %v5082_v24  ;;  %2483 = vmatprep.subr.bf16.mxu1 %v5084_v5 }
 0x8dc   :  { %2472 = vmatprep.mubr.bf16.mxu0 %v5704_v11  ;;  %2513 = vmatprep.mubr.bf16.mxu1 %v5704_v11 }
 0x8de   :  { %2443 = vmatpush1.bf16.msra.mxu0 %v5086_v43  ;;  %2484 = vmatpush1.bf16.msra.mxu1 %v5088_v45 }
 0x8df   :  { %2444 = vmatprep.subr.bf16.mxu0 %v5094_v20  ;;  %2485 = vmatprep.subr.bf16.mxu1 %v5096_v34 }
 0x8e2   :  { %2445 = vmatpush1.bf16.msra.mxu0 %v5098_v26  ;;  %2486 = vmatpush1.bf16.msra.mxu1 %v5100_v28 }
 0x8e3   :  { %2446 = vmatprep.subr.bf16.mxu0 %v5106_v32  ;;  %2487 = vmatprep.subr.bf16.mxu1 %v5108_v44 }
 0x8e6   :  { %2447 = vmatpush1.bf16.msra.mxu0 %v5110_v62  ;;  %2488 = vmatpush1.bf16.msra.mxu1 %v5112_v29 }
 0x8e7   :  { %2448 = vmatprep.subr.bf16.mxu0 %v5118_v52  ;;  %2489 = vmatprep.subr.bf16.mxu1 %v5120_v54 }
 0x8ea   :  { %2449 = vmatpush1.bf16.msra.mxu0 %v5122_v55  ;;  %2490 = vmatpush1.bf16.msra.mxu1 %v5124_v56 }
 0x8eb   :  { %2450 = vmatprep.subr.bf16.mxu0 %v5130_v57  ;;  %2491 = vmatprep.subr.bf16.mxu1 %v5132_v58 }
 0x8ee   :  { %2451 = vmatpush1.bf16.msra.mxu0 %v5134_v59  ;;  %2492 = vmatpush1.bf16.msra.mxu1 %v5136_v60 }
 0x8ef   :  { %2452 = vmatprep.subr.bf16.mxu0 %v5142_v47  ;;  %2493 = vmatprep.subr.bf16.mxu1 %v5144_v49 }
 0x8f2   :  { %2453 = vmatpush1.bf16.msra.mxu0 %v5146_v50  ;;  %2494 = vmatpush1.bf16.msra.mxu1 %v5148_v10 }
 0x8f3   :  { %2454 = vmatprep.subr.bf16.mxu0 %v5154_v15  ;;  %2495 = vmatprep.subr.bf16.mxu1 %v5156_v14 }
 0x8f6   :  { %2455 = vmatpush1.bf16.msra.mxu0 %v5158_v16  ;;  %2496 = vmatpush1.bf16.msra.mxu1 %v5160_v36 }
 0x8f7   :  { %2559 = vmatprep.subr.bf16.mxu0 %v5070_v25  ;;  %2600 = vmatprep.subr.bf16.mxu1 %v5072_v13 }
 0x9a4   :  { %v5260_v19 = vpop.f32.mrb[60].mxu0  ;;  %v5262_v4 = vpop.f32.mrb[60].mxu1 }
 0x9a5   :  { %5742 = vst [vmem:[#allocation39_spill] sm:$0xff] %v5260_v19  ;;  %5743 = vst [vmem:[#allocation40_spill] sm:$0xff] %v5262_v4  ;;  %v5264_v7 = vpop.f32.mrb[61].mxu0  ;;  %v5266_v31 = vpop.f32.mrb[61].mxu1 }
 0x9a6   :  { %5744 = vst [vmem:[#allocation41_spill] sm:$0xff] %v5264_v7  ;;  %5745 = vst [vmem:[#allocation42_spill] sm:$0xff] %v5266_v31  ;;  %v5268_v0 = vpop.f32.mrb[62].mxu0  ;;  %v5270_v42 = vpop.f32.mrb[62].mxu1  ;;  %v5753_v7 = vsub.s32 1, %v5748_v51 }
 0x9a7   :  { %5746 = vst [vmem:[#allocation43_spill] sm:$0xff] %v5268_v0  ;;  %5747 = vst [vmem:[#allocation44_spill] sm:$0xff] %v5270_v42  ;;  %v5280_v53 = vpop.f32.mrb[63].mxu0  ;;  %v5282_v19 = vpop.f32.mrb[63].mxu1  ;;  %v5754_v0 = vsub.s32 3, %v5748_v51  ;;  %v2050_v42 = vadd.f32 %v5175_v17, %v5278_v38 }
 0x9a8   :  { %5751 = vst [vmem:[#allocation23_spill] sm:$0xff] %v5280_v53  ;;  %5752 = vst [vmem:[#allocation45_spill] sm:$0xff] %v5282_v19  ;;  %v5286_v4 = vrot.slane %v1760_v37, %v5753_v7 }
 0x9a9   :  { %v5290_v31 = vrot.slane %v1760_v37, %v5754_v0 }
 0x9aa   :  { %v1979_v39 = vadd.f32 %v5177_v8, %v5286_v4 }
 0x9ab   :  { %v2052_v19 = vadd.f32 %v5179_v9, %v5290_v31 }
 0x9ac   :  { %v2355_v53 = vpop.f32.mrb[64].mxu0  ;;  %v2396_v30 = vpop.f32.mrb[64].mxu1 }
 0x9ad   :  { %v2403_v7 = vadd.f32 %v2355_v53, %v1977_v41  ;;  %v2405_v22 = vadd.f32 %v2396_v30, %v2050_v42  ;;  %v2357_v27 = vpop.f32.mrb[65].mxu0  ;;  %v2398_v51 = vpop.f32.mrb[65].mxu1 }
 0x9ae   :  { %v2404_v37 = vadd.f32 %v2357_v27, %v1979_v39  ;;  %v2406_v0 = vadd.f32 %v2398_v51, %v2052_v19  ;;  %v2359_v35 = vpop.f32.mrb[66].mxu0  ;;  %v2400_v46 = vpop.f32.mrb[66].mxu1  ;;  %v1983_v51 = vadd.f32 %v5185_v33, %v5286_v4 }
 0x9af   :  { %v3543_v18 = vmul.f32 -1.442695, %v2403_v7  ;;  %v2360_v3 = vpop.f32.mrb[67].mxu0  ;;  %v2401_v2 = vpop.f32.mrb[67].mxu1 }
 0x9b0   :  { %v3544_v17 = vmul.f32 -1.442695, %v2404_v37  ;;  %v3545_v8 = vmul.f32 -1.442695, %v2406_v0  ;;  %v2056_v37 = vadd.f32 %v5187_v61, %v5290_v31 }
 0x9b1   :  { %3985 = vpow2.f32 %v3543_v18 }
 0x9b2   :  { %3987 = vpow2.f32 %v3544_v17 }
 0x9b3   :  { %3989 = vpow2.f32 %v3545_v8 }
 0x9b4   :  { %3991 = vtanh.f32 %v2405_v22  ;;  %v2054_v22 = vadd.f32 %v5183_v21, %v5278_v38 }
 0x9bb   :  { %v3986_v1 = vpop.eup %3985 }
 0x9bc   :  { %v3988_v63 = vpop.eup %3987  ;;  %v2410_v9 = vadd.f32 1.0, %v3986_v1 }
 0x9bd   :  { %v2416_v53 = vadd.f32 1.0, %v3988_v63  ;;  %v3990_v30 = vpop.eup %3989  ;;  %v1981_v63 = vadd.f32 %v5181_v6, %v5274_v40 }
 0x9be   :  { %3993 = vrcp.f32 %v2410_v9  ;;  %v3992_v27 = vpop.eup %3991  ;;  %v2423_v19 = vadd.f32 1.0, %v3990_v30 }
 0x9bf   :  { %3995 = vrcp.f32 %v2416_v53 }
 0x9c0   :  { %3997 = vrcp.f32 %v2423_v19 }
 0x9c8   :  { %v3994_v42 = vpop.eup %3993 }
 0x9c9   :  { %v3996_v35 = vpop.eup %3995  ;;  %v2428_v46 = vmul.f32 %v3994_v42, %v3992_v27 }
 0x9ca   :  { %v2427_v3 = vmul.f32 0.0, %v3996_v35  ;;  %v3998_v41 = vpop.eup %3997 }
 0x9cc   :  { %v5300_v2 = vadd.f32 %v2428_v46, %v2427_v3 }
 0x9ce   :  { %3999 = vtanh.f32 %v5300_v2 }
 0x9d8   :  { %v4000_v39 = vpop.eup %3999 }
 0x9d9   :  { %v2431_v1 = vmul.f32 %v4000_v39, %v3998_v41 }
 0x9db   :  { %v2439_v7 = vpack.c.bf16 %v2431_v1, %v2431_v1 }
 0x9dd   :  { %2473 = vmatmul.mubr.bf16.vlgmr.msra.gmra.mrb[68].mxu0 %v2439_v7  ;;  %2514 = vmatmul.mubr.bf16.vlgmr.msra.gmra.mrb[68].mxu1 %v2439_v7 }
 0x9de   :  { %2560 = vmatpush1.bf16.msra.mxu0 %v5074_v12  ;;  %2601 = vmatpush1.bf16.msra.mxu1 %v5076_v23 }
 0x9df   :  { %2561 = vmatprep.subr.bf16.mxu0 %v5082_v24  ;;  %2602 = vmatprep.subr.bf16.mxu1 %v5084_v5 }
 0x9e0   :  { %2591 = vmatprep.mubr.bf16.mxu0 %v5704_v11  ;;  %2632 = vmatprep.mubr.bf16.mxu1 %v5704_v11 }
 0x9e2   :  { %2562 = vmatpush1.bf16.msra.mxu0 %v5086_v43  ;;  %2603 = vmatpush1.bf16.msra.mxu1 %v5088_v45 }
 0x9e3   :  { %2563 = vmatprep.subr.bf16.mxu0 %v5094_v20  ;;  %2604 = vmatprep.subr.bf16.mxu1 %v5096_v34 }
 0x9e6   :  { %2564 = vmatpush1.bf16.msra.mxu0 %v5098_v26  ;;  %2605 = vmatpush1.bf16.msra.mxu1 %v5100_v28 }
 0x9e7   :  { %2565 = vmatprep.subr.bf16.mxu0 %v5106_v32  ;;  %2606 = vmatprep.subr.bf16.mxu1 %v5108_v44 }
 0x9ea   :  { %2566 = vmatpush1.bf16.msra.mxu0 %v5110_v62  ;;  %2607 = vmatpush1.bf16.msra.mxu1 %v5112_v29 }
 0x9eb   :  { %2567 = vmatprep.subr.bf16.mxu0 %v5118_v52  ;;  %2608 = vmatprep.subr.bf16.mxu1 %v5120_v54 }
 0x9ee   :  { %2568 = vmatpush1.bf16.msra.mxu0 %v5122_v55  ;;  %2609 = vmatpush1.bf16.msra.mxu1 %v5124_v56 }
 0x9ef   :  { %2569 = vmatprep.subr.bf16.mxu0 %v5130_v57  ;;  %2610 = vmatprep.subr.bf16.mxu1 %v5132_v58 }
 0x9f2   :  { %2570 = vmatpush1.bf16.msra.mxu0 %v5134_v59  ;;  %2611 = vmatpush1.bf16.msra.mxu1 %v5136_v60 }
 0x9f3   :  { %2571 = vmatprep.subr.bf16.mxu0 %v5142_v47  ;;  %2612 = vmatprep.subr.bf16.mxu1 %v5144_v49 }
 0x9f6   :  { %2572 = vmatpush1.bf16.msra.mxu0 %v5146_v50  ;;  %2613 = vmatpush1.bf16.msra.mxu1 %v5148_v10 }
 0x9f7   :  { %2573 = vmatprep.subr.bf16.mxu0 %v5154_v15  ;;  %2614 = vmatprep.subr.bf16.mxu1 %v5156_v14 }
 0x9fa   :  { %2574 = vmatpush1.bf16.msra.mxu0 %v5158_v16  ;;  %2615 = vmatpush1.bf16.msra.mxu1 %v5160_v36 }
 0x9fb   :  { %2678 = vmatprep.subr.bf16.mxu0 %v5070_v25  ;;  %2719 = vmatprep.subr.bf16.mxu1 %v5072_v13 }
 0xab0   :  { %v2474_v0 = vpop.f32.mrb[68].mxu0  ;;  %v2515_v18 = vpop.f32.mrb[68].mxu1 }
 0xab1   :  { %v2522_v17 = vadd.f32 %v2474_v0, %v1981_v63  ;;  %v2524_v8 = vadd.f32 %v2515_v18, %v2054_v22  ;;  %v2476_v9 = vpop.f32.mrb[69].mxu0  ;;  %v2517_v53 = vpop.f32.mrb[69].mxu1 }
 0xab2   :  { %v2523_v30 = vadd.f32 %v2476_v9, %v1983_v51  ;;  %v2525_v27 = vadd.f32 %v2517_v53, %v2056_v37  ;;  %v2478_v42 = vpop.f32.mrb[70].mxu0  ;;  %v2519_v35 = vpop.f32.mrb[70].mxu1 }
 0xab3   :  { %v3546_v6 = vmul.f32 -1.442695, %v2522_v17  ;;  %v2479_v46 = vpop.f32.mrb[71].mxu0  ;;  %v2520_v19 = vpop.f32.mrb[71].mxu1  ;;  %v5756_v42 = vld [vmem:[#allocation25_spill] sm:$0xff] }
 0xab4   :  { %v3547_v21 = vmul.f32 -1.442695, %v2523_v30  ;;  %v3548_v33 = vmul.f32 -1.442695, %v2525_v27  ;;  %v5755_v30 = vld [vmem:[#allocation24_spill] sm:$0xff]  ;;  %v1989_v35 = vadd.f32 %v5756_v42, %v5286_v4 }
 0xab5   :  { %4001 = vpow2.f32 %v3546_v6  ;;  %v2060_v27 = vadd.f32 %v5755_v30, %v5278_v38  ;;  %v5757_v6 = vld [vmem:[#allocation26_spill] sm:$0xff] }
 0xab6   :  { %4003 = vpow2.f32 %v3547_v21  ;;  %v2062_v46 = vadd.f32 %v5757_v6, %v5290_v31 }
 0xab7   :  { %4005 = vpow2.f32 %v3548_v33 }
 0xab8   :  { %4007 = vtanh.f32 %v2524_v8 }
 0xabf   :  { %v4002_v3 = vpop.eup %4001 }
 0xac0   :  { %v4004_v41 = vpop.eup %4003  ;;  %v2529_v61 = vadd.f32 1.0, %v4002_v3 }
 0xac1   :  { %v2535_v39 = vadd.f32 1.0, %v4004_v41  ;;  %v4006_v1 = vpop.eup %4005 }
 0xac2   :  { %4009 = vrcp.f32 %v2529_v61  ;;  %v4008_v7 = vpop.eup %4007  ;;  %v2542_v37 = vadd.f32 1.0, %v4006_v1 }
 0xac3   :  { %4011 = vrcp.f32 %v2535_v39 }
 0xac4   :  { %4013 = vrcp.f32 %v2542_v37 }
 0xacc   :  { %v4010_v63 = vpop.eup %4009 }
 0xacd   :  { %v4012_v22 = vpop.eup %4011  ;;  %v2547_v51 = vmul.f32 %v4010_v63, %v4008_v7 }
 0xace   :  { %v2546_v0 = vmul.f32 %v4012_v22, %v5300_v2  ;;  %v4014_v17 = vpop.eup %4013  ;;  %v1987_v2 = vadd.f32 %v5189_v48, %v5274_v40 }
 0xad0   :  { %v5346_v18 = vadd.f32 %v2547_v51, %v2546_v0 }
 0xad2   :  { %4015 = vtanh.f32 %v5346_v18 }
 0xadc   :  { %v4016_v9 = vpop.eup %4015 }
 0xadd   :  { %v2550_v53 = vmul.f32 %v4016_v9, %v4014_v17 }
 0xadf   :  { %v2558_v8 = vpack.c.bf16 %v2550_v53, %v2550_v53 }
 0xae1   :  { %2592 = vmatmul.mubr.bf16.vlgmr.msra.gmra.mrb[72].mxu0 %v2558_v8  ;;  %2633 = vmatmul.mubr.bf16.vlgmr.msra.gmra.mrb[72].mxu1 %v2558_v8 }
 0xae2   :  { %2679 = vmatpush1.bf16.msra.mxu0 %v5074_v12  ;;  %2720 = vmatpush1.bf16.msra.mxu1 %v5076_v23 }
 0xae3   :  { %2680 = vmatprep.subr.bf16.mxu0 %v5082_v24  ;;  %2721 = vmatprep.subr.bf16.mxu1 %v5084_v5 }
 0xae4   :  { %2710 = vmatprep.mubr.bf16.mxu0 %v5704_v11  ;;  %2751 = vmatprep.mubr.bf16.mxu1 %v5704_v11 }
 0xae6   :  { %2681 = vmatpush1.bf16.msra.mxu0 %v5086_v43  ;;  %2722 = vmatpush1.bf16.msra.mxu1 %v5088_v45 }
 0xae7   :  { %2682 = vmatprep.subr.bf16.mxu0 %v5094_v20  ;;  %2723 = vmatprep.subr.bf16.mxu1 %v5096_v34 }
 0xaea   :  { %2683 = vmatpush1.bf16.msra.mxu0 %v5098_v26  ;;  %2724 = vmatpush1.bf16.msra.mxu1 %v5100_v28 }
 0xaeb   :  { %2684 = vmatprep.subr.bf16.mxu0 %v5106_v32  ;;  %2725 = vmatprep.subr.bf16.mxu1 %v5108_v44 }
 0xaee   :  { %2685 = vmatpush1.bf16.msra.mxu0 %v5110_v62  ;;  %2726 = vmatpush1.bf16.msra.mxu1 %v5112_v29 }
 0xaef   :  { %2686 = vmatprep.subr.bf16.mxu0 %v5118_v52  ;;  %2727 = vmatprep.subr.bf16.mxu1 %v5120_v54 }
 0xaf2   :  { %2687 = vmatpush1.bf16.msra.mxu0 %v5122_v55  ;;  %2728 = vmatpush1.bf16.msra.mxu1 %v5124_v56 }
 0xaf3   :  { %2688 = vmatprep.subr.bf16.mxu0 %v5130_v57  ;;  %2729 = vmatprep.subr.bf16.mxu1 %v5132_v58 }
 0xaf6   :  { %2689 = vmatpush1.bf16.msra.mxu0 %v5134_v59  ;;  %2730 = vmatpush1.bf16.msra.mxu1 %v5136_v60 }
 0xaf7   :  { %2690 = vmatprep.subr.bf16.mxu0 %v5142_v47  ;;  %2731 = vmatprep.subr.bf16.mxu1 %v5144_v49 }
 0xafa   :  { %2691 = vmatpush1.bf16.msra.mxu0 %v5146_v50  ;;  %2732 = vmatpush1.bf16.msra.mxu1 %v5148_v10 }
 0xafb   :  { %2692 = vmatprep.subr.bf16.mxu0 %v5154_v15  ;;  %2733 = vmatprep.subr.bf16.mxu1 %v5156_v14 }
 0xafe   :  { %2693 = vmatpush1.bf16.msra.mxu0 %v5158_v16  ;;  %2734 = vmatpush1.bf16.msra.mxu1 %v5160_v36 }
 0xaff   :  { %2797 = vmatprep.subr.bf16.mxu0 %v5070_v25  ;;  %2838 = vmatprep.subr.bf16.mxu1 %v5072_v13 }
 0xbb4   :  { %v2593_v19 = vpop.f32.mrb[72].mxu0  ;;  %v2634_v21 = vpop.f32.mrb[72].mxu1 }
 0xbb5   :  { %v2641_v33 = vadd.f32 %v2593_v19, %v1987_v2  ;;  %v2643_v3 = vadd.f32 %v2634_v21, %v2060_v27  ;;  %v2595_v41 = vpop.f32.mrb[73].mxu0  ;;  %v2636_v61 = vpop.f32.mrb[73].mxu1 }
 0xbb6   :  { %v2642_v39 = vadd.f32 %v2595_v41, %v1989_v35  ;;  %v2644_v1 = vadd.f32 %v2636_v61, %v2062_v46  ;;  %v2597_v7 = vpop.f32.mrb[74].mxu0  ;;  %v2638_v63 = vpop.f32.mrb[74].mxu1 }
 0xbb7   :  { %v3549_v48 = vmul.f32 -1.442695, %v2641_v33  ;;  %v2598_v22 = vpop.f32.mrb[75].mxu0  ;;  %v2639_v51 = vpop.f32.mrb[75].mxu1  ;;  %v5760_v7 = vld [vmem:[#allocation29_spill] sm:$0xff] }
 0xbb8   :  { %v3550_v37 = vmul.f32 -1.442695, %v2642_v39  ;;  %v3551_v0 = vmul.f32 -1.442695, %v2644_v1  ;;  %v5759_v39 = vld [vmem:[#allocation28_spill] sm:$0xff]  ;;  %v1993_v63 = vadd.f32 %v5760_v7, %v5286_v4 }
 0xbb9   :  { %4017 = vpow2.f32 %v3549_v48  ;;  %v2064_v1 = vadd.f32 %v5759_v39, %v5278_v38  ;;  %v5761_v48 = vld [vmem:[#allocation30_spill] sm:$0xff] }
 0xbba   :  { %4019 = vpow2.f32 %v3550_v37  ;;  %v2066_v22 = vadd.f32 %v5761_v48, %v5290_v31 }
 0xbbb   :  { %4021 = vpow2.f32 %v3551_v0 }
 0xbbc   :  { %4023 = vtanh.f32 %v2643_v3 }
 0xbc3   :  { %v4018_v17 = vpop.eup %4017 }
 0xbc4   :  { %v4020_v9 = vpop.eup %4019  ;;  %v2648_v53 = vadd.f32 1.0, %v4018_v17 }
 0xbc5   :  { %v2654_v8 = vadd.f32 1.0, %v4020_v9  ;;  %v4022_v2 = vpop.eup %4021 }
 0xbc6   :  { %4025 = vrcp.f32 %v2648_v53  ;;  %v4024_v30 = vpop.eup %4023  ;;  %v2661_v6 = vadd.f32 1.0, %v4022_v2 }
 0xbc7   :  { %4027 = vrcp.f32 %v2654_v8 }
 0xbc8   :  { %4029 = vrcp.f32 %v2661_v6 }
 0xbd0   :  { %v4026_v27 = vpop.eup %4025 }
 0xbd1   :  { %v4028_v42 = vpop.eup %4027  ;;  %v2666_v35 = vmul.f32 %v4026_v27, %v4024_v30 }
 0xbd2   :  { %v2665_v46 = vmul.f32 %v4028_v42, %v5346_v18  ;;  %v4030_v21 = vpop.eup %4029  ;;  %v5758_v18 = vld [vmem:[#allocation27_spill] sm:$0xff] }
 0xbd3   :  { %v1991_v61 = vadd.f32 %v5758_v18, %v5274_v40 }
 0xbd4   :  { %v5392_v19 = vadd.f32 %v2666_v35, %v2665_v46 }
 0xbd6   :  { %4031 = vtanh.f32 %v5392_v19 }
 0xbe0   :  { %v4032_v33 = vpop.eup %4031 }
 0xbe1   :  { %v2669_v41 = vmul.f32 %v4032_v33, %v4030_v21 }
 0xbe3   :  { %v2677_v3 = vpack.c.bf16 %v2669_v41, %v2669_v41 }
 0xbe5   :  { %2711 = vmatmul.mubr.bf16.vlgmr.msra.gmra.mrb[76].mxu0 %v2677_v3  ;;  %2752 = vmatmul.mubr.bf16.vlgmr.msra.gmra.mrb[76].mxu1 %v2677_v3 }
 0xbe6   :  { %2798 = vmatpush1.bf16.msra.mxu0 %v5074_v12  ;;  %2839 = vmatpush1.bf16.msra.mxu1 %v5076_v23 }
 0xbe7   :  { %2799 = vmatprep.subr.bf16.mxu0 %v5082_v24  ;;  %2840 = vmatprep.subr.bf16.mxu1 %v5084_v5 }
 0xbe8   :  { %2829 = vmatprep.mubr.bf16.mxu0 %v5704_v11  ;;  %2870 = vmatprep.mubr.bf16.mxu1 %v5704_v11 }
 0xbea   :  { %2800 = vmatpush1.bf16.msra.mxu0 %v5086_v43  ;;  %2841 = vmatpush1.bf16.msra.mxu1 %v5088_v45 }
 0xbeb   :  { %2801 = vmatprep.subr.bf16.mxu0 %v5094_v20  ;;  %2842 = vmatprep.subr.bf16.mxu1 %v5096_v34 }
 0xbee   :  { %2802 = vmatpush1.bf16.msra.mxu0 %v5098_v26  ;;  %2843 = vmatpush1.bf16.msra.mxu1 %v5100_v28 }
 0xbef   :  { %2803 = vmatprep.subr.bf16.mxu0 %v5106_v32  ;;  %2844 = vmatprep.subr.bf16.mxu1 %v5108_v44 }
 0xbf2   :  { %2804 = vmatpush1.bf16.msra.mxu0 %v5110_v62  ;;  %2845 = vmatpush1.bf16.msra.mxu1 %v5112_v29 }
 0xbf3   :  { %2805 = vmatprep.subr.bf16.mxu0 %v5118_v52  ;;  %2846 = vmatprep.subr.bf16.mxu1 %v5120_v54 }
 0xbf6   :  { %2806 = vmatpush1.bf16.msra.mxu0 %v5122_v55  ;;  %2847 = vmatpush1.bf16.msra.mxu1 %v5124_v56 }
 0xbf7   :  { %2807 = vmatprep.subr.bf16.mxu0 %v5130_v57  ;;  %2848 = vmatprep.subr.bf16.mxu1 %v5132_v58 }
 0xbfa   :  { %2808 = vmatpush1.bf16.msra.mxu0 %v5134_v59  ;;  %2849 = vmatpush1.bf16.msra.mxu1 %v5136_v60 }
 0xbfb   :  { %2809 = vmatprep.subr.bf16.mxu0 %v5142_v47  ;;  %2850 = vmatprep.subr.bf16.mxu1 %v5144_v49 }
 0xbfe   :  { %2810 = vmatpush1.bf16.msra.mxu0 %v5146_v50  ;;  %2851 = vmatpush1.bf16.msra.mxu1 %v5148_v10 }
 0xbff   :  { %2811 = vmatprep.subr.bf16.mxu0 %v5154_v15  ;;  %2852 = vmatprep.subr.bf16.mxu1 %v5156_v14 }
 0xc02   :  { %2812 = vmatpush1.bf16.msra.mxu0 %v5158_v16  ;;  %2853 = vmatpush1.bf16.msra.mxu1 %v5160_v36 }
 0xc03   :  { %2916 = vmatprep.subr.bf16.mxu0 %v5070_v25  ;;  %2957 = vmatprep.subr.bf16.mxu1 %v5072_v13 }
 0xcb8   :  { %v2712_v51 = vpop.f32.mrb[76].mxu0  ;;  %v2753_v37 = vpop.f32.mrb[76].mxu1 }
 0xcb9   :  { %v2760_v0 = vadd.f32 %v2712_v51, %v1991_v61  ;;  %v2762_v17 = vadd.f32 %v2753_v37, %v2064_v1  ;;  %v2714_v9 = vpop.f32.mrb[77].mxu0  ;;  %v2755_v53 = vpop.f32.mrb[77].mxu1 }
 0xcba   :  { %v2761_v8 = vadd.f32 %v2714_v9, %v1993_v63  ;;  %v2763_v2 = vadd.f32 %v2755_v53, %v2066_v22  ;;  %v2716_v30 = vpop.f32.mrb[78].mxu0  ;;  %v2757_v27 = vpop.f32.mrb[78].mxu1 }
 0xcbb   :  { %v3552_v42 = vmul.f32 -1.442695, %v2760_v0  ;;  %v2717_v35 = vpop.f32.mrb[79].mxu0  ;;  %v2758_v6 = vpop.f32.mrb[79].mxu1 }
 0xcbc   :  { %v3553_v46 = vmul.f32 -1.442695, %v2761_v8  ;;  %v3554_v21 = vmul.f32 -1.442695, %v2763_v2  ;;  %v5487_v35 = vld [vmem:[#allocation11 + $0x100] ss:$16 sps:$4 sm:$0xff]  }
 0xcbd   :  { %4033 = vpow2.f32 %v3552_v42  ;;  %v5490_v6 = vld [vmem:[#allocation11 + $0x108] ss:$16 sps:$4 sm:$0xff]  }
 0xcbe   :  { %4035 = vpow2.f32 %v3553_v46  ;;  %v5493_v46 = vld [vmem:[#allocation11 + $0x124] ss:$16 sps:$4 sm:$0xff]  }
 0xcbf   :  { %4037 = vpow2.f32 %v3554_v21  ;;  %v5496_v21 = vld [vmem:[#allocation11 + $0x12c] ss:$16 sps:$4 sm:$0xff]  }
 0xcc0   :  { %4039 = vtanh.f32 %v2762_v17 }
 0xcc7   :  { %v4034_v33 = vpop.eup %4033 }
 0xcc8   :  { %v4036_v41 = vpop.eup %4035  ;;  %v2767_v3 = vadd.f32 1.0, %v4034_v33  ;;  %v5501_v33 = vld [vmem:[#allocation11 + $0x120] ss:$16 sps:$4 sm:$0xff]  }
 0xcc9   :  { %v2773_v18 = vadd.f32 1.0, %v4036_v41  ;;  %v4038_v61 = vpop.eup %4037  ;;  %v5504_v41 = vld [vmem:[#allocation11 + $0x128] ss:$16 sps:$4 sm:$0xff]  }
 0xcca   :  { %4041 = vrcp.f32 %v2767_v3  ;;  %v4040_v39 = vpop.eup %4039  ;;  %v2780_v48 = vadd.f32 1.0, %v4038_v61  ;;  %v5507_v3 = vld [vmem:[#allocation11 + $0x144] ss:$16 sps:$4 sm:$0xff]   ;;  %v5513_v61 = vld [vmem:[#allocation11 + $0x140] ss:$16 sps:$4 sm:$0xff]  }
 0xccb   :  { %4043 = vrcp.f32 %v2773_v18  ;;  %v5510_v18 = vld [vmem:[#allocation11 + $0x14c] ss:$16 sps:$4 sm:$0xff]  }
 0xccc   :  { %4045 = vrcp.f32 %v2780_v48  ;;  %v5528_v48 = vld [vmem:[#allocation11 + $0x168] ss:$16 sps:$4 sm:$0xff]  }
 0xcd4   :  { %v4042_v1 = vpop.eup %4041 }
 0xcd5   :  { %v4044_v7 = vpop.eup %4043  ;;  %v2785_v63 = vmul.f32 %v4042_v1, %v4040_v39  ;;  %v5516_v39 = vld [vmem:[#allocation11 + $0x148] ss:$16 sps:$4 sm:$0xff]   ;;  %v5519_v1 = vld [vmem:[#allocation11 + $0x164] ss:$16 sps:$4 sm:$0xff]  }
 0xcd6   :  { %v2784_v22 = vmul.f32 %v4044_v7, %v5392_v19  ;;  %v4046_v37 = vpop.eup %4045  ;;  %v5522_v7 = vld [vmem:[#allocation11 + $0x16c] ss:$16 sps:$4 sm:$0xff]  }
 0xcd8   :  { %v5438_v51 = vadd.f32 %v2785_v63, %v2784_v22  ;;  %v5525_v63 = vld [vmem:[#allocation11 + $0x160] ss:$16 sps:$4 sm:$0xff]   ;;  %v5531_v22 = vld [vmem:[#allocation11 + $0x184] ss:$16 sps:$4 sm:$0xff]  }
 0xcda   :  { %4047 = vtanh.f32 %v5438_v51 }
 0xce4   :  { %v4048_v0 = vpop.eup %4047 }
 0xce5   :  { %v2788_v9 = vmul.f32 %v4048_v0, %v4046_v37  ;;  %v5537_v37 = vld [vmem:[#allocation11 + $0x180] ss:$16 sps:$4 sm:$0xff]   ;;  %v5540_v0 = vld [vmem:[#allocation11 + $0x188] ss:$16 sps:$4 sm:$0xff]  }
 0xce7   :  { %v2796_v17 = vpack.c.bf16 %v2788_v9, %v2788_v9  ;;  %v5543_v9 = vld [vmem:[#allocation11 + $0x1a4] ss:$16 sps:$4 sm:$0xff]  }
 0xce9   :  { %2830 = vmatmul.mubr.bf16.vlgmr.msra.gmra.mrb[80].mxu0 %v2796_v17  ;;  %2871 = vmatmul.mubr.bf16.vlgmr.msra.gmra.mrb[80].mxu1 %v2796_v17  ;;  %v5546_v17 = vld [vmem:[#allocation11 + $0x1ac] ss:$16 sps:$4 sm:$0xff]  }
 0xcea   :  { %2917 = vmatpush1.bf16.msra.mxu0 %v5074_v12  ;;  %2958 = vmatpush1.bf16.msra.mxu1 %v5076_v23  ;;  %v5762_v12 = vld [vmem:[#allocation31_spill] sm:$0xff] }
 0xceb   :  { %2918 = vmatprep.subr.bf16.mxu0 %v5082_v24  ;;  %2959 = vmatprep.subr.bf16.mxu1 %v5084_v5  ;;  %v1997_v23 = vadd.f32 %v5762_v12, %v5274_v40  ;;  %v5763_v24 = vld [vmem:[#allocation32_spill] sm:$0xff] }
 0xcec   :  { %2948 = vmatprep.mubr.bf16.mxu0 %v5704_v11  ;;  %2989 = vmatprep.mubr.bf16.mxu1 %v5704_v11  ;;  %v2070_v5 = vadd.f32 %v5763_v24, %v5278_v38  ;;  %v5549_v12 = vld [vmem:[#allocation11 + $0x1a0] ss:$16 sps:$4 sm:$0xff]   ;;  %v5555_v24 = vld [vmem:[#allocation11 + $0x1c4] ss:$16 sps:$4 sm:$0xff]  }
 0xcee   :  { %2919 = vmatpush1.bf16.msra.mxu0 %v5086_v43  ;;  %2960 = vmatpush1.bf16.msra.mxu1 %v5088_v45  ;;  %v5764_v43 = vld [vmem:[#allocation33_spill] sm:$0xff] }
 0xcef   :  { %2920 = vmatprep.subr.bf16.mxu0 %v5094_v20  ;;  %2961 = vmatprep.subr.bf16.mxu1 %v5096_v34  ;;  %v1999_v45 = vadd.f32 %v5764_v43, %v5286_v4  ;;  %v5765_v20 = vld [vmem:[#allocation34_spill] sm:$0xff] }
 0xcf0   :  { %v2072_v34 = vadd.f32 %v5765_v20, %v5290_v31  ;;  %v5561_v43 = vld [vmem:[#allocation11 + $0x1c0] ss:$16 sps:$4 sm:$0xff]   ;;  %v5567_v20 = vld [vmem:[#allocation11 + $0x1e4] ss:$16 sps:$4 sm:$0xff]  }
 0xcf2   :  { %2921 = vmatpush1.bf16.msra.mxu0 %v5098_v26  ;;  %2962 = vmatpush1.bf16.msra.mxu1 %v5100_v28 }
 0xcf3   :  { %2922 = vmatprep.subr.bf16.mxu0 %v5106_v32  ;;  %2963 = vmatprep.subr.bf16.mxu1 %v5108_v44 }
 0xcf6   :  { %2923 = vmatpush1.bf16.msra.mxu0 %v5110_v62  ;;  %2964 = vmatpush1.bf16.msra.mxu1 %v5112_v29 }
 0xcf7   :  { %2924 = vmatprep.subr.bf16.mxu0 %v5118_v52  ;;  %2965 = vmatprep.subr.bf16.mxu1 %v5120_v54 }
 0xcfa   :  { %2925 = vmatpush1.bf16.msra.mxu0 %v5122_v55  ;;  %2966 = vmatpush1.bf16.msra.mxu1 %v5124_v56 }
 0xcfb   :  { %2926 = vmatprep.subr.bf16.mxu0 %v5130_v57  ;;  %2967 = vmatprep.subr.bf16.mxu1 %v5132_v58 }
 0xcfe   :  { %2927 = vmatpush1.bf16.msra.mxu0 %v5134_v59  ;;  %2968 = vmatpush1.bf16.msra.mxu1 %v5136_v60 }
 0xcff   :  { %2928 = vmatprep.subr.bf16.mxu0 %v5142_v47  ;;  %2969 = vmatprep.subr.bf16.mxu1 %v5144_v49 }
 0xd02   :  { %2929 = vmatpush1.bf16.msra.mxu0 %v5146_v50  ;;  %2970 = vmatpush1.bf16.msra.mxu1 %v5148_v10 }
 0xd03   :  { %2930 = vmatprep.subr.bf16.mxu0 %v5154_v15  ;;  %2971 = vmatprep.subr.bf16.mxu1 %v5156_v14 }
 0xd06   :  { %2931 = vmatpush1.bf16.msra.mxu0 %v5158_v16  ;;  %2972 = vmatpush1.bf16.msra.mxu1 %v5160_v36 }
 0xd07   :  { %3035 = vmatprep.subr.bf16.mxu0 %v5070_v25  ;;  %3076 = vmatprep.subr.bf16.mxu1 %v5072_v13 }
 0xdbc   :  { %v2831_v26 = vpop.f32.mrb[80].mxu0  ;;  %v2872_v28 = vpop.f32.mrb[80].mxu1 }
 0xdbd   :  { %v2879_v32 = vadd.f32 %v2831_v26, %v1997_v23  ;;  %v2881_v44 = vadd.f32 %v2872_v28, %v2070_v5  ;;  %v2833_v62 = vpop.f32.mrb[81].mxu0  ;;  %v2874_v25 = vpop.f32.mrb[81].mxu1  ;;  %v5552_v23 = vld [vmem:[#allocation11 + $0x1a8] ss:$16 sps:$4 sm:$0xff]   ;;  %v5558_v5 = vld [vmem:[#allocation11 + $0x1cc] ss:$16 sps:$4 sm:$0xff]  }
 0xdbe   :  { %v2880_v29 = vadd.f32 %v2833_v62, %v1999_v45  ;;  %v2882_v13 = vadd.f32 %v2874_v25, %v2072_v34  ;;  %v2835_v52 = vpop.f32.mrb[82].mxu0  ;;  %v2876_v54 = vpop.f32.mrb[82].mxu1  ;;  %v5564_v45 = vld [vmem:[#allocation11 + $0x1c8] ss:$16 sps:$4 sm:$0xff]   ;;  %v5570_v34 = vld [vmem:[#allocation11 + $0x1ec] ss:$16 sps:$4 sm:$0xff]  }
 0xdbf   :  { %v3555_v55 = vmul.f32 -1.442695, %v2879_v32  ;;  %v2836_v56 = vpop.f32.mrb[83].mxu0  ;;  %v2877_v57 = vpop.f32.mrb[83].mxu1  ;;  %v5573_v26 = vld [vmem:[#allocation11 + $0x1e0] ss:$16 sps:$4 sm:$0xff]  }
 0xdc0   :  { %v3556_v58 = vmul.f32 -1.442695, %v2880_v29  ;;  %v3557_v59 = vmul.f32 -1.442695, %v2882_v13  ;;  %v5576_v28 = vld [vmem:[#allocation11 + $0x1e8] ss:$16 sps:$4 sm:$0xff]  }
 0xdc1   :  { %4049 = vpow2.f32 %v3555_v55  ;;  %v4175_v32 = vld [vmem:[#allocation11 + $0x104] ss:$16 sps:$4 sm:$0xff]   ;;  %v5767_v29 = vld [vmem:[#allocation36_spill] sm:$0xff]  ;;  %v5769_v55 = vld [vmem:[#allocation38_spill] sm:$0xff] }
 0xdc2   :  { %4051 = vpow2.f32 %v3556_v58  ;;  %v5766_v62 = vld [vmem:[#allocation35_spill] sm:$0xff]  ;;  %v2074_v13 = vadd.f32 %v5767_v29, %v5278_v38  ;;  %v5768_v52 = vld [vmem:[#allocation37_spill] sm:$0xff]  ;;  %v2076_v56 = vadd.f32 %v5769_v55, %v5290_v31 }
 0xdc3   :  { %4053 = vpow2.f32 %v3557_v59  ;;  %v2001_v25 = vadd.f32 %v5766_v62, %v5274_v40  ;;  %v2003_v54 = vadd.f32 %v5768_v52, %v5286_v4 }
 0xdc4   :  { %4055 = vtanh.f32 %v2881_v44  ;;  %v4176_v44 = vld [vmem:[#allocation11 + $0x10c] ss:$16 sps:$4 sm:$0xff]  }
 0xdcb   :  { %v4050_v60 = vpop.eup %4049 }
 0xdcc   :  { %v4052_v47 = vpop.eup %4051  ;;  %v2886_v49 = vadd.f32 1.0, %v4050_v60 }
 0xdcd   :  { %v2892_v50 = vadd.f32 1.0, %v4052_v47  ;;  %v4054_v10 = vpop.eup %4053 }
 0xdce   :  { %4057 = vrcp.f32 %v2886_v49  ;;  %v4056_v15 = vpop.eup %4055  ;;  %v2899_v19 = vadd.f32 1.0, %v4054_v10 }
 0xdcf   :  { %4059 = vrcp.f32 %v2892_v50 }
 0xdd0   :  { %4061 = vrcp.f32 %v2899_v19 }
 0xdd8   :  { %v4058_v14 = vpop.eup %4057 }
 0xdd9   :  { %v4060_v16 = vpop.eup %4059  ;;  %v2904_v36 = vmul.f32 %v4058_v14, %v4056_v15 }
 0xdda   :  { %v2903_v53 = vmul.f32 %v4060_v16, %v5438_v51  ;;  %v4062_v2 = vpop.eup %4061  ;;  %v5534_v51 = vld [vmem:[#allocation11 + $0x18c] ss:$16 sps:$4 sm:$0xff]  }
 0xddc   :  { %v5484_v8 = vadd.f32 %v2904_v36, %v2903_v53 }
 0xdde   :  { %4063 = vtanh.f32 %v5484_v8 }
 0xde8   :  { %v4064_v30 = vpop.eup %4063 }
 0xde9   :  { %v2907_v27 = vmul.f32 %v4064_v30, %v4062_v2 }
 0xdeb   :  { %v2915_v42 = vpack.c.bf16 %v2907_v27, %v2907_v27 }
 0xded   :  { %2949 = vmatmul.mubr.bf16.vlgmr.msra.gmra.mrb[84].mxu0 %v2915_v42  ;;  %2990 = vmatmul.mubr.bf16.vlgmr.msra.gmra.mrb[84].mxu1 %v2915_v42 }
 0xdee   :  { %3036 = vmatpush1.bf16.msra.mxu0 %v5487_v35  ;;  %3077 = vmatpush1.bf16.msra.mxu1 %v5490_v6 }
 0xdef   :  { %3037 = vmatprep.subr.bf16.mxu0 %v5493_v46  ;;  %3078 = vmatprep.subr.bf16.mxu1 %v5496_v21 }
 0xdf0   :  { %3067 = vmatprep.mubr.bf16.mxu0 %v5704_v11  ;;  %3108 = vmatprep.mubr.bf16.mxu1 %v5704_v11 }
 0xdf2   :  { %3038 = vmatpush1.bf16.msra.mxu0 %v5501_v33  ;;  %3079 = vmatpush1.bf16.msra.mxu1 %v5504_v41 }
 0xdf3   :  { %3039 = vmatprep.subr.bf16.mxu0 %v5507_v3  ;;  %3080 = vmatprep.subr.bf16.mxu1 %v5510_v18 }
 0xdf6   :  { %3040 = vmatpush1.bf16.msra.mxu0 %v5513_v61  ;;  %3081 = vmatpush1.bf16.msra.mxu1 %v5516_v39 }
 0xdf7   :  { %3041 = vmatprep.subr.bf16.mxu0 %v5519_v1  ;;  %3082 = vmatprep.subr.bf16.mxu1 %v5522_v7 }
 0xdfa   :  { %3042 = vmatpush1.bf16.msra.mxu0 %v5525_v63  ;;  %3083 = vmatpush1.bf16.msra.mxu1 %v5528_v48 }
 0xdfb   :  { %3043 = vmatprep.subr.bf16.mxu0 %v5531_v22  ;;  %3084 = vmatprep.subr.bf16.mxu1 %v5534_v51 }
 0xdfe   :  { %3044 = vmatpush1.bf16.msra.mxu0 %v5537_v37  ;;  %3085 = vmatpush1.bf16.msra.mxu1 %v5540_v0 }
 0xdff   :  { %3045 = vmatprep.subr.bf16.mxu0 %v5543_v9  ;;  %3086 = vmatprep.subr.bf16.mxu1 %v5546_v17 }
 0xe02   :  { %3046 = vmatpush1.bf16.msra.mxu0 %v5549_v12  ;;  %3087 = vmatpush1.bf16.msra.mxu1 %v5552_v23 }
 0xe03   :  { %3047 = vmatprep.subr.bf16.mxu0 %v5555_v24  ;;  %3088 = vmatprep.subr.bf16.mxu1 %v5558_v5 }
 0xe06   :  { %3048 = vmatpush1.bf16.msra.mxu0 %v5561_v43  ;;  %3089 = vmatpush1.bf16.msra.mxu1 %v5564_v45 }
 0xe07   :  { %3049 = vmatprep.subr.bf16.mxu0 %v5567_v20  ;;  %3090 = vmatprep.subr.bf16.mxu1 %v5570_v34 }
 0xe0a   :  { %3050 = vmatpush1.bf16.msra.mxu0 %v5573_v26  ;;  %3091 = vmatpush1.bf16.msra.mxu1 %v5576_v28 }
 0xe0b   :  { %3154 = vmatprep.subr.bf16.mxu0 %v4175_v32  ;;  %3195 = vmatprep.subr.bf16.mxu1 %v4176_v44 }
 0xec0   :  { %v2950_v57 = vpop.f32.mrb[84].mxu0  ;;  %v2991_v58 = vpop.f32.mrb[84].mxu1 }
 0xec1   :  { %v2998_v59 = vadd.f32 %v2950_v57, %v2001_v25  ;;  %v3000_v60 = vadd.f32 %v2991_v58, %v2074_v13  ;;  %v2952_v47 = vpop.f32.mrb[85].mxu0  ;;  %v2993_v49 = vpop.f32.mrb[85].mxu1 }
 0xec2   :  { %v2999_v50 = vadd.f32 %v2952_v47, %v2003_v54  ;;  %v3001_v10 = vadd.f32 %v2993_v49, %v2076_v56  ;;  %v2954_v15 = vpop.f32.mrb[86].mxu0  ;;  %v2995_v14 = vpop.f32.mrb[86].mxu1 }
 0xec3   :  { %v3558_v16 = vmul.f32 -1.442695, %v2998_v59  ;;  %v2955_v36 = vpop.f32.mrb[87].mxu0  ;;  %v2996_v19 = vpop.f32.mrb[87].mxu1 }
 0xec4   :  { %v3559_v53 = vmul.f32 -1.442695, %v2999_v50  ;;  %v3560_v2 = vmul.f32 -1.442695, %v3001_v10  ;;  %v3268_v36 = vld [vmem:[#allocation14] sm:$0xff]  ;;  %v3269_v19 = vld [vmem:[#allocation14 + $0x8] sm:$0xff] }
 0xec5   :  { %4065 = vpow2.f32 %v3558_v16 }
 0xec6   :  { %4067 = vpow2.f32 %v3559_v53  ;;  %v3621_v53 = vpack.c.bf16 %v3269_v19, %v3268_v36  ;;  %v3567_v36 = vld [vmem:[#allocation15] ss:$0 sm:$0xff] }
 0xec7   :  { %4069 = vpow2.f32 %v3560_v2  ;;  %v3270_v2 = vld [vmem:[#allocation14 + $0x10] sm:$0xff] }
 0xec8   :  { %4071 = vtanh.f32 %v3000_v60 }
 0xecf   :  { %v4066_v30 = vpop.eup %4065 }
 0xed0   :  { %v4068_v27 = vpop.eup %4067  ;;  %v3005_v42 = vadd.f32 1.0, %v4066_v30  ;;  %v3271_v30 = vld [vmem:[#allocation14 + $0x18] sm:$0xff] }
 0xed1   :  { %v3011_v32 = vadd.f32 1.0, %v4068_v27  ;;  %v4070_v44 = vpop.eup %4069  ;;  %v3624_v27 = vpack.c.bf16 %v3271_v30, %v3270_v2 }
 0xed2   :  { %4073 = vrcp.f32 %v3005_v42  ;;  %v4072_v62 = vpop.eup %4071  ;;  %v3018_v52 = vadd.f32 1.0, %v4070_v44  ;;  %v3272_v42 = vld [vmem:[#allocation14 + $0x20] sm:$0xff] }
 0xed3   :  { %4075 = vrcp.f32 %v3011_v32  ;;  %v3273_v32 = vld [vmem:[#allocation14 + $0x28] sm:$0xff] }
 0xed4   :  { %4077 = vrcp.f32 %v3018_v52  ;;  %v3627_v44 = vpack.c.bf16 %v3273_v32, %v3272_v42  ;;  %v3277_v52 = vld [vmem:[#allocation14 + $0x48] sm:$0xff] }
 0xedc   :  { %v4074_v25 = vpop.eup %4073 }
 0xedd   :  { %v4076_v29 = vpop.eup %4075  ;;  %v3023_v13 = vmul.f32 %v4074_v25, %v4072_v62  ;;  %v3274_v62 = vld [vmem:[#allocation14 + $0x30] sm:$0xff]  ;;  %v3275_v25 = vld [vmem:[#allocation14 + $0x38] sm:$0xff] }
 0xede   :  { %v3022_v54 = vmul.f32 %v4076_v29, %v5484_v8  ;;  %v4078_v56 = vpop.eup %4077  ;;  %v5771_v8 = vld [vmem:[#allocation39_spill] sm:$0xff]  ;;  %v3630_v29 = vpack.c.bf16 %v3275_v25, %v3274_v62 }
 0xee0   :  { %v5588_v55 = vadd.f32 %v3023_v13, %v3022_v54  ;;  %v3276_v13 = vld [vmem:[#allocation14 + $0x40] sm:$0xff] }
 0xee1   :  { %v3633_v54 = vpack.c.bf16 %v3277_v52, %v3276_v13 }
 0xee2   :  { %4079 = vtanh.f32 %v5588_v55 }
 0xeec   :  { %v4080_v57 = vpop.eup %4079 }
 0xeed   :  { %v3026_v58 = vmul.f32 %v4080_v57, %v4078_v56  ;;  %v3279_v56 = vld [vmem:[#allocation14 + $0x58] sm:$0xff]  ;;  %v3280_v57 = vld [vmem:[#allocation14 + $0x60] sm:$0xff] }
 0xeef   :  { %v3034_v59 = vpack.c.bf16 %v3026_v58, %v3026_v58 }
 0xef1   :  { %3068 = vmatmul.mubr.bf16.vlgmr.msra.gmra.mrb[88].mxu0 %v3034_v59  ;;  %3109 = vmatmul.mubr.bf16.vlgmr.msra.gmra.mrb[88].mxu1 %v3034_v59  ;;  %v3281_v59 = vld [vmem:[#allocation14 + $0x68] sm:$0xff] }
 0xef2   :  { %3155 = vmatpush1.bf16.msra.mxu0 %v5487_v35  ;;  %3196 = vmatpush1.bf16.msra.mxu1 %v5490_v6  ;;  %v2007_v35 = vadd.f32 %v5771_v8, %v5274_v40  ;;  %v5772_v6 = vld [vmem:[#allocation40_spill] sm:$0xff]  ;;  %v4356_v8 = vmov 0.0  }
 0xef3   :  { %3156 = vmatprep.subr.bf16.mxu0 %v5493_v46  ;;  %3197 = vmatprep.subr.bf16.mxu1 %v5496_v21  ;;  %v2080_v46 = vadd.f32 %v5772_v6, %v5278_v38  ;;  %v5773_v21 = vld [vmem:[#allocation41_spill] sm:$0xff]  ;;  %v3282_v6 = vld [vmem:[#allocation14 + $0x70] sm:$0xff] }
 0xef4   :  { %3186 = vmatprep.mubr.bf16.mxu0 %v5704_v11  ;;  %3227 = vmatprep.mubr.bf16.mxu1 %v5704_v11  ;;  %v5770_v11 = vmov 0.0|0.0  }
 0xef6   :  { %3157 = vmatpush1.bf16.msra.mxu0 %v5501_v33  ;;  %3198 = vmatpush1.bf16.msra.mxu1 %v5504_v41  ;;  %v2009_v33 = vadd.f32 %v5773_v21, %v5286_v4  ;;  %v5774_v41 = vld [vmem:[#allocation42_spill] sm:$0xff] }
 0xef7   :  { %3158 = vmatprep.subr.bf16.mxu0 %v5507_v3  ;;  %3199 = vmatprep.subr.bf16.mxu1 %v5510_v18  ;;  %v2082_v3 = vadd.f32 %v5774_v41, %v5290_v31 }
 0xefa   :  { %3159 = vmatpush1.bf16.msra.mxu0 %v5513_v61  ;;  %3200 = vmatpush1.bf16.msra.mxu1 %v5516_v39 }
 0xefb   :  { %3160 = vmatprep.subr.bf16.mxu0 %v5519_v1  ;;  %3201 = vmatprep.subr.bf16.mxu1 %v5522_v7 }
 0xefe   :  { %3161 = vmatpush1.bf16.msra.mxu0 %v5525_v63  ;;  %3202 = vmatpush1.bf16.msra.mxu1 %v5528_v48 }
 0xeff   :  { %3162 = vmatprep.subr.bf16.mxu0 %v5531_v22  ;;  %3203 = vmatprep.subr.bf16.mxu1 %v5534_v51 }
 0xf02   :  { %3163 = vmatpush1.bf16.msra.mxu0 %v5537_v37  ;;  %3204 = vmatpush1.bf16.msra.mxu1 %v5540_v0 }
 0xf03   :  { %3164 = vmatprep.subr.bf16.mxu0 %v5543_v9  ;;  %3205 = vmatprep.subr.bf16.mxu1 %v5546_v17 }
 0xf06   :  { %3165 = vmatpush1.bf16.msra.mxu0 %v5549_v12  ;;  %3206 = vmatpush1.bf16.msra.mxu1 %v5552_v23 }
 0xf07   :  { %3166 = vmatprep.subr.bf16.mxu0 %v5555_v24  ;;  %3207 = vmatprep.subr.bf16.mxu1 %v5558_v5 }
 0xf0a   :  { %3167 = vmatpush1.bf16.msra.mxu0 %v5561_v43  ;;  %3208 = vmatpush1.bf16.msra.mxu1 %v5564_v45 }
 0xf0b   :  { %3168 = vmatprep.subr.bf16.mxu0 %v5567_v20  ;;  %3209 = vmatprep.subr.bf16.mxu1 %v5570_v34 }
 0xf0e   :  { %3169 = vmatpush1.bf16.msra.mxu0 %v5573_v26  ;;  %3210 = vmatpush1.bf16.msra.mxu1 %v5576_v28 }
 0xf0f   :  { %3620 = vmatprep.subr.bf16.mxu0 %v5770_v11 }
 0xfc4   :  { %v3069_v18 = vpop.f32.mrb[88].mxu0  ;;  %v3110_v61 = vpop.f32.mrb[88].mxu1 }
 0xfc5   :  { %v3117_v39 = vadd.f32 %v3069_v18, %v2007_v35  ;;  %v3119_v1 = vadd.f32 %v3110_v61, %v2080_v46  ;;  %v3071_v7 = vpop.f32.mrb[89].mxu0  ;;  %v3112_v63 = vpop.f32.mrb[89].mxu1  ;;  %v3639_v35 = vpack.c.bf16 %v3281_v59, %v3280_v57  ;;  %v3283_v46 = vld [vmem:[#allocation14 + $0x78] sm:$0xff]  ;;  %v5777_v61 = vld [vmem:[#allocation23_spill] sm:$0xff] }
 0xfc6   :  { %v3118_v48 = vadd.f32 %v3071_v7, %v2009_v33  ;;  %v3120_v22 = vadd.f32 %v3112_v63, %v2082_v3  ;;  %v3073_v51 = vpop.f32.mrb[90].mxu0  ;;  %v3114_v37 = vpop.f32.mrb[90].mxu1  ;;  %v3642_v21 = vpack.c.bf16 %v3283_v46, %v3282_v6  ;;  %v5775_v33 = vld [vmem:[#allocation43_spill] sm:$0xff]  ;;  %v5776_v3 = vld [vmem:[#allocation44_spill] sm:$0xff] }
 0xfc7   :  { %v3561_v0 = vmul.f32 -1.442695, %v3117_v39  ;;  %v3074_v9 = vpop.f32.mrb[91].mxu0  ;;  %v3115_v17 = vpop.f32.mrb[91].mxu1  ;;  %v2011_v41 = vadd.f32 %v5775_v33, %v5274_v40  ;;  %v2084_v18 = vadd.f32 %v5776_v3, %v5278_v38  ;;  %v2013_v39 = vadd.f32 %v5777_v61, %v5286_v4 }
 0xfc8   :  { %v3562_v12 = vmul.f32 -1.442695, %v3118_v48  ;;  %v3563_v23 = vmul.f32 -1.442695, %v3120_v22 }
 0xfc9   :  { %4081 = vpow2.f32 %v3561_v0 }
 0xfca   :  { %4083 = vpow2.f32 %v3562_v12 }
 0xfcb   :  { %4085 = vpow2.f32 %v3563_v23 }
 0xfcc   :  { %4087 = vtanh.f32 %v3119_v1  ;;  %v5778_v1 = vld [vmem:[#allocation45_spill] sm:$0xff] }
 0xfcd   :  { %v2086_v7 = vadd.f32 %v5778_v1, %v5290_v31 }
 0xfd3   :  { %v4082_v24 = vpop.eup %4081 }
 0xfd4   :  { %v4084_v5 = vpop.eup %4083  ;;  %v3124_v43 = vadd.f32 1.0, %v4082_v24 }
 0xfd5   :  { %v3130_v45 = vadd.f32 1.0, %v4084_v5  ;;  %v4086_v20 = vpop.eup %4085 }
 0xfd6   :  { %4089 = vrcp.f32 %v3124_v43  ;;  %v4088_v34 = vpop.eup %4087  ;;  %v3137_v47 = vadd.f32 1.0, %v4086_v20 }
 0xfd7   :  { %4091 = vrcp.f32 %v3130_v45 }
 0xfd8   :  { %4093 = vrcp.f32 %v3137_v47 }
 0xfe0   :  { %v4090_v26 = vpop.eup %4089 }
 0xfe1   :  { %v4092_v28 = vpop.eup %4091  ;;  %v3142_v60 = vmul.f32 %v4090_v26, %v4088_v34 }
 0xfe2   :  { %v3141_v49 = vmul.f32 %v4092_v28, %v5588_v55  ;;  %v4094_v10 = vpop.eup %4093  ;;  %v3278_v55 = vld [vmem:[#allocation14 + $0x50] sm:$0xff] }
 0xfe3   :  { %v3636_v58 = vpack.c.bf16 %v3279_v56, %v3278_v55 }
 0xfe4   :  { %v5633_v50 = vadd.f32 %v3142_v60, %v3141_v49 }
 0xfe6   :  { %4095 = vtanh.f32 %v5633_v50 }
 0xff0   :  { %v4096_v15 = vpop.eup %4095 }
 0xff1   :  { %v3145_v14 = vmul.f32 %v4096_v15, %v4094_v10 }
 0xff3   :  { %v3153_v16 = vpack.c.bf16 %v3145_v14, %v3145_v14 }
 0xff5   :  { %3187 = vmatmul.mubr.bf16.vlgmr.msra.gmra.mrb[92].mxu0 %v3153_v16  ;;  %3228 = vmatmul.mubr.bf16.vlgmr.msra.gmra.mrb[92].mxu1 %v3153_v16 }
 0xff6   :  { %3622 = vmatpush3.bf16.msra.mxu0 %v3621_v53  ;;  %3617 = vmatprep.mubr.msk.f32.mxu0 %vm4355_vm0, %v4356_v8 }
 0xff7   :  { %3623 = vmatprep.subr.bf16.mxu0 %v5770_v11 }
 0xffa   :  { %3625 = vmatpush3.bf16.msra.mxu0 %v3624_v27 }
 0xffb   :  { %3626 = vmatprep.subr.bf16.mxu0 %v5770_v11 }
 0xffe   :  { %3628 = vmatpush3.bf16.msra.mxu0 %v3627_v44 }
 0xfff   :  { %3629 = vmatprep.subr.bf16.mxu0 %v5770_v11 }
0x1002   :  { %3631 = vmatpush3.bf16.msra.mxu0 %v3630_v29 }
0x1003   :  { %3632 = vmatprep.subr.bf16.mxu0 %v5770_v11 }
0x1006   :  { %3634 = vmatpush3.bf16.msra.mxu0 %v3633_v54 }
0x1007   :  { %3635 = vmatprep.subr.bf16.mxu0 %v5770_v11 }
0x100a   :  { %3637 = vmatpush3.bf16.msra.mxu0 %v3636_v58 }
0x100b   :  { %3638 = vmatprep.subr.bf16.mxu0 %v5770_v11 }
0x100e   :  { %3640 = vmatpush3.bf16.msra.mxu0 %v3639_v35 }
0x100f   :  { %3641 = vmatprep.subr.bf16.mxu0 %v5770_v11 }
0x1012   :  { %3643 = vmatpush3.bf16.msra.mxu0 %v3642_v21 }
0x10c8   :  { %v3188_v63 = vpop.f32.mrb[92].mxu0  ;;  %v3229_v48 = vpop.f32.mrb[92].mxu1 }
0x10c9   :  { %v3236_v22 = vadd.f32 %v3188_v63, %v2011_v41  ;;  %v3238_v51 = vadd.f32 %v3229_v48, %v2084_v18  ;;  %v3190_v37 = vpop.f32.mrb[93].mxu0  ;;  %v3231_v0 = vpop.f32.mrb[93].mxu1 }
0x10ca   :  { %v3237_v11 = vadd.f32 %v3190_v37, %v2013_v39  ;;  %v3239_v9 = vadd.f32 %v3231_v0, %v2086_v7  ;;  %v3192_v17 = vpop.f32.mrb[94].mxu0  ;;  %v3233_v12 = vpop.f32.mrb[94].mxu1 }
0x10cb   :  { %v3564_v40 = vmul.f32 -1.442695, %v3236_v22  ;;  %v3193_v23 = vpop.f32.mrb[95].mxu0  ;;  %v3234_v24 = vpop.f32.mrb[95].mxu1 }
0x10cc   :  { %v3565_v38 = vmul.f32 -1.442695, %v3237_v11  ;;  %v3566_v4 = vmul.f32 -1.442695, %v3239_v9 }
0x10cd   :  { %4097 = vpow2.f32 %v3564_v40 }
0x10ce   :  { %4099 = vpow2.f32 %v3565_v38 }
0x10cf   :  { %4101 = vpow2.f32 %v3566_v4 }
0x10d0   :  { %4103 = vtanh.f32 %v3238_v51 }
0x10d7   :  { %v4098_v5 = vpop.eup %4097 }
0x10d8   :  { %v4100_v43 = vpop.eup %4099  ;;  %v3243_v31 = vadd.f32 1.0, %v4098_v5 }
0x10d9   :  { %v3249_v45 = vadd.f32 1.0, %v4100_v43  ;;  %v4102_v20 = vpop.eup %4101 }
0x10da   :  { %4105 = vrcp.f32 %v3243_v31  ;;  %v4104_v34 = vpop.eup %4103  ;;  %v3256_v47 = vadd.f32 1.0, %v4102_v20 }
0x10db   :  { %4107 = vrcp.f32 %v3249_v45 }
0x10dc   :  { %4109 = vrcp.f32 %v3256_v47 }
0x10e4   :  { %v4106_v26 = vpop.eup %4105 }
0x10e5   :  { %v4108_v28 = vpop.eup %4107  ;;  %v3261_v60 = vmul.f32 %v4106_v26, %v4104_v34 }
0x10e6   :  { %v3260_v49 = vmul.f32 %v4108_v28, %v5633_v50  ;;  %v4110_v15 = vpop.eup %4109 }
0x10e8   :  { %v3262_v10 = vadd.f32 %v3261_v60, %v3260_v49 }
0x10ea   :  { %4111 = vtanh.f32 %v3262_v10 }
0x10f4   :  { %v4112_v14 = vpop.eup %4111 }
0x10f5   :  { %v3264_v16 = vmul.f32 %v4112_v14, %v4110_v15 }
0x10f7   :  { %3618 = vmatmul.mubr.f32.vlgmr.msra.gmra.mrb[96].mxu0 %v3264_v16 }
0x11ca   :  { %v3357_v19 = vpop.f32.mrb[96].mxu0 }
0x11cb   :  { %v3358_v53 = vadd.f32 %v3567_v36, %v3357_v19  ;;  %v3619_v2 = vpop.f32.mrb[97].mxu0 }
0x11cd   :  { %3361 = vst [vmem:[#allocation17] sm:$0xff] %v3358_v53 }
0x11ce   :  { %4320 = shalt.err (!%p4317_p10)
}
0x11cf   :  { %s4321_s23 = scalar_lea.hbm %s5670_s6, 128 }
0x11d0   :  { %p4322_p11 = scmp.ne.s32.totalorder %s5670_s6, %s4321_s23  ;;  %p4325_p12 = scmp.lt.u32.totalorder %s4321_s23, %s5670_s6 }
0x11d2   :  { %p4327_p13 = pnand %p4325_p12, %p4322_p11 }
0x11d4   :  { %4330 = shalt.err (!%p4327_p13)
}
0x11d5   :  { %3371 = dma.vmem_to_hbm [thread:$0]  %s3369_s25, 128, %s5670_s6, [#allocation8]  }
0x11d6   :  { %4339 = dma.done.wait [#allocation8], 128  }
0x11d7   :  { %4340 = vsyncadd [#allocation8], 4294967168 }
0x11d8   :  { %3375 = vsyncpa [#allocation7], 1 }
0x11d9   :  { %3376 = vsyncpa [#allocation10], 1 }
0x11da   :  { %3377 = vsyncpa [#allocation13], 1 }
0x11db   :  { %3378 = vsyncpa [#allocation16], 1 }
0x11dc   :  { %3379 = vsyncpa [#allocation8], 1 }

</bundles_post_ra>
